<compile_context>
chip_gen: v7x
topology: tpu7x:2x2x1
jax: 0.10.0
libtpu: 0.0.40
codegen_flags: <defaults>
</compile_context>

<pallas_src>
import functools

import jax
import jax.numpy as jnp
import numpy as np
from jax.experimental import pallas as pl
from jax.experimental.pallas import tpu as pltpu

RANK = 32          # args.rank
HEADS = 2          # args.head_num
N_USER = 64        # synthetic user-graph node count
N_SERV = 96        # synthetic serv-graph node count
BATCH = 8
EPS = 1e-5
NEG_SLOPE = 0.2    # DGL GATConv default negative_slope
NEG_INF = -1e30

# bf16 operands for the attention value matmul (native MXU pass).  float32 -> exact path.
VALUE_MM_DTYPE = jnp.bfloat16
TOL = 2e-2 if VALUE_MM_DTYPE == jnp.bfloat16 else 5e-3

# ---------------- static packed-input row offsets (shared by host packer & kernel) ----
# pack32: width-RANK stack of [u_emb | s_emb | w1 | v1(pad8) | w2(pad cols) | v2(pad8)]
P32_UEMB = 0
P32_SEMB = P32_UEMB + N_USER
P32_W1 = P32_SEMB + N_SERV
P32_V1 = P32_W1 + 2 * RANK
P32_W2 = P32_V1 + 8
P32_V2 = P32_W2 + RANK
P32_ROWS = P32_V2 + 8
# gpack: width-(HEADS*RANK) stack, one G_ROWS block per graph (user then serv)
G_W = 0
G_AL = G_W + RANK
G_ART = G_AL + HEADS
G_BIAS = G_ART + HEADS
G_GAMMA = G_BIAS + 1
G_BETA = G_GAMMA + 1
G_ROWS = G_BETA + 2            # + 1 pad row -> 40 (multiple of 8)


# ------------------------------------------------------------------ in-kernel helpers


def _layernorm(x, gamma, beta):
    mu = jnp.mean(x, axis=-1, keepdims=True)
    var = jnp.mean((x - mu) ** 2, axis=-1, keepdims=True)
    return (x - mu) * jax.lax.rsqrt(var + EPS) * gamma + beta


def _gat_graph(gpack_ref, base, emb, adj_bias, n, *, num_heads, rank):
    """Dense GATConv (all heads) + LayerNorm + ELU + head-mean, lane-concatenated layout.

    emb      : (N, R) node features
    gpack_ref: packed graph params; rows [base, base+G_ROWS) belong to this graph
    adj_bias : (N, N) f32 additive mask: 0 on edges (dst,src), -1e30 otherwise
    """
    H, R = num_heads, rank
    HR = H * R
    W = gpack_ref[base + G_W:base + G_W + R, :]              # (R, H*R)  fc weight
    Al = gpack_ref[base + G_AL:base + G_AL + H, :]           # (H, H*R)  attn_l block rows
    ArT = gpack_ref[base + G_ART:base + G_ART + H, :]        # (H, H*R)  attn_r block rows
    bias = gpack_ref[base + G_BIAS:base + G_BIAS + 1, :]     # (1, H*R)
    gamma = gpack_ref[base + G_GAMMA:base + G_GAMMA + 1, :]
    beta = gpack_ref[base + G_BETA:base + G_BETA + 1, :]

    # One fc matmul for all heads; one dot per side for all heads' attention scores.
    fh = jnp.dot(emb, W, preferred_element_type=jnp.float32)                  # (N, H*R)
    el = jax.lax.dot_general(Al, fh, (((1,), (1,)), ((), ())),
                             preferred_element_type=jnp.float32)              # (H, N) rows
    er = jax.lax.dot_general(fh, ArT, (((1,), (1,)), ((), ())),
                             preferred_element_type=jnp.float32)              # (N, H) cols
    # Append a ones column so the value matmul also yields the softmax denominator.
    fh_ext = jnp.concatenate([fh, jnp.ones((n, 1), jnp.float32)], axis=-1)
    fh_ext = fh_ext.astype(VALUE_MM_DTYPE)                                    # (N, H*R+1)

    outs = []
    for hd in range(H):
        e = er[:, hd:hd + 1] + el[hd:hd + 1, :]                               # (N, N) e[dst, src]
        e = jnp.maximum(e, NEG_SLOPE * e) + adj_bias                          # LeakyReLU + edge mask
        p = jnp.exp(e - jnp.max(e, axis=-1, keepdims=True))                   # masked -> underflow to 0
        o = jnp.dot(p.astype(VALUE_MM_DTYPE), fh_ext,
                    preferred_element_type=jnp.float32)                       # (N, H*R+1)
        inv = pl.reciprocal(o[:, HR:HR + 1], approx=True)                     # 1/denom (EUP slot)
        outs.append(o[:, :HR] * inv)                                          # cols [hd*R,(hd+1)*R) valid

    # Lane-concatenated head layout: select each head's valid 32-lane block.
    lane = jax.lax.broadcasted_iota(jnp.int32, (n, HR), 1)
    rst = outs[0]
    for hd in range(1, H):
        rst = jnp.where(lane < hd * R, rst, outs[hd])
    rst = rst + bias                                                          # (N, H*R)

    x = _layernorm(rst, gamma, beta)                                          # LN over H*R feats
    y = jnp.where(x > 0, x, jnp.exp(jnp.minimum(x, 0.0)) - 1.0)               # ELU(alpha=1)
    acc = y[:, :R]                                                            # mean over heads
    for hd in range(1, H):
        acc = acc + y[:, hd * R:(hd + 1) * R]
    return acc * (1.0 / H)                                                    # (N, R)


# ------------------------------------------------------------------ fused kernel


def gatcf_kernel(idx_ref, pack32_ref, gpack_ref, u_adjb_ref, s_adjb_ref, out_ref, *,
                 num_heads, rank, n_user, n_serv, batch):
    R, B = rank, batch

    u_adjb = u_adjb_ref[...].astype(jnp.float32)          # upcast once, hoisted out of head loop
    s_adjb = s_adjb_ref[...].astype(jnp.float32)
    u_emb = pack32_ref[P32_UEMB:P32_UEMB + n_user, :]
    s_emb = pack32_ref[P32_SEMB:P32_SEMB + n_serv, :]

    user_all = _gat_graph(gpack_ref, 0, u_emb, u_adjb, n_user,
                          num_heads=num_heads, rank=R)
    serv_all = _gat_graph(gpack_ref, G_ROWS, s_emb, s_adjb, n_serv,
                          num_heads=num_heads, rank=R)

    # Row gather via one-hot matmuls (keeps everything in VMEM / on the MXU).
    uidx = idx_ref[0:B, :]                                 # (B, 1) int32
    sidx = idx_ref[B:2 * B, :]
    oh_u = (jax.lax.broadcasted_iota(jnp.int32, (B, n_user), 1) == uidx).astype(jnp.float32)
    oh_s = (jax.lax.broadcasted_iota(jnp.int32, (B, n_serv), 1) == sidx).astype(jnp.float32)
    ue = jnp.dot(oh_u, user_all, preferred_element_type=jnp.float32)          # (B, R)
    se = jnp.dot(oh_s, serv_all, preferred_element_type=jnp.float32)          # (B, R)

    # MLP head: Linear(2R->R), LN, ReLU, Linear(R->R/2), LN, ReLU, Linear(R/2->1)
    w1 = pack32_ref[P32_W1:P32_W1 + 2 * R, :]              # (2R, R) = [w1u; w1s]
    v1 = pack32_ref[P32_V1:P32_V1 + 3, :]                  # (3, R)  = [b1; g1; be1]
    h = (jnp.dot(ue, w1[:R, :], preferred_element_type=jnp.float32)
         + jnp.dot(se, w1[R:, :], preferred_element_type=jnp.float32)
         + v1[0:1, :])
    h = _layernorm(h, v1[1:2, :], v1[2:3, :])
    h = jnp.maximum(h, 0.0)

    w2 = pack32_ref[P32_W2:P32_W2 + R, :][:, :R // 2]      # (R, R/2)
    v2 = pack32_ref[P32_V2:P32_V2 + 5, :][:, :R // 2]      # (5, R/2) = [b2; g2; be2; w3^T; b3]
    h = jnp.dot(h, w2, preferred_element_type=jnp.float32) + v2[0:1, :]
    h = _layernorm(h, v2[1:2, :], v2[2:3, :])
    h = jnp.maximum(h, 0.0)
    out_ref[...] = (jnp.sum(h * v2[3:4, :], axis=-1, keepdims=True)
                    + v2[4:5, 0:1])


# ------------------------------------------------------------------ host-side packing & wrapper


def _block_rows(v, heads, rank):
    """(H, R) -> (H, H*R): row h holds v[h] at cols [h*R, (h+1)*R), zeros elsewhere."""
    return (jnp.eye(heads, dtype=v.dtype)[:, :, None] * v[:, None, :]).reshape(heads, heads * rank)


def _pack_inputs(p):
    r, h = RANK, HEADS
    pad_r = lambda x, rows: jnp.pad(x, ((0, rows - x.shape[0]), (0, 0)))
    pad_c = lambda x, cols: jnp.pad(x, ((0, 0), (0, cols - x.shape[1])))

    # width-R pack: embeddings + MLP params
    w1 = jnp.concatenate([p["w1u"], p["w1s"]], axis=0)                        # (2R, R)
    v1 = jnp.concatenate([p["b1"], p["g1"], p["be1"]], axis=0)                # (3, R)
    b3row = jnp.zeros((1, r // 2), jnp.float32).at[0, 0].set(p["b3"][0, 0])
    v2 = jnp.concatenate([p["b2"], p["g2"], p["be2"],
                          jnp.transpose(p["w3"]), b3row], axis=0)             # (5, R/2)
    pack32 = jnp.concatenate([
        p["user_emb"], p["serv_emb"], w1,
        pad_r(v1, 8), pad_c(p["w2"], r), pad_r(pad_c(v2, r), 8)], axis=0)
    assert pack32.shape == (P32_ROWS, r)

    # width-(H*R) pack: both graphs' GAT params
    def graph_block(pre):
        return jnp.concatenate([
            p[pre + "_w"],
            _block_rows(p[pre + "_al"], h, r),
            _block_rows(p[pre + "_ar"], h, r),
            p[pre + "_bias"], p[pre + "_gamma"], p[pre + "_beta"],
            jnp.zeros((1, h * r), jnp.float32)], axis=0)
    gpack = jnp.concatenate([graph_block("u"), graph_block("s")], axis=0)
    assert gpack.shape == (2 * G_ROWS, h * r)

    # additive edge-mask bias, bf16 (every row has a self loop -> softmax rows never empty)
    u_adjb = jnp.where(p["u_adj"] > 0, 0.0, NEG_INF).astype(jnp.bfloat16)
    s_adjb = jnp.where(p["s_adj"] > 0, 0.0, NEG_INF).astype(jnp.bfloat16)
    return pack32, gpack, u_adjb, s_adjb


def gatcf_forward(user_idx, serv_idx, p):
    """Full GATCF.forward (eval mode) as one fused Pallas kernel."""
    pack32, gpack, u_adjb, s_adjb = _pack_inputs(p)
    idx = jnp.concatenate([user_idx.astype(jnp.int32),
                           serv_idx.astype(jnp.int32)], axis=0)[:, None]      # (2B, 1)

    kernel = functools.partial(gatcf_kernel, num_heads=HEADS, rank=RANK,
                               n_user=N_USER, n_serv=N_SERV,
                               batch=user_idx.shape[0])
    vmem = pl.BlockSpec(memory_space=pltpu.MemorySpace.VMEM)
    return pl.pallas_call(
        kernel,
        out_shape=jax.ShapeDtypeStruct((user_idx.shape[0], 1), jnp.float32),
        in_specs=[vmem] * 5,
        out_specs=vmem,
    )(idx, pack32, gpack, u_adjb, s_adjb)


# ------------------------------------------------------------------ references (pure JAX)


def gat_ref(emb, w, al, ar, bias, adj, gamma, beta, h_heads):
    n, r = emb.shape
    feat = emb @ w
    fh = feat.reshape(n, h_heads, r)
    el = jnp.sum(fh * al[None], axis=-1)                 # (N, H)
    er = jnp.sum(fh * ar[None], axis=-1)
    e = er[:, None, :] + el[None, :, :]                  # (dst, src, H)
    e = jnp.where(e > 0, e, NEG_SLOPE * e)
    mask = (adj > 0)[:, :, None]
    e = jnp.where(mask, e, -1e30)
    a = jax.nn.softmax(e, axis=1)
    a = jnp.where(mask, a, 0.0)
    rst = jnp.einsum('dsh,shr->dhr', a, fh) + bias.reshape(1, h_heads, r)
    x = rst.reshape(n, h_heads * r)
    mu = x.mean(-1, keepdims=True)
    var = ((x - mu) ** 2).mean(-1, keepdims=True)
    x = (x - mu) / jnp.sqrt(var + EPS) * gamma + beta
    y = jnp.where(x > 0, x, jnp.exp(x) - 1.0)
    return y.reshape(n, h_heads, r).mean(axis=1)


def gatcf_ref(user_idx, serv_idx, p):
    ua = gat_ref(p["user_emb"], p["u_w"], p["u_al"], p["u_ar"], p["u_bias"],
                 p["u_adj"], p["u_gamma"], p["u_beta"], HEADS)
    sa = gat_ref(p["serv_emb"], p["s_w"], p["s_al"], p["s_ar"], p["s_bias"],
                 p["s_adj"], p["s_gamma"], p["s_beta"], HEADS)
    ue = ua[user_idx]
    se = sa[serv_idx]
    h = ue @ p["w1u"] + se @ p["w1s"] + p["b1"]
    h = _layernorm(h, p["g1"], p["be1"])
    h = jnp.maximum(h, 0.0)
    h = h @ p["w2"] + p["b2"]
    h = _layernorm(h, p["g2"], p["be2"])
    h = jnp.maximum(h, 0.0)
    return h @ p["w3"] + p["b3"]


# ------------------------------------------------------------------ setup & run


def make_adj(key, n, prob=0.08):
    a = jax.random.uniform(key, (n, n)) < prob
    a = a | a.T | jnp.eye(n, dtype=bool)                 # bidirected + self loops
    return a.astype(jnp.float32)


def init_params(key):
    ks = jax.random.split(key, 32)
    r, h = RANK, HEADS
    kaiming = np.sqrt(2.0 / r)
    p = {
        "user_emb": jax.random.normal(ks[0], (N_USER, r)) * kaiming,
        "serv_emb": jax.random.normal(ks[1], (N_SERV, r)) * kaiming,
        # user GraphGATConv
        "u_w": jax.random.normal(ks[2], (r, h * r)) * kaiming,
        "u_al": jax.random.normal(ks[3], (h, r)) * 0.1,
        "u_ar": jax.random.normal(ks[4], (h, r)) * 0.1,
        "u_bias": jax.random.normal(ks[5], (1, h * r)) * 0.05,
        "u_gamma": 1.0 + 0.1 * jax.random.normal(ks[6], (1, h * r)),
        "u_beta": 0.05 * jax.random.normal(ks[7], (1, h * r)),
        "u_adj": make_adj(ks[8], N_USER),
        # serv GraphGATConv
        "s_w": jax.random.normal(ks[9], (r, h * r)) * kaiming,
        "s_al": jax.random.normal(ks[10], (h, r)) * 0.1,
        "s_ar": jax.random.normal(ks[11], (h, r)) * 0.1,
        "s_bias": jax.random.normal(ks[12], (1, h * r)) * 0.05,
        "s_gamma": 1.0 + 0.1 * jax.random.normal(ks[13], (1, h * r)),
        "s_beta": 0.05 * jax.random.normal(ks[14], (1, h * r)),
        "s_adj": make_adj(ks[15], N_SERV),
        # MLP head: Linear(2r->r), LN, ReLU, Linear(r->r/2), LN, ReLU, Linear(r/2->1)
        "w1u": jax.random.normal(ks[16], (r, r)) * np.sqrt(1.0 / (2 * r)),
        "w1s": jax.random.normal(ks[17], (r, r)) * np.sqrt(1.0 / (2 * r)),
        "b1": jax.random.normal(ks[18], (1, r)) * 0.01,
        "g1": 1.0 + 0.1 * jax.random.normal(ks[19], (1, r)),
        "be1": 0.05 * jax.random.normal(ks[20], (1, r)),
        "w2": jax.random.normal(ks[21], (r, r // 2)) * np.sqrt(1.0 / r),
        "b2": jax.random.normal(ks[22], (1, r // 2)) * 0.01,
        "g2": 1.0 + 0.1 * jax.random.normal(ks[23], (1, r // 2)),
        "be2": 0.05 * jax.random.normal(ks[24], (1, r // 2)),
        "w3": jax.random.normal(ks[25], (r // 2, 1)) * np.sqrt(1.0 / (r // 2)),
        "b3": jax.random.normal(ks[26], (1, 1)) * 0.01,
    }
    return {k: jnp.asarray(v, jnp.float32) for k, v in p.items()}


if __name__ == "__main__":
    root = jax.random.PRNGKey(0)
    kp, ku, ks = jax.random.split(root, 3)
    params = init_params(kp)
    user_idx = jax.random.randint(ku, (BATCH,), 0, N_USER, dtype=jnp.int32)
    serv_idx = jax.random.randint(ks, (BATCH,), 0, N_SERV, dtype=jnp.int32)

    fwd = jax.jit(gatcf_forward)
    out = jax.block_until_ready(fwd(user_idx, serv_idx, params))

    ref = jax.block_until_ready(gatcf_ref(user_idx, serv_idx, params))
    np.testing.assert_allclose(np.asarray(out), np.asarray(ref), rtol=TOL, atol=TOL)
    assert out.shape == (BATCH, 1)
    print("KERNEL_OK")
</pallas_src>

<mosaic_0001>
module attributes {stable_mosaic.version = 11 : i64} {
  func.func @gatcf_kernel(%arg0: memref<16x1xi32, #tpu.memory_space<vmem>>, %arg1: memref<272x32xf32, #tpu.memory_space<vmem>>, %arg2: memref<80x64xf32, #tpu.memory_space<vmem>>, %arg3: memref<64x64xbf16, #tpu.memory_space<vmem>>, %arg4: memref<96x96xbf16, #tpu.memory_space<vmem>>, %arg5: memref<8x1xf32, #tpu.memory_space<vmem>>) attributes {dimension_semantics = [], scalar_prefetch = 0 : i64, scratch_operands = 0 : i64, tpu.core_type = #tpu.core_type<tc>} {
    %c0 = arith.constant 0 : index
    %c0_0 = arith.constant 0 : index
    %0 = vector.load %arg3[%c0, %c0_0] : memref<64x64xbf16, #tpu.memory_space<vmem>>, vector<64x64xbf16>
    %1 = arith.extf %0 : vector<64x64xbf16> to vector<64x64xf32>
    %c0_1 = arith.constant 0 : index
    %c0_2 = arith.constant 0 : index
    %2 = vector.load %arg4[%c0_1, %c0_2] : memref<96x96xbf16, #tpu.memory_space<vmem>>, vector<96x96xbf16>
    %3 = arith.extf %2 : vector<96x96xbf16> to vector<96x96xf32>
    %c0_3 = arith.constant 0 : index
    %c0_4 = arith.constant 0 : index
    %4 = vector.load %arg1[%c0_3, %c0_4] : memref<272x32xf32, #tpu.memory_space<vmem>>, vector<64x32xf32>
    %c64 = arith.constant 64 : index
    %c0_5 = arith.constant 0 : index
    %5 = vector.load %arg1[%c64, %c0_5] : memref<272x32xf32, #tpu.memory_space<vmem>>, vector<96x32xf32>
    %c0_6 = arith.constant 0 : index
    %c0_7 = arith.constant 0 : index
    %6 = vector.load %arg2[%c0_6, %c0_7] : memref<80x64xf32, #tpu.memory_space<vmem>>, vector<32x64xf32>
    %c32 = arith.constant 32 : index
    %c0_8 = arith.constant 0 : index
    %7 = vector.load %arg2[%c32, %c0_8] : memref<80x64xf32, #tpu.memory_space<vmem>>, vector<2x64xf32>
    %c34 = arith.constant 34 : index
    %c0_9 = arith.constant 0 : index
    %8 = vector.load %arg2[%c34, %c0_9] : memref<80x64xf32, #tpu.memory_space<vmem>>, vector<2x64xf32>
    %c36 = arith.constant 36 : index
    %c0_10 = arith.constant 0 : index
    %9 = vector.load %arg2[%c36, %c0_10] : memref<80x64xf32, #tpu.memory_space<vmem>>, vector<1x64xf32>
    %c37 = arith.constant 37 : index
    %c0_11 = arith.constant 0 : index
    %10 = vector.load %arg2[%c37, %c0_11] : memref<80x64xf32, #tpu.memory_space<vmem>>, vector<1x64xf32>
    %c38 = arith.constant 38 : index
    %c0_12 = arith.constant 0 : index
    %11 = vector.load %arg2[%c38, %c0_12] : memref<80x64xf32, #tpu.memory_space<vmem>>, vector<1x64xf32>
    %cst = arith.constant dense<0.000000e+00> : vector<64x64xf32>
    %12 = tpu.matmul %4, %6, %cst {dimension_numbers = #tpu.dot_dimension_numbers<[1], [0], [0], [1], [0, 0, 1, 1], [], []>} : vector<64x32xf32>, vector<32x64xf32>, vector<64x64xf32> -> vector<64x64xf32>
    %cst_13 = arith.constant dense<0.000000e+00> : vector<2x64xf32>
    %13 = tpu.matmul %7, %12, %cst_13 {dimension_numbers = #tpu.dot_dimension_numbers<[1], [1], [0], [0], [0, 0, 1, 0], [], []>} : vector<2x64xf32>, vector<64x64xf32>, vector<2x64xf32> -> vector<2x64xf32>
    %cst_14 = arith.constant dense<0.000000e+00> : vector<64x2xf32>
    %14 = tpu.matmul %12, %8, %cst_14 {dimension_numbers = #tpu.dot_dimension_numbers<[1], [1], [0], [0], [0, 0, 1, 0], [], []>} : vector<64x64xf32>, vector<2x64xf32>, vector<64x2xf32> -> vector<64x2xf32>
    %cst_15 = arith.constant 1.000000e+00 : f32
    %15 = vector.broadcast %cst_15 : f32 to vector<64x1xf32>
    %16 = tpu.concatenate %12, %15 in 1 : vector<64x64xf32>, vector<64x1xf32> -> vector<64x65xf32>
    %17 = arith.truncf %16 : vector<64x65xf32> to vector<64x65xbf16>
    %18 = vector.extract_strided_slice %14 {offsets = [0, 0], sizes = [64, 1], strides = [1, 1]} : vector<64x2xf32> to vector<64x1xf32>
    %19 = vector.extract_strided_slice %13 {offsets = [0, 0], sizes = [1, 64], strides = [1, 1]} : vector<2x64xf32> to vector<1x64xf32>
    %20 = vector.broadcast %18 : vector<64x1xf32> to vector<64x64xf32>
    %21 = vector.broadcast %19 : vector<1x64xf32> to vector<64x64xf32>
    %22 = arith.addf %20, %21 : vector<64x64xf32>
    %cst_16 = arith.constant 2.000000e-01 : f32
    %23 = vector.broadcast %cst_16 : f32 to vector<64x64xf32>
    %24 = arith.mulf %23, %22 : vector<64x64xf32>
    %25 = arith.maximumf %22, %24 : vector<64x64xf32>
    %26 = arith.addf %25, %1 : vector<64x64xf32>
    %cst_17 = arith.constant dense<0xFF800000> : vector<64xf32>
    %27 = vector.multi_reduction <maximumf>, %26, %cst_17 [1] : vector<64x64xf32> to vector<64xf32>
    %28 = vector.shape_cast %27 : vector<64xf32> to vector<64x1xf32>
    %29 = vector.broadcast %28 : vector<64x1xf32> to vector<64x64xf32>
    %30 = arith.subf %26, %29 : vector<64x64xf32>
    %31 = math.exp %30 : vector<64x64xf32>
    %32 = arith.truncf %31 : vector<64x64xf32> to vector<64x64xbf16>
    %cst_18 = arith.constant dense<0.000000e+00> : vector<64x65xf32>
    %33 = tpu.matmul %32, %17, %cst_18 {dimension_numbers = #tpu.dot_dimension_numbers<[1], [0], [0], [1], [0, 0, 1, 1], [], []>} : vector<64x64xbf16>, vector<64x65xbf16>, vector<64x65xf32> -> vector<64x65xf32>
    %34 = vector.extract_strided_slice %33 {offsets = [0, 64], sizes = [64, 1], strides = [1, 1]} : vector<64x65xf32> to vector<64x1xf32>
    %35 = tpu.reciprocal %34 {approx = true} : vector<64x1xf32> -> vector<64x1xf32>
    %36 = vector.extract_strided_slice %33 {offsets = [0, 0], sizes = [64, 64], strides = [1, 1]} : vector<64x65xf32> to vector<64x64xf32>
    %37 = vector.broadcast %35 : vector<64x1xf32> to vector<64x64xf32>
    %38 = arith.mulf %36, %37 : vector<64x64xf32>
    %39 = vector.extract_strided_slice %14 {offsets = [0, 1], sizes = [64, 1], strides = [1, 1]} : vector<64x2xf32> to vector<64x1xf32>
    %40 = vector.extract_strided_slice %13 {offsets = [1, 0], sizes = [1, 64], strides = [1, 1]} : vector<2x64xf32> to vector<1x64xf32>
    %41 = vector.broadcast %39 : vector<64x1xf32> to vector<64x64xf32>
    %42 = vector.broadcast %40 : vector<1x64xf32> to vector<64x64xf32>
    %43 = arith.addf %41, %42 : vector<64x64xf32>
    %cst_19 = arith.constant 2.000000e-01 : f32
    %44 = vector.broadcast %cst_19 : f32 to vector<64x64xf32>
    %45 = arith.mulf %44, %43 : vector<64x64xf32>
    %46 = arith.maximumf %43, %45 : vector<64x64xf32>
    %47 = arith.addf %46, %1 : vector<64x64xf32>
    %cst_20 = arith.constant dense<0xFF800000> : vector<64xf32>
    %48 = vector.multi_reduction <maximumf>, %47, %cst_20 [1] : vector<64x64xf32> to vector<64xf32>
    %49 = vector.shape_cast %48 : vector<64xf32> to vector<64x1xf32>
    %50 = vector.broadcast %49 : vector<64x1xf32> to vector<64x64xf32>
    %51 = arith.subf %47, %50 : vector<64x64xf32>
    %52 = math.exp %51 : vector<64x64xf32>
    %53 = arith.truncf %52 : vector<64x64xf32> to vector<64x64xbf16>
    %cst_21 = arith.constant dense<0.000000e+00> : vector<64x65xf32>
    %54 = tpu.matmul %53, %17, %cst_21 {dimension_numbers = #tpu.dot_dimension_numbers<[1], [0], [0], [1], [0, 0, 1, 1], [], []>} : vector<64x64xbf16>, vector<64x65xbf16>, vector<64x65xf32> -> vector<64x65xf32>
    %55 = vector.extract_strided_slice %54 {offsets = [0, 64], sizes = [64, 1], strides = [1, 1]} : vector<64x65xf32> to vector<64x1xf32>
    %56 = tpu.reciprocal %55 {approx = true} : vector<64x1xf32> -> vector<64x1xf32>
    %57 = vector.extract_strided_slice %54 {offsets = [0, 0], sizes = [64, 64], strides = [1, 1]} : vector<64x65xf32> to vector<64x64xf32>
    %58 = vector.broadcast %56 : vector<64x1xf32> to vector<64x64xf32>
    %59 = arith.mulf %57, %58 : vector<64x64xf32>
    %60 = tpu.iota {dimensions = array<i32: 1>} : vector<64x64xi32>
    %c32_i32 = arith.constant 32 : i32
    %61 = vector.broadcast %c32_i32 : i32 to vector<64x64xi32>
    %62 = arith.cmpi slt, %60, %61 : vector<64x64xi32>
    %63 = arith.select %62, %38, %59 : vector<64x64xi1>, vector<64x64xf32>
    %64 = vector.broadcast %9 : vector<1x64xf32> to vector<64x64xf32>
    %65 = arith.addf %63, %64 : vector<64x64xf32>
    %cst_22 = arith.constant dense<0.000000e+00> : vector<64xf32>
    %66 = vector.multi_reduction <add>, %65, %cst_22 [1] : vector<64x64xf32> to vector<64xf32>
    %67 = vector.shape_cast %66 : vector<64xf32> to vector<64x1xf32>
    %cst_23 = arith.constant 6.400000e+01 : f32
    %68 = vector.broadcast %cst_23 : f32 to vector<64x1xf32>
    %69 = arith.divf %67, %68 : vector<64x1xf32>
    %70 = vector.broadcast %69 : vector<64x1xf32> to vector<64x64xf32>
    %71 = arith.subf %65, %70 : vector<64x64xf32>
    %72 = arith.mulf %71, %71 : vector<64x64xf32>
    %cst_24 = arith.constant dense<0.000000e+00> : vector<64xf32>
    %73 = vector.multi_reduction <add>, %72, %cst_24 [1] : vector<64x64xf32> to vector<64xf32>
    %74 = vector.shape_cast %73 : vector<64xf32> to vector<64x1xf32>
    %cst_25 = arith.constant 6.400000e+01 : f32
    %75 = vector.broadcast %cst_25 : f32 to vector<64x1xf32>
    %76 = arith.divf %74, %75 : vector<64x1xf32>
    %77 = vector.broadcast %69 : vector<64x1xf32> to vector<64x64xf32>
    %78 = arith.subf %65, %77 : vector<64x64xf32>
    %cst_26 = arith.constant 9.99999974E-6 : f32
    %79 = vector.broadcast %cst_26 : f32 to vector<64x1xf32>
    %80 = arith.addf %76, %79 : vector<64x1xf32>
    %81 = math.rsqrt %80 : vector<64x1xf32>
    %82 = vector.broadcast %81 : vector<64x1xf32> to vector<64x64xf32>
    %83 = arith.mulf %78, %82 : vector<64x64xf32>
    %84 = vector.broadcast %10 : vector<1x64xf32> to vector<64x64xf32>
    %85 = arith.mulf %83, %84 : vector<64x64xf32>
    %86 = vector.broadcast %11 : vector<1x64xf32> to vector<64x64xf32>
    %87 = arith.addf %85, %86 : vector<64x64xf32>
    %cst_27 = arith.constant 0.000000e+00 : f32
    %88 = vector.broadcast %cst_27 : f32 to vector<64x64xf32>
    %89 = arith.cmpf ogt, %87, %88 : vector<64x64xf32>
    %cst_28 = arith.constant 0.000000e+00 : f32
    %90 = vector.broadcast %cst_28 : f32 to vector<64x64xf32>
    %91 = arith.minimumf %87, %90 : vector<64x64xf32>
    %92 = math.exp %91 : vector<64x64xf32>
    %cst_29 = arith.constant 1.000000e+00 : f32
    %93 = vector.broadcast %cst_29 : f32 to vector<64x64xf32>
    %94 = arith.subf %92, %93 : vector<64x64xf32>
    %95 = arith.select %89, %87, %94 : vector<64x64xi1>, vector<64x64xf32>
    %96 = vector.extract_strided_slice %95 {offsets = [0, 0], sizes = [64, 32], strides = [1, 1]} : vector<64x64xf32> to vector<64x32xf32>
    %97 = vector.extract_strided_slice %95 {offsets = [0, 32], sizes = [64, 32], strides = [1, 1]} : vector<64x64xf32> to vector<64x32xf32>
    %98 = arith.addf %96, %97 : vector<64x32xf32>
    %cst_30 = arith.constant 5.000000e-01 : f32
    %99 = vector.broadcast %cst_30 : f32 to vector<64x32xf32>
    %100 = arith.mulf %98, %99 : vector<64x32xf32>
    %c40 = arith.constant 40 : index
    %c0_31 = arith.constant 0 : index
    %101 = vector.load %arg2[%c40, %c0_31] : memref<80x64xf32, #tpu.memory_space<vmem>>, vector<32x64xf32>
    %c72 = arith.constant 72 : index
    %c0_32 = arith.constant 0 : index
    %102 = vector.load %arg2[%c72, %c0_32] : memref<80x64xf32, #tpu.memory_space<vmem>>, vector<2x64xf32>
    %c74 = arith.constant 74 : index
    %c0_33 = arith.constant 0 : index
    %103 = vector.load %arg2[%c74, %c0_33] : memref<80x64xf32, #tpu.memory_space<vmem>>, vector<2x64xf32>
    %c76 = arith.constant 76 : index
    %c0_34 = arith.constant 0 : index
    %104 = vector.load %arg2[%c76, %c0_34] : memref<80x64xf32, #tpu.memory_space<vmem>>, vector<1x64xf32>
    %c77 = arith.constant 77 : index
    %c0_35 = arith.constant 0 : index
    %105 = vector.load %arg2[%c77, %c0_35] : memref<80x64xf32, #tpu.memory_space<vmem>>, vector<1x64xf32>
    %c78 = arith.constant 78 : index
    %c0_36 = arith.constant 0 : index
    %106 = vector.load %arg2[%c78, %c0_36] : memref<80x64xf32, #tpu.memory_space<vmem>>, vector<1x64xf32>
    %cst_37 = arith.constant dense<0.000000e+00> : vector<96x64xf32>
    %107 = tpu.matmul %5, %101, %cst_37 {dimension_numbers = #tpu.dot_dimension_numbers<[1], [0], [0], [1], [0, 0, 1, 1], [], []>} : vector<96x32xf32>, vector<32x64xf32>, vector<96x64xf32> -> vector<96x64xf32>
    %cst_38 = arith.constant dense<0.000000e+00> : vector<2x96xf32>
    %108 = tpu.matmul %102, %107, %cst_38 {dimension_numbers = #tpu.dot_dimension_numbers<[1], [1], [0], [0], [0, 0, 1, 0], [], []>} : vector<2x64xf32>, vector<96x64xf32>, vector<2x96xf32> -> vector<2x96xf32>
    %cst_39 = arith.constant dense<0.000000e+00> : vector<96x2xf32>
    %109 = tpu.matmul %107, %103, %cst_39 {dimension_numbers = #tpu.dot_dimension_numbers<[1], [1], [0], [0], [0, 0, 1, 0], [], []>} : vector<96x64xf32>, vector<2x64xf32>, vector<96x2xf32> -> vector<96x2xf32>
    %cst_40 = arith.constant 1.000000e+00 : f32
    %110 = vector.broadcast %cst_40 : f32 to vector<96x1xf32>
    %111 = tpu.concatenate %107, %110 in 1 : vector<96x64xf32>, vector<96x1xf32> -> vector<96x65xf32>
    %112 = arith.truncf %111 : vector<96x65xf32> to vector<96x65xbf16>
    %113 = vector.extract_strided_slice %109 {offsets = [0, 0], sizes = [96, 1], strides = [1, 1]} : vector<96x2xf32> to vector<96x1xf32>
    %114 = vector.extract_strided_slice %108 {offsets = [0, 0], sizes = [1, 96], strides = [1, 1]} : vector<2x96xf32> to vector<1x96xf32>
    %115 = vector.broadcast %113 : vector<96x1xf32> to vector<96x96xf32>
    %116 = vector.broadcast %114 : vector<1x96xf32> to vector<96x96xf32>
    %117 = arith.addf %115, %116 : vector<96x96xf32>
    %cst_41 = arith.constant 2.000000e-01 : f32
    %118 = vector.broadcast %cst_41 : f32 to vector<96x96xf32>
    %119 = arith.mulf %118, %117 : vector<96x96xf32>
    %120 = arith.maximumf %117, %119 : vector<96x96xf32>
    %121 = arith.addf %120, %3 : vector<96x96xf32>
    %cst_42 = arith.constant dense<0xFF800000> : vector<96xf32>
    %122 = vector.multi_reduction <maximumf>, %121, %cst_42 [1] : vector<96x96xf32> to vector<96xf32>
    %123 = vector.shape_cast %122 : vector<96xf32> to vector<96x1xf32>
    %124 = vector.broadcast %123 : vector<96x1xf32> to vector<96x96xf32>
    %125 = arith.subf %121, %124 : vector<96x96xf32>
    %126 = math.exp %125 : vector<96x96xf32>
    %127 = arith.truncf %126 : vector<96x96xf32> to vector<96x96xbf16>
    %cst_43 = arith.constant dense<0.000000e+00> : vector<96x65xf32>
    %128 = tpu.matmul %127, %112, %cst_43 {dimension_numbers = #tpu.dot_dimension_numbers<[1], [0], [0], [1], [0, 0, 1, 1], [], []>} : vector<96x96xbf16>, vector<96x65xbf16>, vector<96x65xf32> -> vector<96x65xf32>
    %129 = vector.extract_strided_slice %128 {offsets = [0, 64], sizes = [96, 1], strides = [1, 1]} : vector<96x65xf32> to vector<96x1xf32>
    %130 = tpu.reciprocal %129 {approx = true} : vector<96x1xf32> -> vector<96x1xf32>
    %131 = vector.extract_strided_slice %128 {offsets = [0, 0], sizes = [96, 64], strides = [1, 1]} : vector<96x65xf32> to vector<96x64xf32>
    %132 = vector.broadcast %130 : vector<96x1xf32> to vector<96x64xf32>
    %133 = arith.mulf %131, %132 : vector<96x64xf32>
    %134 = vector.extract_strided_slice %109 {offsets = [0, 1], sizes = [96, 1], strides = [1, 1]} : vector<96x2xf32> to vector<96x1xf32>
    %135 = vector.extract_strided_slice %108 {offsets = [1, 0], sizes = [1, 96], strides = [1, 1]} : vector<2x96xf32> to vector<1x96xf32>
    %136 = vector.broadcast %134 : vector<96x1xf32> to vector<96x96xf32>
    %137 = vector.broadcast %135 : vector<1x96xf32> to vector<96x96xf32>
    %138 = arith.addf %136, %137 : vector<96x96xf32>
    %cst_44 = arith.constant 2.000000e-01 : f32
    %139 = vector.broadcast %cst_44 : f32 to vector<96x96xf32>
    %140 = arith.mulf %139, %138 : vector<96x96xf32>
    %141 = arith.maximumf %138, %140 : vector<96x96xf32>
    %142 = arith.addf %141, %3 : vector<96x96xf32>
    %cst_45 = arith.constant dense<0xFF800000> : vector<96xf32>
    %143 = vector.multi_reduction <maximumf>, %142, %cst_45 [1] : vector<96x96xf32> to vector<96xf32>
    %144 = vector.shape_cast %143 : vector<96xf32> to vector<96x1xf32>
    %145 = vector.broadcast %144 : vector<96x1xf32> to vector<96x96xf32>
    %146 = arith.subf %142, %145 : vector<96x96xf32>
    %147 = math.exp %146 : vector<96x96xf32>
    %148 = arith.truncf %147 : vector<96x96xf32> to vector<96x96xbf16>
    %cst_46 = arith.constant dense<0.000000e+00> : vector<96x65xf32>
    %149 = tpu.matmul %148, %112, %cst_46 {dimension_numbers = #tpu.dot_dimension_numbers<[1], [0], [0], [1], [0, 0, 1, 1], [], []>} : vector<96x96xbf16>, vector<96x65xbf16>, vector<96x65xf32> -> vector<96x65xf32>
    %150 = vector.extract_strided_slice %149 {offsets = [0, 64], sizes = [96, 1], strides = [1, 1]} : vector<96x65xf32> to vector<96x1xf32>
    %151 = tpu.reciprocal %150 {approx = true} : vector<96x1xf32> -> vector<96x1xf32>
    %152 = vector.extract_strided_slice %149 {offsets = [0, 0], sizes = [96, 64], strides = [1, 1]} : vector<96x65xf32> to vector<96x64xf32>
    %153 = vector.broadcast %151 : vector<96x1xf32> to vector<96x64xf32>
    %154 = arith.mulf %152, %153 : vector<96x64xf32>
    %155 = tpu.iota {dimensions = array<i32: 1>} : vector<96x64xi32>
    %c32_i32_47 = arith.constant 32 : i32
    %156 = vector.broadcast %c32_i32_47 : i32 to vector<96x64xi32>
    %157 = arith.cmpi slt, %155, %156 : vector<96x64xi32>
    %158 = arith.select %157, %133, %154 : vector<96x64xi1>, vector<96x64xf32>
    %159 = vector.broadcast %104 : vector<1x64xf32> to vector<96x64xf32>
    %160 = arith.addf %158, %159 : vector<96x64xf32>
    %cst_48 = arith.constant dense<0.000000e+00> : vector<96xf32>
    %161 = vector.multi_reduction <add>, %160, %cst_48 [1] : vector<96x64xf32> to vector<96xf32>
    %162 = vector.shape_cast %161 : vector<96xf32> to vector<96x1xf32>
    %cst_49 = arith.constant 6.400000e+01 : f32
    %163 = vector.broadcast %cst_49 : f32 to vector<96x1xf32>
    %164 = arith.divf %162, %163 : vector<96x1xf32>
    %165 = vector.broadcast %164 : vector<96x1xf32> to vector<96x64xf32>
    %166 = arith.subf %160, %165 : vector<96x64xf32>
    %167 = arith.mulf %166, %166 : vector<96x64xf32>
    %cst_50 = arith.constant dense<0.000000e+00> : vector<96xf32>
    %168 = vector.multi_reduction <add>, %167, %cst_50 [1] : vector<96x64xf32> to vector<96xf32>
    %169 = vector.shape_cast %168 : vector<96xf32> to vector<96x1xf32>
    %cst_51 = arith.constant 6.400000e+01 : f32
    %170 = vector.broadcast %cst_51 : f32 to vector<96x1xf32>
    %171 = arith.divf %169, %170 : vector<96x1xf32>
    %172 = vector.broadcast %164 : vector<96x1xf32> to vector<96x64xf32>
    %173 = arith.subf %160, %172 : vector<96x64xf32>
    %cst_52 = arith.constant 9.99999974E-6 : f32
    %174 = vector.broadcast %cst_52 : f32 to vector<96x1xf32>
    %175 = arith.addf %171, %174 : vector<96x1xf32>
    %176 = math.rsqrt %175 : vector<96x1xf32>
    %177 = vector.broadcast %176 : vector<96x1xf32> to vector<96x64xf32>
    %178 = arith.mulf %173, %177 : vector<96x64xf32>
    %179 = vector.broadcast %105 : vector<1x64xf32> to vector<96x64xf32>
    %180 = arith.mulf %178, %179 : vector<96x64xf32>
    %181 = vector.broadcast %106 : vector<1x64xf32> to vector<96x64xf32>
    %182 = arith.addf %180, %181 : vector<96x64xf32>
    %cst_53 = arith.constant 0.000000e+00 : f32
    %183 = vector.broadcast %cst_53 : f32 to vector<96x64xf32>
    %184 = arith.cmpf ogt, %182, %183 : vector<96x64xf32>
    %cst_54 = arith.constant 0.000000e+00 : f32
    %185 = vector.broadcast %cst_54 : f32 to vector<96x64xf32>
    %186 = arith.minimumf %182, %185 : vector<96x64xf32>
    %187 = math.exp %186 : vector<96x64xf32>
    %cst_55 = arith.constant 1.000000e+00 : f32
    %188 = vector.broadcast %cst_55 : f32 to vector<96x64xf32>
    %189 = arith.subf %187, %188 : vector<96x64xf32>
    %190 = arith.select %184, %182, %189 : vector<96x64xi1>, vector<96x64xf32>
    %191 = vector.extract_strided_slice %190 {offsets = [0, 0], sizes = [96, 32], strides = [1, 1]} : vector<96x64xf32> to vector<96x32xf32>
    %192 = vector.extract_strided_slice %190 {offsets = [0, 32], sizes = [96, 32], strides = [1, 1]} : vector<96x64xf32> to vector<96x32xf32>
    %193 = arith.addf %191, %192 : vector<96x32xf32>
    %cst_56 = arith.constant 5.000000e-01 : f32
    %194 = vector.broadcast %cst_56 : f32 to vector<96x32xf32>
    %195 = arith.mulf %193, %194 : vector<96x32xf32>
    %c0_57 = arith.constant 0 : index
    %c0_58 = arith.constant 0 : index
    %196 = vector.load %arg0[%c0_57, %c0_58] : memref<16x1xi32, #tpu.memory_space<vmem>>, vector<8x1xi32>
    %c8 = arith.constant 8 : index
    %c0_59 = arith.constant 0 : index
    %197 = vector.load %arg0[%c8, %c0_59] : memref<16x1xi32, #tpu.memory_space<vmem>>, vector<8x1xi32>
    %198 = tpu.iota {dimensions = array<i32: 1>} : vector<8x64xi32>
    %199 = vector.broadcast %196 : vector<8x1xi32> to vector<8x64xi32>
    %200 = arith.cmpi eq, %198, %199 : vector<8x64xi32>
    %201 = arith.extui %200 : vector<8x64xi1> to vector<8x64xi32>
    %202 = arith.sitofp %201 : vector<8x64xi32> to vector<8x64xf32>
    %203 = tpu.iota {dimensions = array<i32: 1>} : vector<8x96xi32>
    %204 = vector.broadcast %197 : vector<8x1xi32> to vector<8x96xi32>
    %205 = arith.cmpi eq, %203, %204 : vector<8x96xi32>
    %206 = arith.extui %205 : vector<8x96xi1> to vector<8x96xi32>
    %207 = arith.sitofp %206 : vector<8x96xi32> to vector<8x96xf32>
    %cst_60 = arith.constant dense<0.000000e+00> : vector<8x32xf32>
    %208 = tpu.matmul %202, %100, %cst_60 {dimension_numbers = #tpu.dot_dimension_numbers<[1], [0], [0], [1], [0, 0, 1, 1], [], []>} : vector<8x64xf32>, vector<64x32xf32>, vector<8x32xf32> -> vector<8x32xf32>
    %cst_61 = arith.constant dense<0.000000e+00> : vector<8x32xf32>
    %209 = tpu.matmul %207, %195, %cst_61 {dimension_numbers = #tpu.dot_dimension_numbers<[1], [0], [0], [1], [0, 0, 1, 1], [], []>} : vector<8x96xf32>, vector<96x32xf32>, vector<8x32xf32> -> vector<8x32xf32>
    %c160 = arith.constant 160 : index
    %c0_62 = arith.constant 0 : index
    %210 = vector.load %arg1[%c160, %c0_62] : memref<272x32xf32, #tpu.memory_space<vmem>>, vector<64x32xf32>
    %c224 = arith.constant 224 : index
    %c0_63 = arith.constant 0 : index
    %211 = vector.load %arg1[%c224, %c0_63] : memref<272x32xf32, #tpu.memory_space<vmem>>, vector<3x32xf32>
    %212 = vector.extract_strided_slice %210 {offsets = [0, 0], sizes = [32, 32], strides = [1, 1]} : vector<64x32xf32> to vector<32x32xf32>
    %cst_64 = arith.constant dense<0.000000e+00> : vector<8x32xf32>
    %213 = tpu.matmul %208, %212, %cst_64 {dimension_numbers = #tpu.dot_dimension_numbers<[1], [0], [0], [1], [0, 0, 1, 1], [], []>} : vector<8x32xf32>, vector<32x32xf32>, vector<8x32xf32> -> vector<8x32xf32>
    %214 = vector.extract_strided_slice %210 {offsets = [32, 0], sizes = [32, 32], strides = [1, 1]} : vector<64x32xf32> to vector<32x32xf32>
    %cst_65 = arith.constant dense<0.000000e+00> : vector<8x32xf32>
    %215 = tpu.matmul %209, %214, %cst_65 {dimension_numbers = #tpu.dot_dimension_numbers<[1], [0], [0], [1], [0, 0, 1, 1], [], []>} : vector<8x32xf32>, vector<32x32xf32>, vector<8x32xf32> -> vector<8x32xf32>
    %216 = arith.addf %213, %215 : vector<8x32xf32>
    %217 = vector.extract_strided_slice %211 {offsets = [0, 0], sizes = [1, 32], strides = [1, 1]} : vector<3x32xf32> to vector<1x32xf32>
    %218 = vector.broadcast %217 : vector<1x32xf32> to vector<8x32xf32>
    %219 = arith.addf %216, %218 : vector<8x32xf32>
    %220 = vector.extract_strided_slice %211 {offsets = [1, 0], sizes = [1, 32], strides = [1, 1]} : vector<3x32xf32> to vector<1x32xf32>
    %221 = vector.extract_strided_slice %211 {offsets = [2, 0], sizes = [1, 32], strides = [1, 1]} : vector<3x32xf32> to vector<1x32xf32>
    %cst_66 = arith.constant dense<0.000000e+00> : vector<8xf32>
    %222 = vector.multi_reduction <add>, %219, %cst_66 [1] : vector<8x32xf32> to vector<8xf32>
    %223 = vector.shape_cast %222 : vector<8xf32> to vector<8x1xf32>
    %cst_67 = arith.constant 3.200000e+01 : f32
    %224 = vector.broadcast %cst_67 : f32 to vector<8x1xf32>
    %225 = arith.divf %223, %224 : vector<8x1xf32>
    %226 = vector.broadcast %225 : vector<8x1xf32> to vector<8x32xf32>
    %227 = arith.subf %219, %226 : vector<8x32xf32>
    %228 = arith.mulf %227, %227 : vector<8x32xf32>
    %cst_68 = arith.constant dense<0.000000e+00> : vector<8xf32>
    %229 = vector.multi_reduction <add>, %228, %cst_68 [1] : vector<8x32xf32> to vector<8xf32>
    %230 = vector.shape_cast %229 : vector<8xf32> to vector<8x1xf32>
    %cst_69 = arith.constant 3.200000e+01 : f32
    %231 = vector.broadcast %cst_69 : f32 to vector<8x1xf32>
    %232 = arith.divf %230, %231 : vector<8x1xf32>
    %233 = vector.broadcast %225 : vector<8x1xf32> to vector<8x32xf32>
    %234 = arith.subf %219, %233 : vector<8x32xf32>
    %cst_70 = arith.constant 9.99999974E-6 : f32
    %235 = vector.broadcast %cst_70 : f32 to vector<8x1xf32>
    %236 = arith.addf %232, %235 : vector<8x1xf32>
    %237 = math.rsqrt %236 : vector<8x1xf32>
    %238 = vector.broadcast %237 : vector<8x1xf32> to vector<8x32xf32>
    %239 = arith.mulf %234, %238 : vector<8x32xf32>
    %240 = vector.broadcast %220 : vector<1x32xf32> to vector<8x32xf32>
    %241 = arith.mulf %239, %240 : vector<8x32xf32>
    %242 = vector.broadcast %221 : vector<1x32xf32> to vector<8x32xf32>
    %243 = arith.addf %241, %242 : vector<8x32xf32>
    %cst_71 = arith.constant 0.000000e+00 : f32
    %244 = vector.broadcast %cst_71 : f32 to vector<8x32xf32>
    %245 = arith.maximumf %243, %244 : vector<8x32xf32>
    %c232 = arith.constant 232 : index
    %c0_72 = arith.constant 0 : index
    %246 = vector.load %arg1[%c232, %c0_72] : memref<272x32xf32, #tpu.memory_space<vmem>>, vector<32x32xf32>
    %247 = vector.extract_strided_slice %246 {offsets = [0, 0], sizes = [32, 16], strides = [1, 1]} : vector<32x32xf32> to vector<32x16xf32>
    %c264 = arith.constant 264 : index
    %c0_73 = arith.constant 0 : index
    %248 = vector.load %arg1[%c264, %c0_73] : memref<272x32xf32, #tpu.memory_space<vmem>>, vector<5x32xf32>
    %249 = vector.extract_strided_slice %248 {offsets = [0, 0], sizes = [5, 16], strides = [1, 1]} : vector<5x32xf32> to vector<5x16xf32>
    %cst_74 = arith.constant dense<0.000000e+00> : vector<8x16xf32>
    %250 = tpu.matmul %245, %247, %cst_74 {dimension_numbers = #tpu.dot_dimension_numbers<[1], [0], [0], [1], [0, 0, 1, 1], [], []>} : vector<8x32xf32>, vector<32x16xf32>, vector<8x16xf32> -> vector<8x16xf32>
    %251 = vector.extract_strided_slice %249 {offsets = [0, 0], sizes = [1, 16], strides = [1, 1]} : vector<5x16xf32> to vector<1x16xf32>
    %252 = vector.broadcast %251 : vector<1x16xf32> to vector<8x16xf32>
    %253 = arith.addf %250, %252 : vector<8x16xf32>
    %254 = vector.extract_strided_slice %249 {offsets = [1, 0], sizes = [1, 16], strides = [1, 1]} : vector<5x16xf32> to vector<1x16xf32>
    %255 = vector.extract_strided_slice %249 {offsets = [2, 0], sizes = [1, 16], strides = [1, 1]} : vector<5x16xf32> to vector<1x16xf32>
    %cst_75 = arith.constant dense<0.000000e+00> : vector<8xf32>
    %256 = vector.multi_reduction <add>, %253, %cst_75 [1] : vector<8x16xf32> to vector<8xf32>
    %257 = vector.shape_cast %256 : vector<8xf32> to vector<8x1xf32>
    %cst_76 = arith.constant 1.600000e+01 : f32
    %258 = vector.broadcast %cst_76 : f32 to vector<8x1xf32>
    %259 = arith.divf %257, %258 : vector<8x1xf32>
    %260 = vector.broadcast %259 : vector<8x1xf32> to vector<8x16xf32>
    %261 = arith.subf %253, %260 : vector<8x16xf32>
    %262 = arith.mulf %261, %261 : vector<8x16xf32>
    %cst_77 = arith.constant dense<0.000000e+00> : vector<8xf32>
    %263 = vector.multi_reduction <add>, %262, %cst_77 [1] : vector<8x16xf32> to vector<8xf32>
    %264 = vector.shape_cast %263 : vector<8xf32> to vector<8x1xf32>
    %cst_78 = arith.constant 1.600000e+01 : f32
    %265 = vector.broadcast %cst_78 : f32 to vector<8x1xf32>
    %266 = arith.divf %264, %265 : vector<8x1xf32>
    %267 = vector.broadcast %259 : vector<8x1xf32> to vector<8x16xf32>
    %268 = arith.subf %253, %267 : vector<8x16xf32>
    %cst_79 = arith.constant 9.99999974E-6 : f32
    %269 = vector.broadcast %cst_79 : f32 to vector<8x1xf32>
    %270 = arith.addf %266, %269 : vector<8x1xf32>
    %271 = math.rsqrt %270 : vector<8x1xf32>
    %272 = vector.broadcast %271 : vector<8x1xf32> to vector<8x16xf32>
    %273 = arith.mulf %268, %272 : vector<8x16xf32>
    %274 = vector.broadcast %254 : vector<1x16xf32> to vector<8x16xf32>
    %275 = arith.mulf %273, %274 : vector<8x16xf32>
    %276 = vector.broadcast %255 : vector<1x16xf32> to vector<8x16xf32>
    %277 = arith.addf %275, %276 : vector<8x16xf32>
    %cst_80 = arith.constant 0.000000e+00 : f32
    %278 = vector.broadcast %cst_80 : f32 to vector<8x16xf32>
    %279 = arith.maximumf %277, %278 : vector<8x16xf32>
    %280 = vector.extract_strided_slice %249 {offsets = [3, 0], sizes = [1, 16], strides = [1, 1]} : vector<5x16xf32> to vector<1x16xf32>
    %281 = vector.broadcast %280 : vector<1x16xf32> to vector<8x16xf32>
    %282 = arith.mulf %279, %281 : vector<8x16xf32>
    %cst_81 = arith.constant dense<0.000000e+00> : vector<8xf32>
    %283 = vector.multi_reduction <add>, %282, %cst_81 [1] : vector<8x16xf32> to vector<8xf32>
    %284 = vector.shape_cast %283 : vector<8xf32> to vector<8x1xf32>
    %285 = vector.extract_strided_slice %249 {offsets = [4, 0], sizes = [1, 1], strides = [1, 1]} : vector<5x16xf32> to vector<1x1xf32>
    %286 = vector.broadcast %285 : vector<1x1xf32> to vector<8x1xf32>
    %287 = arith.addf %284, %286 : vector<8x1xf32>
    %c0_82 = arith.constant 0 : index
    %c0_83 = arith.constant 0 : index
    %288 = vector.load %arg5[%c0_82, %c0_83] : memref<8x1xf32, #tpu.memory_space<vmem>>, vector<8x1xf32>
    tpu.vector_store %arg5[%c0_82, %c0_83], %287 {strides = array<i32>} : memref<8x1xf32, #tpu.memory_space<vmem>>, vector<8x1xf32>,
    return
  }
}

</mosaic_0001>

<bundles_post_ra>
// kernel: gatcf_forward.1
= control target key start
LH: loop header
LB: loop body
LE: loop exit
PB: predicated region body
PF: predicated region fallthrough
CT: control target
= control target key end

     0   :  { %vm90_vm0 = vcmask 261120   ;;  %v4171_v14 = vmov 0.0|0.0   ;;  %vm4172_vm1 = vmmov 0   ;;  %v4173_v15 = vmov 0.0   ;;  %s4177_s6 = smov 96   ;;  %s5609_s2 = inlined_call_operand.vmem [shape: f32[80,64], index: 2, kind: input, shape index: {}]   ;;  %s5610_s1 = inlined_call_operand.vmem [shape: f32[272,32], index: 1, kind: input, shape index: {}]   ;;  %s5611_s3 = inlined_call_operand.vmem [shape: bf16[64,64], index: 3, kind: input, shape index: {}]   ;;  %s5612_s4 = inlined_call_operand.vmem [shape: bf16[96,96], index: 4, kind: input, shape index: {}]   ;;  %s5613_s0 = inlined_call_operand.vmem [shape: s32[16,1], index: 0, kind: input, shape index: {}]   ;;  %s5614_s5 = inlined_call_operand.vmem [shape: f32[8,1], index: 5, kind: output, shape index: {}]  }
   0x1   :  { %v81_v0 = vld [vmem:[%s5609_s2] sm:$0xff]  ;;  %v82_v1 = vld [vmem:[%s5609_s2 + $0x8] sm:$0xff]  ;;  %v83_v2 = vld [vmem:[%s5609_s2 + $0x10] sm:$0xff]  ;;  %3799 = vmatprep.subr.bf16.mxu1 %v4171_v14  ;;  %3542 = vmatprep.mubr.msk.f32.mxu1 %vm4172_vm1, %v4173_v15  ;;  %vm220_vm2 = vcmask 523264   ;;  %v4174_v43 = vmov 0   ;;  %v4175_v54 = vmov 1   ;;  %v478_v55 = vlaneseq }
   0x2   :  { %v3791_v3 = vpack.c.bf16 %v82_v1, %v81_v0  ;;  %v84_v4 = vld [vmem:[%s5609_s2 + $0x18] sm:$0xff]  ;;  %v61_v5 = vld [vmem:[%s5610_s1] sm:$0xff]  ;;  %v62_v7 = vld [vmem:[%s5610_s1 + $0x8] sm:$0xff]  ;;  %3902 = vset.pattern.permute.xlu0 %v4174_v43  ;;  %3903 = vset.pattern.permute.xlu1 %v4174_v43  ;;  %vm1737_vm4 = vcmask 785408  }
   0x3   :  { %v3795_v6 = vpack.c.bf16 %v84_v4, %v83_v2  ;;  %3514 = vmatprep.mubr.msk.f32.mxu0 %vm90_vm0, %v61_v5  ;;  %v63_v8 = vld [vmem:[%s5610_s1 + $0x10] sm:$0xff]  ;;  %v64_v9 = vld [vmem:[%s5610_s1 + $0x18] sm:$0xff]  ;;  %v65_v10 = vld [vmem:[%s5610_s1 + $0x20] sm:$0xff]  ;;  %v4329_v56 = vshrl.u32 %v478_v55, 7 }
   0x4   :  { %3792 = vmatprep.subr.bf16.mxu0 %v3791_v3  ;;  %v66_v11 = vld [vmem:[%s5610_s1 + $0x28] sm:$0xff]  ;;  %v67_v12 = vld [vmem:[%s5610_s1 + $0x30] sm:$0xff]  ;;  %v68_v13 = vld [vmem:[%s5610_s1 + $0x38] sm:$0xff] }
   0x5   :  { %3794 = vmatpush3.bf16.msra.mxu0 %v3791_v3  ;;  %vm4258_vm3 = vmpackc.low %vm220_vm2, %vm220_vm2  ;;  %v86_v41 = vld [vmem:[%s5609_s2 + $0x22] sm:$0x3]  ;;  %v85_v42 = vld [vmem:[%s5609_s2 + $0x20] sm:$0x3]  ;;  %v4332_v57 = vsub.s32 0, %v4329_v56 }
   0x6   :  { %3796 = vmatprep.subr.bf16.mxu0 %v3795_v6  ;;  %v4339_v60 = vld [vmem:[%s5611_s3] sm:$0xff]   ;;  %v4345_v1 = vld [vmem:[%s5611_s3 + $0x8] sm:$0xff]  }
   0x7   :  { %v3311_v0 = vunpack.c.l.bf16 %v4339_v60 }
   0x9   :  { %3798 = vmatpush3.bf16.msra.mxu0 %v3795_v6 }
   0xc   :  { %3515 = vmatmul.mubr.msk.f32.vlgmr.msra.gmra.mrb[0].mxu0 %vm90_vm0, %v62_v7  ;;  %v3316_v7 = vunpack.c.h.bf16 %v4345_v1 }
   0xd   :  { %3517 = vmatprep.mubr.msk.f32.mxu0 %vm90_vm0, %v63_v8 }
  0x10   :  { %3518 = vmatmul.mubr.msk.f32.gmra.mrb[2].mxu0 %vm90_vm0, %v64_v9 }
  0x11   :  { %3520 = vmatprep.mubr.msk.f32.mxu0 %vm90_vm0, %v65_v10 }
  0x14   :  { %3521 = vmatmul.mubr.msk.f32.gmra.mrb[4].mxu0 %vm90_vm0, %v66_v11  ;;  %v3312_v11 = vunpack.c.h.bf16 %v4339_v60  ;;  %v69_v60 = vld [vmem:[%s5610_s1 + $0x40] sm:$0xff] }
  0x15   :  { %3523 = vmatprep.mubr.msk.f32.mxu0 %vm90_vm0, %v67_v12 }
  0x18   :  { %3524 = vmatmul.mubr.msk.f32.gmra.mrb[6].mxu0 %vm90_vm0, %v68_v13 }
  0xdf   :  { %v3516_v16 = vpop.f32.mrb[0].mxu0 }
  0xe0   :  { %v427_v17 = vsel %vm220_vm2, %v3516_v16, 1.0  ;;  %v181_v18 = vpop.f32.mrb[1].mxu0 }
  0xe1   :  { %v3800_v20 = vpack.c.bf16 %v3516_v16, %v181_v18  ;;  %v426_v21 = vsel %vm220_vm2, %v181_v18, 1.0 }
  0xe2   :  { %v434_v22 = vpack.c.bf16 %v427_v17, %v426_v21  ;;  %v4356_v17 = vld [vmem:[%s5611_s3 + $0x10] sm:$0xff]  }
  0xe3   :  { %3802 = vmatpush3.bf16.xpose.msk.msra.mxu1 %vm4258_vm3, %v3800_v20  ;;  %v3519_v23 = vpop.f32.mrb[2].mxu0 }
  0xe4   :  { %3559 = vmatprep.subr.bf16.mxu0 %v434_v22  ;;  %v429_v24 = vsel %vm220_vm2, %v3519_v23, 1.0  ;;  %v191_v25 = vpop.f32.mrb[3].mxu0  ;;  %3803 = vmatprep.subr.bf16.mxu1 %v4171_v14 }
  0xe5   :  { %3560 = vmatpush3.bf16.msra.mxu0 %v434_v22  ;;  %v3804_v26 = vpack.c.bf16 %v3519_v23, %v191_v25  ;;  %v428_v27 = vsel %vm220_vm2, %v191_v25, 1.0 }
  0xe6   :  { %v435_v28 = vpack.c.bf16 %v429_v24, %v428_v27  ;;  %v3315_v24 = vunpack.c.l.bf16 %v4345_v1 }
  0xe7   :  { %v3522_v29 = vpop.f32.mrb[4].mxu0 }
  0xe8   :  { %3561 = vmatprep.subr.bf16.mxu0 %v435_v28  ;;  %v431_v30 = vsel %vm220_vm2, %v3522_v29, 1.0  ;;  %v201_v31 = vpop.f32.mrb[5].mxu0 }
  0xe9   :  { %3562 = vmatpush3.bf16.msra.mxu0 %v435_v28  ;;  %v3808_v32 = vpack.c.bf16 %v3522_v29, %v201_v31  ;;  %v430_v33 = vsel %vm220_vm2, %v201_v31, 1.0 }
  0xea   :  { %v436_v34 = vpack.c.bf16 %v431_v30, %v430_v33  ;;  %v4373_v33 = vld [vmem:[%s5611_s3 + $0x18] sm:$0xff]  }
  0xeb   :  { %3806 = vmatpush3.bf16.xpose.msk.msra.mxu1 %vm4258_vm3, %v3804_v26  ;;  %v3525_v35 = vpop.f32.mrb[6].mxu0 }
  0xec   :  { %3807 = vmatprep.subr.bf16.mxu1 %v4171_v14  ;;  %3563 = vmatprep.subr.bf16.mxu0 %v436_v34  ;;  %v433_v36 = vsel %vm220_vm2, %v3525_v35, 1.0  ;;  %v211_v37 = vpop.f32.mrb[7].mxu0 }
  0xed   :  { %3564 = vmatpush3.bf16.msra.mxu0 %v436_v34  ;;  %v3812_v38 = vpack.c.bf16 %v3525_v35, %v211_v37  ;;  %v432_v39 = vsel %vm220_vm2, %v211_v37, 1.0 }
  0xee   :  { %v437_v40 = vpack.c.bf16 %v433_v36, %v432_v39  ;;  %v3320_v39 = vunpack.c.h.bf16 %v4356_v17 }
  0xf0   :  { %3565 = vmatprep.subr.bf16.mxu0 %v437_v40 }
  0xf1   :  { %3566 = vmatpush3.bf16.msra.mxu0 %v437_v40 }
  0xf3   :  { %3810 = vmatpush3.bf16.xpose.msk.msra.mxu1 %vm4258_vm3, %v3808_v32 }
  0xf4   :  { %3811 = vmatprep.subr.bf16.mxu1 %v4171_v14 }
  0xfb   :  { %3814 = vmatpush3.bf16.xpose.msk.msra.mxu1 %vm4258_vm3, %v3812_v38 }
  0xfc   :  { %3545 = vmatprep.subr.msk.mxu1 %vm220_vm2, %v86_v41 }
 0x102   :  { %3543 = vmatmul.mubr.msk.f32.vlgmr.msra.gmra.mrb[0].mxu1 %vm220_vm2, %v85_v42 }
 0x103   :  { %3546 = vmatpush3.xpose.msk.msra.mxu1 %vm220_vm2, %v86_v41  ;;  %3547 = vmatprep.mubr.msk.f32.mxu1 %vm220_vm2, %v181_v18 }
 0x104   :  { %3575 = vmatprep.subr.bf16.mxu1 %v434_v22 }
 0x106   :  { %3548 = vmatmul.mubr.msk.f32.vlgmr.msra.gmra.mrb[2].mxu1 %vm220_vm2, %v3516_v16 }
 0x107   :  { %3550 = vmatprep.mubr.msk.f32.mxu1 %vm220_vm2, %v191_v25  ;;  %3576 = vmatpush3.bf16.msra.mxu1 %v434_v22 }
 0x108   :  { %3577 = vmatprep.subr.bf16.mxu1 %v435_v28 }
 0x10a   :  { %3551 = vmatmul.mubr.msk.f32.gmra.mrb[4].mxu1 %vm220_vm2, %v3519_v23 }
 0x10b   :  { %3553 = vmatprep.mubr.msk.f32.mxu1 %vm220_vm2, %v201_v31  ;;  %3578 = vmatpush3.bf16.msra.mxu1 %v435_v28  ;;  %v3319_v28 = vunpack.c.l.bf16 %v4356_v17 }
 0x10c   :  { %3579 = vmatprep.subr.bf16.mxu1 %v436_v34 }
 0x10e   :  { %3554 = vmatmul.mubr.msk.f32.gmra.mrb[6].mxu1 %vm220_vm2, %v3522_v29 }
 0x10f   :  { %3556 = vmatprep.mubr.msk.f32.mxu1 %vm220_vm2, %v211_v37  ;;  %3580 = vmatpush3.bf16.msra.mxu1 %v436_v34 }
 0x110   :  { %3581 = vmatprep.subr.bf16.mxu1 %v437_v40 }
 0x112   :  { %3557 = vmatmul.mubr.msk.f32.gmra.mrb[8].mxu1 %vm220_vm2, %v3525_v35 }
 0x113   :  { %3582 = vmatpush3.bf16.msra.mxu1 %v437_v40 }
 0x114   :  { %3823 = vmatprep.subr.bf16.mxu1 %v4171_v14 }
 0x1d5   :  { %v4300_v44 = vpop.f32.mrb[0].mxu1 }
 0x1d6   :  { %v3544_v45 = vpop.f32.mrb[1].mxu1  ;;  %v481_v58 = vrot.slane %v4300_v44, %v4332_v57 }
 0x1d7   :  { %v3323_v45 = vunpack.c.l.bf16 %v4373_v33 }
 0x1d9   :  { %v4302_v46 = vpop.f32.mrb[2].mxu1 }
 0x1da   :  { %v4304_v47 = vpop.f32.mrb[3].mxu1 }
 0x1db   :  { %440 = vperm.xlu0 %3902, %v4304_v47  }
 0x1dd   :  { %v4307_v48 = vpop.f32.mrb[4].mxu1 }
 0x1de   :  { %455 = vperm.xlu1 %3903, %v4307_v48   ;;  %v4310_v49 = vpop.f32.mrb[5].mxu1 }
 0x1df   :  { %445 = vperm.xlu0 %3902, %v4302_v46  }
 0x1e1   :  { %v4313_v50 = vpop.f32.mrb[6].mxu1 }
 0x1e2   :  { %450 = vperm.xlu1 %3903, %v4310_v49   ;;  %v4316_v51 = vpop.f32.mrb[7].mxu1 }
 0x1e3   :  { %460 = vperm.xlu0 %3902, %v4316_v51  }
 0x1e5   :  { %v4319_v52 = vpop.f32.mrb[8].mxu1 }
 0x1e6   :  { %465 = vperm.xlu1 %3903, %v4313_v50   ;;  %v4322_v53 = vpop.f32.mrb[9].mxu1 }
 0x1e7   :  { %470 = vperm.xlu0 %3902, %v4322_v53  }
 0x1ea   :  { %475 = vperm.xlu1 %3903, %v4319_v52  }
 0x1eb   :  { %3905 = vset.pattern.permute.xlu0 %v4175_v54 }
 0x1ee   :  { %3904 = vset.pattern.permute.xlu1 %v4175_v54 }
 0x25a   :  { %v441_v59 = vpop.permute.xlu0 %440 }
 0x25b   :  { %v482_v61 = vadd.f32 %v481_v58, %v441_v59 }
 0x25d   :  { %v490_v62 = vmul.f32 0.2, %v482_v61  ;;  %v456_v63 = vpop.permute.xlu1 %455 }
 0x25e   :  { %v485_v2 = vadd.f32 %v481_v58, %v456_v63  ;;  %v446_v3 = vpop.permute.xlu0 %445 }
 0x25f   :  { %v498_v4 = vmax.f32 %v482_v61, %v490_v62  ;;  %v483_v5 = vadd.f32 %v481_v58, %v446_v3 }
 0x260   :  { %v493_v6 = vmul.f32 0.2, %v485_v2 }
 0x261   :  { %v491_v8 = vmul.f32 0.2, %v483_v5  ;;  %v451_v9 = vpop.permute.xlu1 %450  ;;  %v4350_v10 = vadd.f32 %v3311_v0, %v498_v4 }
 0x262   :  { %v501_v12 = vmax.f32 %v485_v2, %v493_v6  ;;  %v484_v13 = vadd.f32 %v481_v58, %v451_v9  ;;  %v461_v16 = vpop.permute.xlu0 %460 }
 0x263   :  { %v499_v18 = vmax.f32 %v483_v5, %v491_v8  ;;  %v486_v20 = vadd.f32 %v481_v58, %v461_v16  ;;  %v514_v21 = vsel %vm220_vm2, %v4350_v10, -inf  ;;  %v3324_v5 = vunpack.c.h.bf16 %v4373_v33  ;;  %v1200_v16 = vld [vmem:[%s5609_s2 + $0x28] sm:$0xff]  ;;  %v76_v33 = vld [vmem:[%s5610_s1 + $0x78] sm:$0xff] }
 0x264   :  { %v492_v22 = vmul.f32 0.2, %v484_v13  ;;  %515 = vmax.xlane.f32.xlu0 %v514_v21  ;;  %v4362_v23 = vadd.f32 %v3316_v7, %v501_v12 }
 0x265   :  { %v494_v25 = vmul.f32 0.2, %v486_v20  ;;  %v466_v26 = vpop.permute.xlu1 %465  ;;  %v507_v27 = vadd.f32 %v3312_v11, %v499_v18 }
 0x266   :  { %v500_v29 = vmax.f32 %v484_v13, %v492_v22  ;;  %v487_v30 = vadd.f32 %v481_v58, %v466_v26  ;;  %v471_v31 = vpop.permute.xlu0 %470  ;;  %v523_v32 = vsel %vm220_vm2, %v4362_v23, -inf }
 0x267   :  { %v502_v34 = vmax.f32 %v486_v20, %v494_v25  ;;  %v488_v35 = vadd.f32 %v481_v58, %v471_v31  ;;  %v517_v36 = vsel %vm220_vm2, %v507_v27, -inf }
 0x268   :  { %v495_v37 = vmul.f32 0.2, %v487_v30  ;;  %518 = vmax.xlane.f32.xlu1 %v517_v36  ;;  %524 = vmax.xlane.f32.xlu0 %v523_v32  ;;  %v508_v38 = vadd.f32 %v3315_v24, %v500_v29 }
 0x269   :  { %v496_v40 = vmul.f32 0.2, %v488_v35  ;;  %v476_v41 = vpop.permute.xlu1 %475  ;;  %v510_v42 = vadd.f32 %v3319_v28, %v502_v34 }
 0x26a   :  { %v503_v59 = vmax.f32 %v487_v30, %v495_v37  ;;  %v489_v61 = vadd.f32 %v481_v58, %v476_v41  ;;  %v520_v62 = vsel %vm220_vm2, %v508_v38, -inf }
 0x26b   :  { %v504_v63 = vmax.f32 %v488_v35, %v496_v40  ;;  %v526_v2 = vsel %vm220_vm2, %v510_v42, -inf }
 0x26c   :  { %v497_v3 = vmul.f32 0.2, %v489_v61  ;;  %527 = vmax.xlane.f32.xlu1 %v526_v2  ;;  %521 = vmax.xlane.f32.xlu0 %v520_v62  ;;  %v511_v4 = vadd.f32 %v3320_v39, %v503_v59 }
 0x26d   :  { %v512_v6 = vadd.f32 %v3323_v45, %v504_v63 }
 0x26e   :  { %v505_v8 = vmax.f32 %v489_v61, %v497_v3  ;;  %v529_v9 = vsel %vm220_vm2, %v511_v4, -inf }
 0x26f   :  { %v532_v58 = vsel %vm220_vm2, %v512_v6, -inf }
 0x270   :  { %530 = vmax.xlane.f32.xlu0 %v529_v9  ;;  %533 = vmax.xlane.f32.xlu1 %v532_v58  ;;  %v513_v12 = vadd.f32 %v3324_v5, %v505_v8  ;;  %v1203_v8 = vld [vmem:[%s5609_s2 + $0x40] sm:$0xff] }
 0x272   :  { %v535_v13 = vsel %vm220_vm2, %v513_v12, -inf }
 0x274   :  { %536 = vmax.xlane.f32.xlu0 %v535_v13 }
 0x281   :  { %700 = vperm.xlu1 %3904, %v4304_v47   ;;  %v1201_v47 = vld [vmem:[%s5609_s2 + $0x30] sm:$0xff] }
 0x282   :  { %v4407_v18 = vpack.c.bf16 %v1201_v47, %v1200_v16 }
 0x284   :  { %3816 = vmatprep.subr.bf16.mxu0 %v4407_v18 }
 0x285   :  { %708 = vperm.xlu1 %3904, %v4310_v49  }
 0x289   :  { %712 = vperm.xlu1 %3904, %v4307_v48  }
 0x28a   :  { %704 = vperm.xlu0 %3905, %v4302_v46  }
 0x28d   :  { %716 = vperm.xlu1 %3904, %v4316_v51  }
 0x28e   :  { %3906 = vset.pattern.permute.xlu0 %v4174_v43 }
 0x291   :  { %720 = vperm.xlu1 %3904, %v4313_v50  }
 0x295   :  { %724 = vperm.xlu1 %3904, %v4322_v53   ;;  %v4415_v53 = vsub.s32 1, %v4329_v56 }
 0x299   :  { %728 = vperm.xlu1 %3904, %v4319_v52  }
 0x2f1   :  { %v516_v46 = vpop.xlane.xlu0 %515 }
 0x2f2   :  { %v538_v48 = vsub.f32 %v4350_v10, %v516_v46 }
 0x2f4   :  { %v546_v49 = vmul.f32 1.442695, %v538_v48 }
 0x2f5   :  { %v519_v50 = vpop.xlane.xlu1 %518  ;;  %v525_v51 = vpop.xlane.xlu0 %524 }
 0x2f6   :  { %v539_v20 = vsub.f32 %v507_v27, %v519_v50  ;;  %v541_v21 = vsub.f32 %v4362_v23, %v525_v51  ;;  %3927 = vpow2.f32 %v546_v49  ;;  %v4419_v23 = vrot.slane %v4300_v44, %v4415_v53 }
 0x2f8   :  { %v548_v22 = vmul.f32 1.442695, %v539_v20  ;;  %v552_v29 = vmul.f32 1.442695, %v541_v21 }
 0x2f9   :  { %v528_v25 = vpop.xlane.xlu1 %527  ;;  %v522_v26 = vpop.xlane.xlu0 %521 }
 0x2fa   :  { %3929 = vpow2.f32 %v548_v22  ;;  %v540_v30 = vsub.f32 %v508_v38, %v522_v26  ;;  %v542_v52 = vsub.f32 %v510_v42, %v528_v25 }
 0x2fb   :  { %3931 = vpow2.f32 %v552_v29 }
 0x2fc   :  { %v550_v31 = vmul.f32 1.442695, %v540_v30  ;;  %v554_v27 = vmul.f32 1.442695, %v542_v52 }
 0x2fd   :  { %v534_v32 = vpop.xlane.xlu1 %533  ;;  %v531_v10 = vpop.xlane.xlu0 %530 }
 0x2fe   :  { %v544_v34 = vsub.f32 %v512_v6, %v534_v32  ;;  %v543_v35 = vsub.f32 %v511_v4, %v531_v10  ;;  %3933 = vpow2.f32 %v550_v31  ;;  %v1202_v6 = vld [vmem:[%s5609_s2 + $0x38] sm:$0xff] }
 0x2ff   :  { %v3819_v46 = vpack.c.bf16 %v1203_v8, %v1202_v6  ;;  %v71_v8 = vld [vmem:[%s5610_s1 + $0x50] sm:$0xff] }
 0x300   :  { %v556_v36 = vmul.f32 1.442695, %v543_v35  ;;  %v558_v37 = vmul.f32 1.442695, %v544_v34  ;;  %v3928_v42 = vpop.eup %3927 }
 0x301   :  { %v701_v40 = vpop.permute.xlu1 %700  ;;  %v537_v38 = vpop.xlane.xlu0 %536 }
 0x302   :  { %v735_v41 = vadd.f32 %v4419_v23, %v701_v40  ;;  %v545_v59 = vsub.f32 %v513_v12, %v537_v38  ;;  %3935 = vpow2.f32 %v556_v36 }
 0x303   :  { %3937 = vpow2.f32 %v554_v27 }
 0x304   :  { %v3930_v61 = vpop.eup %3929  ;;  %v743_v62 = vmul.f32 0.2, %v735_v41  ;;  %v560_v63 = vmul.f32 1.442695, %v545_v59  ;;  %3939 = vpow2.f32 %v558_v37 }
 0x305   :  { %v709_v2 = vpop.permute.xlu1 %708  ;;  %v562_v3 = vpack.c.bf16 %v3930_v61, %v3928_v42  ;;  %v3932_v9 = vpop.eup %3931 }
 0x306   :  { %v751_v4 = vmax.f32 %v735_v41, %v743_v62  ;;  %3941 = vpow2.f32 %v560_v63  ;;  %v737_v44 = vadd.f32 %v4419_v23, %v709_v2 }
 0x307   :  { %3567 = vmatprep.mubr.msk.bf16.mxu0 %vm220_vm2, %v562_v3  ;;  %v70_v3 = vld [vmem:[%s5610_s1 + $0x48] sm:$0xff] }
 0x308   :  { %v745_v58 = vmul.f32 0.2, %v737_v44  ;;  %v4432_v12 = vadd.f32 %v3311_v0, %v751_v4  ;;  %v3934_v13 = vpop.eup %3933 }
 0x309   :  { %v713_v16 = vpop.permute.xlu1 %712  ;;  %v705_v47 = vpop.permute.xlu0 %704  ;;  %v563_v48 = vpack.c.bf16 %v3932_v9, %v3934_v13  ;;  %v73_v13 = vld [vmem:[%s5610_s1 + $0x60] sm:$0xff] }
 0x30a   :  { %v753_v49 = vmax.f32 %v737_v44, %v745_v58  ;;  %v738_v50 = vadd.f32 %v4419_v23, %v713_v16  ;;  %v736_v51 = vadd.f32 %v4419_v23, %v705_v47  ;;  %v767_v20 = vsel %vm220_vm2, %v4432_v12, -inf }
 0x30b   :  { %768 = vmax.xlane.f32.xlu1 %v767_v20  ;;  %3568 = vmatmul.mubr.msk.bf16.vlgmr.msra.gmra.mrb[8].mxu0 %vm220_vm2, %v563_v48  ;;  %v78_v48 = vld [vmem:[%s5610_s1 + $0x88] sm:$0xff] }
 0x30c   :  { %v746_v21 = vmul.f32 0.2, %v738_v50  ;;  %v744_v22 = vmul.f32 0.2, %v736_v51  ;;  %v4441_v0 = vadd.f32 %v3315_v24, %v753_v49  ;;  %v3936_v25 = vpop.eup %3935  ;;  %3818 = vmatpush3.bf16.msra.mxu0 %v4407_v18  ;;  %v79_v49 = vld [vmem:[%s5610_s1 + $0x90] sm:$0xff] }
 0x30d   :  { %v717_v26 = vpop.permute.xlu1 %716  ;;  %v3938_v29 = vpop.eup %3937  ;;  %3820 = vmatprep.subr.bf16.mxu0 %v3819_v46 }
 0x30e   :  { %v754_v30 = vmax.f32 %v738_v50, %v746_v21  ;;  %v752_v52 = vmax.f32 %v736_v51, %v744_v22  ;;  %v739_v31 = vadd.f32 %v4419_v23, %v717_v26  ;;  %v773_v32 = vsel %vm220_vm2, %v4441_v0, -inf  ;;  %v3940_v10 = vpop.eup %3939  ;;  %v80_v50 = vld [vmem:[%s5610_s1 + $0x98] sm:$0xff]  ;;  %v1205_v51 = vld [vmem:[%s5609_s2 + $0x4a] sm:$0x3] }
 0x30f   :  { %v564_v34 = vpack.c.bf16 %v3936_v25, %v3938_v29  ;;  %774 = vmax.xlane.f32.xlu1 %v773_v32 }
 0x310   :  { %v3942_v35 = vpop.eup %3941  ;;  %v747_v27 = vmul.f32 0.2, %v739_v31  ;;  %v4449_v24 = vadd.f32 %v3312_v11, %v752_v52  ;;  %3822 = vmatpush3.bf16.msra.mxu0 %v3819_v46  ;;  %v4457_v41 = vadd.f32 %v3316_v7, %v754_v30  ;;  %v75_v46 = vld [vmem:[%s5610_s1 + $0x70] sm:$0xff] }
 0x311   :  { %3571 = vmatprep.mubr.msk.bf16.mxu0 %vm220_vm2, %v564_v34  ;;  %v721_v18 = vpop.permute.xlu1 %720  ;;  %v565_v36 = vpack.c.bf16 %v3942_v35, %v3940_v10  ;;  %3644 = vmatprep.subr.msk.mxu0 %vm220_vm2, %v1205_v51 }
 0x312   :  { %v755_v37 = vmax.f32 %v739_v31, %v747_v27  ;;  %v740_v40 = vadd.f32 %v4419_v23, %v721_v18  ;;  %v770_v38 = vsel %vm220_vm2, %v4449_v24, -inf  ;;  %v776_v62 = vsel %vm220_vm2, %v4457_v41, -inf }
 0x313   :  { %771 = vmax.xlane.f32.xlu0 %v770_v38  ;;  %3572 = vmatmul.mubr.msk.bf16.gmra.mrb[12].mxu0 %vm220_vm2, %v565_v36 }
 0x314   :  { %v748_v11 = vmul.f32 0.2, %v740_v40  ;;  %v4465_v59 = vadd.f32 %v3319_v28, %v755_v37  ;;  %3599 = vmatprep.mubr.msk.f32.mxu0 %vm90_vm0, %v69_v60 }
 0x315   :  { %v725_v42 = vpop.permute.xlu1 %724 }
 0x316   :  { %v756_v61 = vmax.f32 %v740_v40, %v748_v11  ;;  %v741_v1 = vadd.f32 %v4419_v23, %v725_v42  ;;  %v779_v7 = vsel %vm220_vm2, %v4465_v59, -inf }
 0x317   :  { %780 = vmax.xlane.f32.xlu1 %v779_v7  ;;  %777 = vmax.xlane.f32.xlu0 %v776_v62 }
 0x318   :  { %v749_v63 = vmul.f32 0.2, %v741_v1  ;;  %v764_v2 = vadd.f32 %v3320_v39, %v756_v61  ;;  %v72_v39 = vld [vmem:[%s5610_s1 + $0x58] sm:$0xff] }
 0x319   :  { %v729_v28 = vpop.permute.xlu1 %728 }
 0x31a   :  { %v757_v4 = vmax.f32 %v741_v1, %v749_v63  ;;  %v742_v44 = vadd.f32 %v4419_v23, %v729_v28  ;;  %v782_v6 = vsel %vm220_vm2, %v764_v2, -inf }
 0x31b   :  { %783 = vmax.xlane.f32.xlu0 %v782_v6  ;;  %3600 = vmatmul.mubr.msk.f32.vlgmr.msra.gmra.mrb[16].mxu0 %vm90_vm0, %v70_v3 }
 0x31c   :  { %v750_v9 = vmul.f32 0.2, %v742_v44  ;;  %v765_v17 = vadd.f32 %v3323_v45, %v757_v4  ;;  %3602 = vmatprep.mubr.msk.f32.mxu0 %vm90_vm0, %v71_v8  ;;  %v74_v45 = vld [vmem:[%s5610_s1 + $0x68] sm:$0xff]  ;;  %3645 = vmatpush3.xpose.msk.msra.mxu0 %vm220_vm2, %v1205_v51 }
 0x31e   :  { %v758_v23 = vmax.f32 %v742_v44, %v750_v9  ;;  %v785_v58 = vsel %vm220_vm2, %v765_v17, -inf }
 0x31f   :  { %786 = vmax.xlane.f32.xlu1 %v785_v58  ;;  %3603 = vmatmul.mubr.msk.f32.gmra.mrb[18].mxu0 %vm90_vm0, %v72_v39 }
 0x320   :  { %v766_v16 = vadd.f32 %v3324_v5, %v758_v23  ;;  %3605 = vmatprep.mubr.msk.f32.mxu0 %vm90_vm0, %v73_v13  ;;  %v77_v5 = vld [vmem:[%s5610_s1 + $0x80] sm:$0xff] }
 0x322   :  { %v788_v47 = vsel %vm220_vm2, %v766_v16, -inf }
 0x323   :  { %789 = vmax.xlane.f32.xlu0 %v788_v47  ;;  %3606 = vmatmul.mubr.msk.f32.gmra.mrb[20].mxu0 %vm90_vm0, %v74_v45 }
 0x324   :  { %3608 = vmatprep.mubr.msk.f32.mxu0 %vm90_vm0, %v75_v46 }
 0x327   :  { %3609 = vmatmul.mubr.msk.f32.gmra.mrb[22].mxu0 %vm90_vm0, %v76_v33 }
 0x328   :  { %3611 = vmatprep.mubr.msk.f32.mxu0 %vm90_vm0, %v77_v5 }
 0x32b   :  { %3612 = vmatmul.mubr.msk.f32.gmra.mrb[24].mxu0 %vm90_vm0, %v78_v48 }
 0x32c   :  { %3614 = vmatprep.mubr.msk.f32.mxu0 %vm90_vm0, %v79_v49 }
 0x32f   :  { %3615 = vmatmul.mubr.msk.f32.gmra.mrb[26].mxu0 %vm90_vm0, %v80_v50 }
 0x398   :  { %v769_v20 = vpop.xlane.xlu1 %768 }
 0x399   :  { %v791_v21 = vsub.f32 %v4432_v12, %v769_v20 }
 0x39b   :  { %v799_v25 = vmul.f32 1.442695, %v791_v21 }
 0x39c   :  { %v775_v22 = vpop.xlane.xlu1 %774 }
 0x39d   :  { %v793_v29 = vsub.f32 %v4441_v0, %v775_v22  ;;  %3943 = vpow2.f32 %v799_v25 }
 0x39f   :  { %v803_v10 = vmul.f32 1.442695, %v793_v29 }
 0x3a0   :  { %v772_v26 = vpop.xlane.xlu0 %771 }
 0x3a1   :  { %v792_v30 = vsub.f32 %v4449_v24, %v772_v26 }
 0x3a3   :  { %v801_v52 = vmul.f32 1.442695, %v792_v30 }
 0x3a4   :  { %v781_v31 = vpop.xlane.xlu1 %780  ;;  %v778_v32 = vpop.xlane.xlu0 %777 }
 0x3a5   :  { %3945 = vpow2.f32 %v801_v52  ;;  %v795_v34 = vsub.f32 %v4465_v59, %v781_v31  ;;  %v794_v35 = vsub.f32 %v4457_v41, %v778_v32 }
 0x3a6   :  { %3947 = vpow2.f32 %v803_v10 }
 0x3a7   :  { %v805_v27 = vmul.f32 1.442695, %v794_v35  ;;  %v807_v18 = vmul.f32 1.442695, %v795_v34  ;;  %v3944_v40 = vpop.eup %3943 }
 0x3a8   :  { %v784_v12 = vpop.xlane.xlu0 %783 }
 0x3a9   :  { %v796_v36 = vsub.f32 %v764_v2, %v784_v12  ;;  %3949 = vpow2.f32 %v805_v27 }
 0x3aa   :  { %3951 = vpow2.f32 %v807_v18 }
 0x3ab   :  { %v809_v37 = vmul.f32 1.442695, %v796_v36 }
 0x3ac   :  { %v787_v0 = vpop.xlane.xlu1 %786 }
 0x3ad   :  { %3953 = vpow2.f32 %v809_v37  ;;  %v797_v24 = vsub.f32 %v765_v17, %v787_v0 }
 0x3af   :  { %v3946_v38 = vpop.eup %3945  ;;  %v811_v60 = vmul.f32 1.442695, %v797_v24 }
 0x3b0   :  { %v790_v11 = vpop.xlane.xlu0 %789  ;;  %v815_v42 = vpack.c.bf16 %v3946_v38, %v3944_v40  ;;  %v3948_v41 = vpop.eup %3947 }
 0x3b1   :  { %v798_v61 = vsub.f32 %v766_v16, %v790_v11  ;;  %3955 = vpow2.f32 %v811_v60 }
 0x3b2   :  { %3583 = vmatprep.mubr.msk.bf16.mxu1 %vm220_vm2, %v815_v42 }
 0x3b3   :  { %v813_v59 = vmul.f32 1.442695, %v798_v61  ;;  %v3950_v1 = vpop.eup %3949  ;;  %v1204_v61 = vld [vmem:[%s5609_s2 + $0x48] sm:$0x3] }
 0x3b4   :  { %v816_v7 = vpack.c.bf16 %v3950_v1, %v3948_v41  ;;  %v3952_v62 = vpop.eup %3951 }
 0x3b5   :  { %3957 = vpow2.f32 %v813_v59 }
 0x3b6   :  { %3584 = vmatmul.mubr.msk.bf16.vlgmr.msra.gmra.mrb[12].mxu1 %vm220_vm2, %v816_v7 }
 0x3b7   :  { %v3954_v63 = vpop.eup %3953 }
 0x3b8   :  { %v817_v2 = vpack.c.bf16 %v3954_v63, %v3952_v62 }
 0x3ba   :  { %3587 = vmatprep.mubr.msk.bf16.mxu1 %vm220_vm2, %v817_v2 }
 0x3bb   :  { %v3956_v28 = vpop.eup %3955 }
 0x3bf   :  { %v3958_v3 = vpop.eup %3957 }
 0x3c0   :  { %v818_v4 = vpack.c.bf16 %v3958_v3, %v3956_v28 }
 0x3c2   :  { %3588 = vmatmul.mubr.msk.bf16.gmra.mrb[16].mxu1 %vm220_vm2, %v818_v4 }
 0x3c3   :  { %3641 = vmatprep.mubr.msk.f32.mxu1 %vm4172_vm1, %v4173_v15 }
 0x3de   :  { %v4543_v44 = vpop.f32.mrb[8].mxu0 }
 0x3df   :  { %v4545_v6 = vpop.f32.mrb[9].mxu0 }
 0x3e0   :  { %v4547_v8 = vpop.f32.mrb[10].mxu0 }
 0x3e1   :  { %v4549_v9 = vpop.f32.mrb[11].mxu0 }
 0x3e2   :  { %3959 = vrcp.f32 %v4549_v9 }
 0x3e6   :  { %v4551_v17 = vpop.f32.mrb[12].mxu0 }
 0x3e7   :  { %v4553_v39 = vpop.f32.mrb[13].mxu0 }
 0x3e8   :  { %v4555_v23 = vpop.f32.mrb[14].mxu0 }
 0x3e9   :  { %v4557_v58 = vpop.f32.mrb[15].mxu0 }
 0x3ee   :  { %v3601_v13 = vpop.f32.mrb[16].mxu0 }
 0x3ef   :  { %v1608_v16 = vsel %vm220_vm2, %v3601_v13, 1.0  ;;  %v1311_v45 = vpop.f32.mrb[17].mxu0 }
 0x3f0   :  { %v3824_v47 = vpack.c.bf16 %v3601_v13, %v1311_v45  ;;  %v1607_v46 = vsel %vm220_vm2, %v1311_v45, 1.0  ;;  %3646 = vmatprep.mubr.msk.f32.mxu0 %vm220_vm2, %v1311_v45 }
 0x3f1   :  { %v4562_v33 = vpack.c.bf16 %v1608_v16, %v1607_v46  ;;  %3647 = vmatmul.mubr.msk.f32.vlgmr.msra.gmra.mrb[28].mxu0 %vm220_vm2, %v3601_v13 }
 0x3f2   :  { %v3604_v5 = vpop.f32.mrb[18].mxu0  ;;  %3826 = vmatpush3.bf16.xpose.msk.msra.mxu1 %vm4258_vm3, %v3824_v47 }
 0x3f3   :  { %v1610_v48 = vsel %vm220_vm2, %v3604_v5, 1.0  ;;  %v1321_v49 = vpop.f32.mrb[19].mxu0  ;;  %3664 = vmatprep.subr.bf16.mxu0 %v4562_v33  ;;  %3827 = vmatprep.subr.bf16.mxu1 %v4171_v14 }
 0x3f4   :  { %v3828_v50 = vpack.c.bf16 %v3604_v5, %v1321_v49  ;;  %v1609_v51 = vsel %vm220_vm2, %v1321_v49, 1.0  ;;  %3649 = vmatprep.mubr.msk.f32.mxu0 %vm220_vm2, %v1321_v49  ;;  %3665 = vmatpush3.bf16.msra.mxu0 %v4562_v33 }
 0x3f5   :  { %v1620_v20 = vpack.c.bf16 %v1610_v48, %v1609_v51  ;;  %3650 = vmatmul.mubr.msk.f32.gmra.mrb[30].mxu0 %vm220_vm2, %v3604_v5 }
 0x3f6   :  { %v3607_v21 = vpop.f32.mrb[20].mxu0 }
 0x3f7   :  { %v1612_v22 = vsel %vm220_vm2, %v3607_v21, 1.0  ;;  %v1331_v25 = vpop.f32.mrb[21].mxu0  ;;  %3666 = vmatprep.subr.bf16.mxu0 %v1620_v20 }
 0x3f8   :  { %v3832_v26 = vpack.c.bf16 %v3607_v21, %v1331_v25  ;;  %v1611_v29 = vsel %vm220_vm2, %v1331_v25, 1.0  ;;  %3652 = vmatprep.mubr.msk.f32.mxu0 %vm220_vm2, %v1331_v25  ;;  %3667 = vmatpush3.bf16.msra.mxu0 %v1620_v20 }
 0x3f9   :  { %v1621_v30 = vpack.c.bf16 %v1612_v22, %v1611_v29  ;;  %3653 = vmatmul.mubr.msk.f32.gmra.mrb[32].mxu0 %vm220_vm2, %v3607_v21  ;;  %v3326_v29 = vld [vmem:[%s5612_s4] sm:$0xff]  }
 0x3fa   :  { %3830 = vmatpush3.bf16.xpose.msk.msra.mxu1 %vm4258_vm3, %v3828_v50  ;;  %v3610_v52 = vpop.f32.mrb[22].mxu0 }
 0x3fb   :  { %v1614_v31 = vsel %vm220_vm2, %v3610_v52, 1.0  ;;  %v1341_v32 = vpop.f32.mrb[23].mxu0  ;;  %3831 = vmatprep.subr.bf16.mxu1 %v4171_v14  ;;  %3668 = vmatprep.subr.bf16.mxu0 %v1621_v30 }
 0x3fc   :  { %v3836_v10 = vpack.c.bf16 %v3610_v52, %v1341_v32  ;;  %v1613_v34 = vsel %vm220_vm2, %v1341_v32, 1.0  ;;  %3655 = vmatprep.mubr.msk.f32.mxu0 %vm220_vm2, %v1341_v32  ;;  %3669 = vmatpush3.bf16.msra.mxu0 %v1621_v30  ;;  %v3328_v32 = vunpack.c.h.bf16 %v3326_v29 }
 0x3fd   :  { %v1622_v35 = vpack.c.bf16 %v1614_v31, %v1613_v34  ;;  %3656 = vmatmul.mubr.msk.f32.gmra.mrb[34].mxu0 %vm220_vm2, %v3610_v52 }
 0x3fe   :  { %v3613_v27 = vpop.f32.mrb[24].mxu0 }
 0x3ff   :  { %v1616_v18 = vsel %vm220_vm2, %v3613_v27, 1.0  ;;  %v1351_v12 = vpop.f32.mrb[25].mxu0  ;;  %3670 = vmatprep.subr.bf16.mxu0 %v1622_v35 }
 0x400   :  { %v3840_v36 = vpack.c.bf16 %v3613_v27, %v1351_v12  ;;  %v1615_v37 = vsel %vm220_vm2, %v1351_v12, 1.0  ;;  %3658 = vmatprep.mubr.msk.f32.mxu0 %vm220_vm2, %v1351_v12  ;;  %3671 = vmatpush3.bf16.msra.mxu0 %v1622_v35 }
 0x401   :  { %v1623_v0 = vpack.c.bf16 %v1616_v18, %v1615_v37  ;;  %3659 = vmatmul.mubr.msk.f32.gmra.mrb[36].mxu0 %vm220_vm2, %v3613_v27  ;;  %v3327_v37 = vunpack.c.l.bf16 %v3326_v29  ;;  %v3353_v29 = vld [vmem:[%s5612_s4 + $0x10] sm:$0xff]  }
 0x402   :  { %3834 = vmatpush3.bf16.xpose.msk.msra.mxu1 %vm4258_vm3, %v3832_v26  ;;  %v3616_v24 = vpop.f32.mrb[26].mxu0 }
 0x403   :  { %3835 = vmatprep.subr.bf16.mxu1 %v4171_v14  ;;  %v1618_v40 = vsel %vm220_vm2, %v3616_v24, 1.0  ;;  %v1361_v38 = vpop.f32.mrb[27].mxu0  ;;  %3672 = vmatprep.subr.bf16.mxu0 %v1623_v0 }
 0x404   :  { %v3844_v60 = vpack.c.bf16 %v3616_v24, %v1361_v38  ;;  %v1617_v11 = vsel %vm220_vm2, %v1361_v38, 1.0  ;;  %3661 = vmatprep.mubr.msk.f32.mxu0 %vm220_vm2, %v1361_v38  ;;  %3673 = vmatpush3.bf16.msra.mxu0 %v1623_v0 }
 0x405   :  { %v1624_v42 = vpack.c.bf16 %v1618_v40, %v1617_v11  ;;  %3662 = vmatmul.mubr.msk.f32.gmra.mrb[38].mxu0 %vm220_vm2, %v3616_v24 }
 0x407   :  { %3674 = vmatprep.subr.bf16.mxu0 %v1624_v42 }
 0x408   :  { %3675 = vmatpush3.bf16.msra.mxu0 %v1624_v42 }
 0x409   :  { %3847 = vmatprep.subr.bf16.mxu0 %v4171_v14 }
 0x40a   :  { %3838 = vmatpush3.bf16.xpose.msk.msra.mxu1 %vm4258_vm3, %v3836_v10 }
 0x40b   :  { %3839 = vmatprep.subr.bf16.mxu1 %v4171_v14 }
 0x412   :  { %3842 = vmatpush3.bf16.xpose.msk.msra.mxu1 %vm4258_vm3, %v3840_v36 }
 0x413   :  { %3843 = vmatprep.subr.bf16.mxu1 %v4171_v14 }
 0x41a   :  { %3846 = vmatpush3.bf16.xpose.msk.msra.mxu1 %vm4258_vm3, %v3844_v60 }
 0x41b   :  { %3688 = vmatprep.subr.bf16.mxu1 %v4562_v33 }
 0x421   :  { %3642 = vmatmul.mubr.msk.f32.vlgmr.msra.gmra.mrb[10].mxu1 %vm220_vm2, %v1204_v61 }
 0x422   :  { %3689 = vmatpush3.bf16.msra.mxu1 %v4562_v33 }
 0x423   :  { %3690 = vmatprep.subr.bf16.mxu1 %v1620_v20 }
 0x426   :  { %3691 = vmatpush3.bf16.msra.mxu1 %v1620_v20  ;;  %v4176_v20 = vmov 64  }
 0x427   :  { %3692 = vmatprep.subr.bf16.mxu1 %v1621_v30 }
 0x42a   :  { %3693 = vmatpush3.bf16.msra.mxu1 %v1621_v30 }
 0x42b   :  { %3694 = vmatprep.subr.bf16.mxu1 %v1622_v35 }
 0x42e   :  { %3695 = vmatpush3.bf16.msra.mxu1 %v1622_v35 }
 0x42f   :  { %3696 = vmatprep.subr.bf16.mxu1 %v1623_v0 }
 0x432   :  { %3697 = vmatpush3.bf16.msra.mxu1 %v1623_v0 }
 0x433   :  { %3698 = vmatprep.subr.bf16.mxu1 %v1624_v42 }
 0x436   :  { %3699 = vmatpush3.bf16.msra.mxu1 %v1624_v42 }
 0x437   :  { %3859 = vmatprep.subr.bf16.mxu1 %v4171_v14 }
 0x489   :  { %v4612_v19 = vpop.f32.mrb[12].mxu1 }
 0x48a   :  { %v4614_v41 = vpop.f32.mrb[13].mxu1 }
 0x48b   :  { %v4616_v59 = vpop.f32.mrb[14].mxu1 }
 0x48c   :  { %v4618_v1 = vpop.f32.mrb[15].mxu1 }
 0x48d   :  { %3961 = vrcp.f32 %v4618_v1 }
 0x48e   :  { %3963 = vrcp.f32 %v4545_v6 }
 0x48f   :  { %3965 = vrcp.f32 %v4547_v8 }
 0x490   :  { %3967 = vrcp.f32 %v4614_v41 }
 0x491   :  { %3969 = vrcp.f32 %v4616_v59 }
 0x492   :  { %3971 = vrcp.f32 %v4543_v44 }
 0x493   :  { %3973 = vrcp.f32 %v4557_v58 }
 0x494   :  { %3975 = vrcp.f32 %v4612_v19 }
 0x495   :  { %v4620_v7 = vpop.f32.mrb[16].mxu1  ;;  %3977 = vrcp.f32 %v4553_v39 }
 0x496   :  { %v4622_v62 = vpop.f32.mrb[17].mxu1 }
 0x497   :  { %v4624_v63 = vpop.f32.mrb[18].mxu1  ;;  %3979 = vrcp.f32 %v4622_v62 }
 0x498   :  { %v4626_v2 = vpop.f32.mrb[19].mxu1 }
 0x4c4   :  { %v3648_v28 = vpop.f32.mrb[28].mxu0 }
 0x4c5   :  { %2004 = vperm.xlu1 %3904, %v3648_v28   ;;  %v1548_v3 = vpop.f32.mrb[29].mxu0  ;;  %1632 = vperm.xlu0 %3906, %v3648_v28  }
 0x4c8   :  { %v3651_v4 = vpop.f32.mrb[30].mxu0 }
 0x4c9   :  { %3907 = vset.pattern.permute.xlu1 %v4174_v43  ;;  %v1558_v13 = vpop.f32.mrb[31].mxu0 }
 0x4ca   :  { %1627 = vperm.xlu1 %3907, %v1548_v3  }
 0x4cc   :  { %v3654_v16 = vpop.f32.mrb[32].mxu0 }
 0x4cd   :  { %1652 = vperm.xlu0 %3906, %v3654_v16   ;;  %v1568_v45 = vpop.f32.mrb[33].mxu0 }
 0x4ce   :  { %3908 = vset.pattern.permute.xlu1 %v4175_v54 }
 0x4cf   :  { %2000 = vperm.xlu1 %3908, %v1548_v3  }
 0x4d0   :  { %v3657_v47 = vpop.f32.mrb[34].mxu0 }
 0x4d1   :  { %3913 = vset.pattern.permute.xlu0 %v4175_v54  ;;  %v1578_v46 = vpop.f32.mrb[35].mxu0 }
 0x4d2   :  { %2020 = vperm.xlu0 %3913, %v3654_v16  }
 0x4d3   :  { %3909 = vset.pattern.permute.xlu1 %v4174_v43 }
 0x4d4   :  { %1642 = vperm.xlu1 %3909, %v3651_v4   ;;  %v3660_v33 = vpop.f32.mrb[36].mxu0 }
 0x4d5   :  { %v1588_v5 = vpop.f32.mrb[37].mxu0 }
 0x4d6   :  { %2024 = vperm.xlu0 %3913, %v1578_v46  }
 0x4d8   :  { %3910 = vset.pattern.permute.xlu1 %v4175_v54  ;;  %v3663_v48 = vpop.f32.mrb[38].mxu0 }
 0x4d9   :  { %2012 = vperm.xlu1 %3910, %v3651_v4   ;;  %v1598_v49 = vpop.f32.mrb[39].mxu0 }
 0x4da   :  { %2036 = vperm.xlu0 %3913, %v3660_v33  }
 0x4dd   :  { %3911 = vset.pattern.permute.xlu1 %v4174_v43 }
 0x4de   :  { %1637 = vperm.xlu1 %3911, %v1558_v13   ;;  %3919 = vset.pattern.permute.xlu0 %v4174_v43 }
 0x4df   :  { %1667 = vperm.xlu0 %3919, %v1588_v5  }
 0x4e2   :  { %3912 = vset.pattern.permute.xlu1 %v4175_v54 }
 0x4e3   :  { %2008 = vperm.xlu1 %3912, %v1558_v13   ;;  %3923 = vset.pattern.permute.xlu0 %v4175_v54  ;;  %v3352_v13 = vld [vmem:[%s5612_s4 + $0x8] sm:$0xff]  }
 0x4e4   :  { %2040 = vperm.xlu0 %3923, %v1598_v49  }
 0x4e7   :  { %3914 = vset.pattern.permute.xlu1 %v4174_v43 }
 0x4e8   :  { %1647 = vperm.xlu1 %3914, %v1568_v45   ;;  %3924 = vset.pattern.permute.xlu0 %v4176_v20 }
 0x4ec   :  { %3915 = vset.pattern.permute.xlu1 %v4175_v54 }
 0x4ed   :  { %2016 = vperm.xlu1 %3915, %v1568_v45  }
 0x4f1   :  { %3916 = vset.pattern.permute.xlu1 %v4174_v43 }
 0x4f2   :  { %1662 = vperm.xlu1 %3916, %v3657_v47  }
 0x4f4   :  { %v1475_v50 = vpop.f32.mrb[10].mxu1 }
 0x4f5   :  { %v3643_v51 = vpop.f32.mrb[11].mxu1  ;;  %v4646_v21 = vrot.slane %v1475_v50, %v4332_v57  ;;  %v4649_v22 = vrot.slane %v1475_v50, %v4415_v53 }
 0x4f6   :  { %3917 = vset.pattern.permute.xlu1 %v4175_v54 }
 0x4f7   :  { %2028 = vperm.xlu1 %3917, %v3657_v47  }
 0x4fb   :  { %3918 = vset.pattern.permute.xlu1 %v4174_v43 }
 0x4fc   :  { %1657 = vperm.xlu1 %3918, %v1578_v46  }
 0x500   :  { %1672 = vperm.xlu1 %3918, %v3660_v33  }
 0x504   :  { %3920 = vset.pattern.permute.xlu1 %v4175_v54 }
 0x505   :  { %2032 = vperm.xlu1 %3920, %v1588_v5   ;;  %v3332_v5 = vunpack.c.h.bf16 %v3352_v13 }
 0x509   :  { %3921 = vset.pattern.permute.xlu1 %v4174_v43 }
 0x50a   :  { %1682 = vperm.xlu1 %3921, %v3663_v48  }
 0x50e   :  { %1677 = vperm.xlu1 %3921, %v1598_v49  }
 0x512   :  { %3922 = vset.pattern.permute.xlu1 %v4175_v54 }
 0x513   :  { %2044 = vperm.xlu1 %3922, %v3663_v48  }
 0x517   :  { %3925 = vset.pattern.permute.xlu1 %v4176_v20 }
 0x544   :  { %v2005_v25 = vpop.permute.xlu1 %2004  ;;  %v1633_v26 = vpop.permute.xlu0 %1632 }
 0x545   :  { %v2052_v30 = vadd.f32 %v4649_v22, %v2005_v25  ;;  %v1690_v54 = vadd.f32 %v4646_v21, %v1633_v26 }
 0x547   :  { %v2064_v52 = vmul.f32 0.2, %v2052_v30  ;;  %v1702_v31 = vmul.f32 0.2, %v1690_v54 }
 0x549   :  { %v2076_v10 = vmax.f32 %v2052_v30, %v2064_v52  ;;  %v1714_v34 = vmax.f32 %v1690_v54, %v1702_v31  ;;  %v1628_v35 = vpop.permute.xlu1 %1627 }
 0x54a   :  { %v1689_v27 = vadd.f32 %v4646_v21, %v1628_v35 }
 0x54b   :  { %v4657_v18 = vadd.f32 %v3328_v32, %v2076_v10  ;;  %v4659_v12 = vadd.f32 %v3328_v32, %v1714_v34  ;;  %v3336_v34 = vunpack.c.h.bf16 %v3353_v29 }
 0x54c   :  { %v1701_v36 = vmul.f32 0.2, %v1689_v27  ;;  %v1653_v11 = vpop.permute.xlu0 %1652 }
 0x54d   :  { %v2102_v0 = vsel %vm1737_vm4, %v4657_v18, -inf  ;;  %v1741_v24 = vsel %vm1737_vm4, %v4659_v12, -inf  ;;  %v1694_v45 = vadd.f32 %v4646_v21, %v1653_v11 }
 0x54e   :  { %v1713_v40 = vmax.f32 %v1689_v27, %v1701_v36  ;;  %v2001_v38 = vpop.permute.xlu1 %2000  ;;  %2103 = vmax.xlane.f32.xlu0 %v2102_v0  ;;  %1742 = vmax.xlane.f32.xlu1 %v1741_v24 }
 0x54f   :  { %v2051_v60 = vadd.f32 %v4649_v22, %v2001_v38  ;;  %v1706_v51 = vmul.f32 0.2, %v1694_v45 }
 0x550   :  { %v4666_v42 = vadd.f32 %v3327_v37, %v1713_v40 }
 0x551   :  { %v2063_v61 = vmul.f32 0.2, %v2051_v60  ;;  %v2021_v46 = vpop.permute.xlu0 %2020  ;;  %v1718_v52 = vmax.f32 %v1694_v45, %v1706_v51 }
 0x552   :  { %v1738_v28 = vsel %vm1737_vm4, %v4666_v42, -inf  ;;  %v2056_v20 = vadd.f32 %v4649_v22, %v2021_v46 }
 0x553   :  { %v2075_v3 = vmax.f32 %v2051_v60, %v2063_v61  ;;  %v1643_v4 = vpop.permute.xlu1 %1642  ;;  %1739 = vmax.xlane.f32.xlu0 %v1738_v28  ;;  %v4693_v40 = vadd.f32 %v3336_v34, %v1718_v52 }
 0x554   :  { %v1692_v16 = vadd.f32 %v4646_v21, %v1643_v4  ;;  %v2068_v31 = vmul.f32 0.2, %v2056_v20 }
 0x555   :  { %v4675_v47 = vadd.f32 %v3327_v37, %v2075_v3  ;;  %v3331_v37 = vunpack.c.l.bf16 %v3352_v13  ;;  %v1753_v3 = vsel %vm1737_vm4, %v4693_v40, -inf }
 0x556   :  { %v1704_v33 = vmul.f32 0.2, %v1692_v16  ;;  %v2080_v0 = vmax.f32 %v2056_v20, %v2068_v31 }
 0x557   :  { %v2099_v48 = vsel %vm1737_vm4, %v4675_v47, -inf }
 0x558   :  { %v1716_v49 = vmax.f32 %v1692_v16, %v1704_v33  ;;  %v2013_v50 = vpop.permute.xlu1 %2012  ;;  %2100 = vmax.xlane.f32.xlu0 %v2099_v48  ;;  %v4700_v4 = vadd.f32 %v3336_v34, %v2080_v0 }
 0x559   :  { %v2054_v25 = vadd.f32 %v4649_v22, %v2013_v50 }
 0x55a   :  { %v4681_v26 = vadd.f32 %v3332_v5, %v1716_v49  ;;  %v2114_v33 = vsel %vm1737_vm4, %v4700_v4, -inf  ;;  %v3335_v49 = vunpack.c.l.bf16 %v3353_v29 }
 0x55b   :  { %v2066_v30 = vmul.f32 0.2, %v2054_v25 }
 0x55c   :  { %v1747_v54 = vsel %vm1737_vm4, %v4681_v26, -inf }
 0x55d   :  { %v2078_v32 = vmax.f32 %v2054_v25, %v2066_v30  ;;  %v1638_v10 = vpop.permute.xlu1 %1637  ;;  %1748 = vmax.xlane.f32.xlu0 %v1747_v54  ;;  %v2025_v25 = vpop.permute.xlu0 %2024 }
 0x55e   :  { %v1691_v35 = vadd.f32 %v4646_v21, %v1638_v10 }
 0x55f   :  { %v4689_v27 = vadd.f32 %v3332_v5, %v2078_v32 }
 0x560   :  { %v1703_v36 = vmul.f32 0.2, %v1691_v35 }
 0x561   :  { %v2108_v24 = vsel %vm1737_vm4, %v4689_v27, -inf  ;;  %v2037_v34 = vpop.permute.xlu0 %2036 }
 0x562   :  { %v1715_v38 = vmax.f32 %v1691_v35, %v1703_v36  ;;  %v2009_v60 = vpop.permute.xlu1 %2008  ;;  %2109 = vmax.xlane.f32.xlu0 %v2108_v24  ;;  %v3354_v36 = vld [vmem:[%s5612_s4 + $0x18] sm:$0xff]  }
 0x563   :  { %v2053_v11 = vadd.f32 %v4649_v22, %v2009_v60  ;;  %v3340_v0 = vunpack.c.h.bf16 %v3354_v36 }
 0x564   :  { %v4696_v61 = vadd.f32 %v3331_v37, %v1715_v38 }
 0x565   :  { %v2065_v28 = vmul.f32 0.2, %v2053_v11 }
 0x566   :  { %1754 = vmax.xlane.f32.xlu0 %v1753_v3  ;;  %v1744_v13 = vsel %vm1737_vm4, %v4696_v61, -inf }
 0x567   :  { %v2077_v16 = vmax.f32 %v2053_v11, %v2065_v28  ;;  %v1648_v45 = vpop.permute.xlu1 %1647  ;;  %1745 = vmax.xlane.f32.xlu1 %v1744_v13  ;;  %v2057_v11 = vadd.f32 %v4649_v22, %v2025_v25  ;;  %v1668_v13 = vpop.permute.xlu0 %1667 }
 0x568   :  { %v1693_v46 = vadd.f32 %v4646_v21, %v1648_v45 }
 0x569   :  { %v4707_v5 = vadd.f32 %v3331_v37, %v2077_v16 }
 0x56a   :  { %v1705_v48 = vmul.f32 0.2, %v1693_v46  ;;  %2115 = vmax.xlane.f32.xlu0 %v2114_v33 }
 0x56b   :  { %v2105_v50 = vsel %vm1737_vm4, %v4707_v5, -inf }
 0x56c   :  { %v1717_v51 = vmax.f32 %v1693_v46, %v1705_v48  ;;  %v2017_v20 = vpop.permute.xlu1 %2016  ;;  %2106 = vmax.xlane.f32.xlu1 %v2105_v50  ;;  %v2069_v46 = vmul.f32 0.2, %v2057_v11  ;;  %v1697_v50 = vadd.f32 %v4646_v21, %v1668_v13 }
 0x56d   :  { %v2055_v30 = vadd.f32 %v4649_v22, %v2017_v20 }
 0x56e   :  { %v4712_v54 = vadd.f32 %v3335_v49, %v1717_v51 }
 0x56f   :  { %v2067_v52 = vmul.f32 0.2, %v2055_v30 }
 0x570   :  { %v1750_v31 = vsel %vm1737_vm4, %v4712_v54, -inf }
 0x571   :  { %v2079_v32 = vmax.f32 %v2055_v30, %v2067_v52  ;;  %v1663_v10 = vpop.permute.xlu1 %1662  ;;  %1751 = vmax.xlane.f32.xlu1 %v1750_v31  ;;  %v2081_v30 = vmax.f32 %v2057_v11, %v2069_v46 }
 0x572   :  { %v1696_v29 = vadd.f32 %v4646_v21, %v1663_v10 }
 0x573   :  { %v4717_v35 = vadd.f32 %v3335_v49, %v2079_v32  ;;  %v2060_v49 = vadd.f32 %v4649_v22, %v2037_v34  ;;  %v3339_v32 = vunpack.c.l.bf16 %v3354_v36  ;;  %v3355_v34 = vld [vmem:[%s5612_s4 + $0x20] sm:$0xff]  }
 0x574   :  { %v1708_v37 = vmul.f32 0.2, %v1696_v29 }
 0x575   :  { %v2111_v24 = vsel %vm1737_vm4, %v4717_v35, -inf  ;;  %v2072_v10 = vmul.f32 0.2, %v2060_v49  ;;  %v4743_v11 = vadd.f32 %v3339_v32, %v2081_v30 }
 0x576   :  { %v1720_v38 = vmax.f32 %v1696_v29, %v1708_v37  ;;  %v2029_v60 = vpop.permute.xlu1 %2028  ;;  %2112 = vmax.xlane.f32.xlu1 %v2111_v24  ;;  %v1709_v29 = vmul.f32 0.2, %v1697_v50 }
 0x577   :  { %v2058_v28 = vadd.f32 %v4649_v22, %v2029_v60  ;;  %v3344_v60 = vunpack.c.h.bf16 %v3355_v34  ;;  %v2084_v13 = vmax.f32 %v2060_v49, %v2072_v10  ;;  %v2117_v30 = vsel %vm1737_vm4, %v4743_v11, -inf }
 0x578   :  { %v4726_v3 = vadd.f32 %v3340_v0, %v1720_v38 }
 0x579   :  { %v2070_v16 = vmul.f32 0.2, %v2058_v28  ;;  %v4754_v49 = vadd.f32 %v3344_v60, %v2084_v13 }
 0x57a   :  { %v1759_v45 = vsel %vm1737_vm4, %v4726_v3, -inf }
 0x57b   :  { %v2082_v33 = vmax.f32 %v2058_v28, %v2070_v16  ;;  %v1658_v48 = vpop.permute.xlu1 %1657  ;;  %1760 = vmax.xlane.f32.xlu0 %v1759_v45  ;;  %v3343_v28 = vunpack.c.l.bf16 %v3355_v34  ;;  %v1721_v16 = vmax.f32 %v1697_v50, %v1709_v29 }
 0x57c   :  { %v1695_v51 = vadd.f32 %v4646_v21, %v1658_v48 }
 0x57d   :  { %v4733_v20 = vadd.f32 %v3340_v0, %v2082_v33  ;;  %v4756_v50 = vadd.f32 %v3343_v28, %v1721_v16 }
 0x57e   :  { %v1707_v25 = vmul.f32 0.2, %v1695_v51 }
 0x57f   :  { %v1673_v52 = vpop.permute.xlu1 %1672  ;;  %v2120_v31 = vsel %vm1737_vm4, %v4733_v20, -inf }
 0x580   :  { %v1719_v37 = vmax.f32 %v1695_v51, %v1707_v25  ;;  %v1698_v24 = vadd.f32 %v4646_v21, %v1673_v52  ;;  %2121 = vmax.xlane.f32.xlu0 %v2120_v31  ;;  %v2041_v51 = vpop.permute.xlu0 %2040 }
 0x581   :  { %v2061_v10 = vadd.f32 %v4649_v22, %v2041_v51 }
 0x582   :  { %v1710_v38 = vmul.f32 0.2, %v1698_v24  ;;  %v4741_v0 = vadd.f32 %v3339_v32, %v1719_v37  ;;  %v3356_v37 = vld [vmem:[%s5612_s4 + $0x28] sm:$0xff]  }
 0x584   :  { %v1722_v36 = vmax.f32 %v1698_v24, %v1710_v38  ;;  %v2033_v45 = vpop.permute.xlu1 %2032  ;;  %v1756_v46 = vsel %vm1737_vm4, %v4741_v0, -inf  ;;  %v3348_v24 = vunpack.c.h.bf16 %v3356_v37  ;;  %v2126_v38 = vsel %vm1737_vm4, %v4754_v49, -inf }
 0x585   :  { %v2059_v33 = vadd.f32 %v4649_v22, %v2033_v45  ;;  %1757 = vmax.xlane.f32.xlu1 %v1756_v46 }
 0x586   :  { %v4748_v48 = vadd.f32 %v3344_v60, %v1722_v36  ;;  %v1762_v60 = vsel %vm1737_vm4, %v4756_v50, -inf  ;;  %v2073_v36 = vmul.f32 0.2, %v2061_v10 }
 0x587   :  { %v2071_v25 = vmul.f32 0.2, %v2059_v33 }
 0x588   :  { %v1765_v52 = vsel %vm1737_vm4, %v4748_v48, -inf }
 0x589   :  { %v2083_v31 = vmax.f32 %v2059_v33, %v2071_v25  ;;  %v1683_v32 = vpop.permute.xlu1 %1682  ;;  %1766 = vmax.xlane.f32.xlu0 %v1765_v52  ;;  %2118 = vmax.xlane.f32.xlu1 %v2117_v30  ;;  %v2085_v52 = vmax.f32 %v2061_v10, %v2073_v36 }
 0x58a   :  { %v1700_v29 = vadd.f32 %v4646_v21, %v1683_v32 }
 0x58b   :  { %v4767_v13 = vadd.f32 %v3343_v28, %v2083_v31  ;;  %v3347_v31 = vunpack.c.l.bf16 %v3356_v37  ;;  %v3960_v37 = vpop.eup %3959 }
 0x58c   :  { %v1712_v34 = vmul.f32 0.2, %v1700_v29 }
 0x58d   :  { %v1678_v16 = vpop.permute.xlu1 %1677  ;;  %2127 = vmax.xlane.f32.xlu0 %v2126_v38  ;;  %1763 = vmax.xlane.f32.xlu1 %v1762_v60  ;;  %v2123_v51 = vsel %vm1737_vm4, %v4767_v13, -inf  ;;  %v4781_v60 = vadd.f32 %v3347_v31, %v2085_v52 }
 0x58e   :  { %v1724_v45 = vmax.f32 %v1700_v29, %v1712_v34  ;;  %v1699_v46 = vadd.f32 %v4646_v21, %v1678_v16 }
 0x58f   :  { %v2129_v36 = vsel %vm1737_vm4, %v4781_v60, -inf }
 0x590   :  { %v1711_v33 = vmul.f32 0.2, %v1699_v46  ;;  %v4772_v25 = vadd.f32 %v3348_v24, %v1724_v45 }
 0x591   :  { %2124 = vmax.xlane.f32.xlu1 %v2123_v51 }
 0x592   :  { %v1723_v30 = vmax.f32 %v1699_v46, %v1711_v33  ;;  %v2045_v32 = vpop.permute.xlu1 %2044  ;;  %v1771_v28 = vsel %vm1737_vm4, %v4772_v25, -inf }
 0x593   :  { %v2062_v38 = vadd.f32 %v4649_v22, %v2045_v32  ;;  %1772 = vmax.xlane.f32.xlu0 %v1771_v28 }
 0x594   :  { %v4777_v29 = vadd.f32 %v3347_v31, %v1723_v30 }
 0x595   :  { %v2074_v21 = vmul.f32 0.2, %v2062_v38 }
 0x596   :  { %v1768_v34 = vsel %vm1737_vm4, %v4777_v29, -inf }
 0x597   :  { %v2086_v16 = vmax.f32 %v2062_v38, %v2074_v21  ;;  %1769 = vmax.xlane.f32.xlu1 %v1768_v34 }
 0x599   :  { %v4783_v10 = vadd.f32 %v3348_v24, %v2086_v16  ;;  %v3962_v24 = vpop.eup %3961 }
 0x59a   :  { %v3964_v45 = vpop.eup %3963 }
 0x59b   :  { %2130 = vmax.xlane.f32.xlu1 %v2129_v36  ;;  %v2132_v22 = vsel %vm1737_vm4, %v4783_v10, -inf  ;;  %v3966_v46 = vpop.eup %3965 }
 0x59c   :  { %2133 = vmax.xlane.f32.xlu0 %v2132_v22  ;;  %v3968_v33 = vpop.eup %3967 }
 0x59d   :  { %v3970_v51 = vpop.eup %3969 }
 0x59e   :  { %v3972_v52 = vpop.eup %3971 }
 0x59f   :  { %v3974_v30 = vpop.eup %3973 }
 0x5a0   :  { %v3976_v32 = vpop.eup %3975 }
 0x5a1   :  { %v3978_v28 = vpop.eup %3977 }
 0x5a2   :  { %v3980_v31 = vpop.eup %3979 }
 0x5ac   :  { %658 = vperm.xlu1 %3925, %v3960_v37  }
 0x5b0   :  { %911 = vperm.xlu1 %3925, %v3962_v24  }
 0x5b2   :  { %653 = vperm.xlu0 %3924, %v3964_v45  }
 0x5b4   :  { %668 = vperm.xlu1 %3925, %v3966_v46  }
 0x5b6   :  { %906 = vperm.xlu0 %3924, %v3968_v33  }
 0x5b8   :  { %921 = vperm.xlu1 %3925, %v3970_v51  }
 0x5ba   :  { %663 = vperm.xlu0 %3924, %v3972_v52  }
 0x5bc   :  { %678 = vperm.xlu1 %3925, %v3974_v30  }
 0x5be   :  { %916 = vperm.xlu0 %3924, %v3976_v32  }
 0x5c2   :  { %673 = vperm.xlu0 %3924, %v3978_v28  }
 0x5c6   :  { %926 = vperm.xlu0 %3924, %v3980_v31  }
 0x5db   :  { %v1743_v38 = vpop.xlane.xlu1 %1742  ;;  %v2104_v21 = vpop.xlane.xlu0 %2103 }
 0x5dc   :  { %v1775_v34 = vsub.f32 %v4659_v12, %v1743_v38  ;;  %v2136_v22 = vsub.f32 %v4657_v18, %v2104_v21 }
 0x5de   :  { %v1788_v16 = vmul.f32 1.442695, %v1775_v34  ;;  %v2149_v45 = vmul.f32 1.442695, %v2136_v22 }
 0x5e0   :  { %v1740_v36 = vpop.xlane.xlu0 %1739  ;;  %3981 = vpow2.f32 %v1788_v16 }
 0x5e1   :  { %v1774_v37 = vsub.f32 %v4666_v42, %v1740_v36 }
 0x5e3   :  { %v1786_v24 = vmul.f32 1.442695, %v1774_v37 }
 0x5e5   :  { %3983 = vpow2.f32 %v1786_v24  ;;  %v2101_v46 = vpop.xlane.xlu0 %2100 }
 0x5e6   :  { %v2135_v33 = vsub.f32 %v4675_v47, %v2101_v46  ;;  %3985 = vpow2.f32 %v2149_v45 }
 0x5e8   :  { %v2147_v51 = vmul.f32 1.442695, %v2135_v33 }
 0x5ea   :  { %3987 = vpow2.f32 %v2147_v51  ;;  %v1749_v52 = vpop.xlane.xlu0 %1748  ;;  %v3982_v30 = vpop.eup %3981 }
 0x5eb   :  { %v1777_v12 = vsub.f32 %v4681_v26, %v1749_v52 }
 0x5ed   :  { %v1792_v38 = vmul.f32 1.442695, %v1777_v12 }
 0x5ef   :  { %v3984_v32 = vpop.eup %3983  ;;  %v2110_v28 = vpop.xlane.xlu0 %2109  ;;  %3989 = vpow2.f32 %v1792_v38 }
 0x5f0   :  { %v1810_v31 = vpack.c.bf16 %v3982_v30, %v3984_v32  ;;  %v3986_v18 = vpop.eup %3985  ;;  %v2138_v34 = vsub.f32 %v4689_v27, %v2110_v28 }
 0x5f2   :  { %3676 = vmatprep.mubr.msk.bf16.mxu0 %vm1737_vm4, %v1810_v31  ;;  %v2153_v37 = vmul.f32 1.442695, %v2138_v34 }
 0x5f3   :  { %v1755_v36 = vpop.xlane.xlu0 %1754 }
 0x5f4   :  { %v3988_v42 = vpop.eup %3987  ;;  %v1746_v21 = vpop.xlane.xlu1 %1745  ;;  %v1779_v24 = vsub.f32 %v4693_v40, %v1755_v36 }
 0x5f5   :  { %v1776_v47 = vsub.f32 %v4696_v61, %v1746_v21  ;;  %v2171_v16 = vpack.c.bf16 %v3986_v18, %v3988_v42 }
 0x5f6   :  { %v1796_v51 = vmul.f32 1.442695, %v1779_v24 }
 0x5f7   :  { %v1790_v22 = vmul.f32 1.442695, %v1776_v47  ;;  %3700 = vmatprep.mubr.msk.bf16.mxu1 %vm1737_vm4, %v2171_v16  ;;  %v2116_v46 = vpop.xlane.xlu0 %2115 }
 0x5f8   :  { %v2140_v61 = vsub.f32 %v4700_v4, %v2116_v46 }
 0x5f9   :  { %3991 = vpow2.f32 %v1790_v22  ;;  %v2107_v26 = vpop.xlane.xlu1 %2106  ;;  %v3990_v32 = vpop.eup %3989 }
 0x5fa   :  { %v2137_v45 = vsub.f32 %v4707_v5, %v2107_v26  ;;  %3993 = vpow2.f32 %v2153_v37  ;;  %v2157_v28 = vmul.f32 1.442695, %v2140_v61 }
 0x5fc   :  { %v2151_v33 = vmul.f32 1.442695, %v2137_v45 }
 0x5fe   :  { %3995 = vpow2.f32 %v2151_v33  ;;  %v1752_v27 = vpop.xlane.xlu1 %1751 }
 0x5ff   :  { %v1778_v52 = vsub.f32 %v4712_v54, %v1752_v27  ;;  %3997 = vpow2.f32 %v1796_v51 }
 0x601   :  { %v1794_v30 = vmul.f32 1.442695, %v1778_v52 }
 0x603   :  { %v3992_v12 = vpop.eup %3991  ;;  %3999 = vpow2.f32 %v1794_v30  ;;  %v2113_v31 = vpop.xlane.xlu1 %2112 }
 0x604   :  { %v1811_v40 = vpack.c.bf16 %v3990_v32, %v3992_v12  ;;  %v2139_v5 = vsub.f32 %v4717_v35, %v2113_v31  ;;  %v3994_v42 = vpop.eup %3993  ;;  %4001 = vpow2.f32 %v2157_v28 }
 0x606   :  { %v2155_v18 = vmul.f32 1.442695, %v2139_v5  ;;  %3677 = vmatmul.mubr.msk.bf16.vlgmr.msra.gmra.mrb[40].mxu0 %vm1737_vm4, %v1811_v40 }
 0x608   :  { %v3996_v38 = vpop.eup %3995  ;;  %4003 = vpow2.f32 %v2155_v18  ;;  %v1761_v4 = vpop.xlane.xlu0 %1760 }
 0x609   :  { %v2172_v21 = vpack.c.bf16 %v3994_v42, %v3996_v38  ;;  %v3998_v54 = vpop.eup %3997  ;;  %v1781_v47 = vsub.f32 %v4726_v3, %v1761_v4 }
 0x60b   :  { %3701 = vmatmul.mubr.msk.bf16.vlgmr.msra.gmra.mrb[20].mxu1 %vm1737_vm4, %v2172_v21  ;;  %v1800_v37 = vmul.f32 1.442695, %v1781_v47 }
 0x60d   :  { %v4000_v34 = vpop.eup %3999  ;;  %v2122_v36 = vpop.xlane.xlu0 %2121  ;;  %4005 = vpow2.f32 %v1800_v37 }
 0x60e   :  { %v1812_v16 = vpack.c.bf16 %v3998_v54, %v4000_v34  ;;  %v4002_v35 = vpop.eup %4001  ;;  %v2142_v26 = vsub.f32 %v4733_v20, %v2122_v36 }
 0x610   :  { %3680 = vmatprep.mubr.msk.bf16.mxu0 %vm1737_vm4, %v1812_v16  ;;  %v2161_v51 = vmul.f32 1.442695, %v2142_v26 }
 0x612   :  { %v4004_v22 = vpop.eup %4003  ;;  %v1758_v24 = vpop.xlane.xlu1 %1757 }
 0x613   :  { %v1780_v45 = vsub.f32 %v4741_v0, %v1758_v24  ;;  %v2173_v46 = vpack.c.bf16 %v4002_v35, %v4004_v22 }
 0x615   :  { %v1798_v33 = vmul.f32 1.442695, %v1780_v45  ;;  %3704 = vmatprep.mubr.msk.bf16.mxu1 %vm1737_vm4, %v2173_v46 }
 0x616   :  { %v2119_v27 = vpop.xlane.xlu1 %2118  ;;  %v1767_v3 = vpop.xlane.xlu0 %1766 }
 0x617   :  { %4007 = vpow2.f32 %v1798_v33  ;;  %v2141_v61 = vsub.f32 %v4743_v11, %v2119_v27  ;;  %v1783_v52 = vsub.f32 %v4748_v48, %v1767_v3  ;;  %v4006_v11 = vpop.eup %4005  ;;  %v4833_v33 = vand.u32 127, %v478_v55 }
 0x618   :  { %4009 = vpow2.f32 %v2161_v51 }
 0x619   :  { %v2159_v30 = vmul.f32 1.442695, %v2141_v61  ;;  %v1804_v32 = vmul.f32 1.442695, %v1783_v52  ;;  %vm954_vm5 = vcmp.lt.s32.totalorder %v4833_v33, 32 }
 0x61a   :  { %v1764_v20 = vpop.xlane.xlu1 %1763  ;;  %v2128_v12 = vpop.xlane.xlu0 %2127 }
 0x61b   :  { %4011 = vpow2.f32 %v2159_v30  ;;  %v1782_v0 = vsub.f32 %v4756_v50, %v1764_v20  ;;  %v2144_v28 = vsub.f32 %v4754_v49, %v2128_v12 }
 0x61c   :  { %4013 = vpow2.f32 %v1804_v32 }
 0x61d   :  { %v1802_v31 = vmul.f32 1.442695, %v1782_v0  ;;  %v2165_v40 = vmul.f32 1.442695, %v2144_v28 }
 0x61e   :  { %v2125_v5 = vpop.xlane.xlu1 %2124 }
 0x61f   :  { %4015 = vpow2.f32 %v1802_v31  ;;  %v2143_v18 = vsub.f32 %v4767_v13, %v2125_v5 }
 0x620   :  { %v1773_v42 = vpop.xlane.xlu0 %1772  ;;  %4017 = vpow2.f32 %v2165_v40 }
 0x621   :  { %v4008_v48 = vpop.eup %4007  ;;  %v2163_v38 = vmul.f32 1.442695, %v2143_v18  ;;  %v1785_v4 = vsub.f32 %v4772_v25, %v1773_v42 }
 0x622   :  { %v1813_v21 = vpack.c.bf16 %v4006_v11, %v4008_v48  ;;  %v4010_v54 = vpop.eup %4009 }
 0x623   :  { %4019 = vpow2.f32 %v2163_v38  ;;  %v1808_v50 = vmul.f32 1.442695, %v1785_v4 }
 0x624   :  { %v1770_v34 = vpop.xlane.xlu1 %1769  ;;  %3681 = vmatmul.mubr.msk.bf16.gmra.mrb[44].mxu0 %vm1737_vm4, %v1813_v21 }
 0x625   :  { %v4012_v49 = vpop.eup %4011  ;;  %v1784_v47 = vsub.f32 %v4777_v29, %v1770_v34  ;;  %4021 = vpow2.f32 %v1808_v50 }
 0x626   :  { %v2174_v16 = vpack.c.bf16 %v4010_v54, %v4012_v49  ;;  %v4014_v13 = vpop.eup %4013 }
 0x627   :  { %v1806_v36 = vmul.f32 1.442695, %v1784_v47 }
 0x628   :  { %v2131_v35 = vpop.xlane.xlu1 %2130  ;;  %3705 = vmatmul.mubr.msk.bf16.gmra.mrb[24].mxu1 %vm1737_vm4, %v2174_v16 }
 0x629   :  { %v4016_v22 = vpop.eup %4015  ;;  %4023 = vpow2.f32 %v1806_v36  ;;  %v2145_v25 = vsub.f32 %v4781_v60, %v2131_v35  ;;  %v2134_v37 = vpop.xlane.xlu0 %2133 }
 0x62a   :  { %v2146_v26 = vsub.f32 %v4783_v10, %v2134_v37  ;;  %v1814_v24 = vpack.c.bf16 %v4014_v13, %v4016_v22  ;;  %v4018_v46 = vpop.eup %4017 }
 0x62b   :  { %v2167_v45 = vmul.f32 1.442695, %v2145_v25 }
 0x62c   :  { %v2169_v29 = vmul.f32 1.442695, %v2146_v26  ;;  %v659_v51 = vpop.permute.xlu1 %658  ;;  %3684 = vmatprep.mubr.msk.bf16.mxu0 %vm1737_vm4, %v1814_v24 }
 0x62d   :  { %v4020_v27 = vpop.eup %4019  ;;  %4025 = vpow2.f32 %v2167_v45  ;;  %v692_v10 = vmul.f32 %v659_v51, %v4549_v9 }
 0x62e   :  { %4027 = vpow2.f32 %v2169_v29  ;;  %v2175_v3 = vpack.c.bf16 %v4018_v46, %v4020_v27 }
 0x62f   :  { %v4022_v55 = vpop.eup %4021 }
 0x630   :  { %v912_v60 = vpop.permute.xlu1 %911  ;;  %3708 = vmatprep.mubr.msk.bf16.mxu1 %vm1737_vm4, %v2175_v3 }
 0x631   :  { %v945_v61 = vmul.f32 %v912_v60, %v4618_v1  ;;  %v654_v52 = vpop.permute.xlu0 %653 }
 0x632   :  { %v691_v28 = vmul.f32 %v654_v52, %v4545_v6 }
 0x633   :  { %v4024_v30 = vpop.eup %4023  ;;  %v4842_v32 = vsel %vm954_vm5, %v692_v10, %v945_v61 }
 0x634   :  { %v669_v20 = vpop.permute.xlu1 %668  ;;  %v1815_v12 = vpack.c.bf16 %v4022_v55, %v4024_v30 }
 0x635   :  { %v907_v0 = vpop.permute.xlu0 %906  ;;  %v694_v18 = vmul.f32 %v4547_v8, %v669_v20 }
 0x636   :  { %v944_v31 = vmul.f32 %v907_v0, %v4614_v41  ;;  %3685 = vmatmul.mubr.msk.bf16.gmra.mrb[48].mxu0 %vm1737_vm4, %v1815_v12 }
 0x637   :  { %v4026_v40 = vpop.eup %4025  ;;  %3728 = vmatprep.mubr.msk.f32.mxu0 %vm4172_vm1, %v4173_v15 }
 0x638   :  { %v4028_v9 = vpop.eup %4027  ;;  %v922_v1 = vpop.permute.xlu1 %921  ;;  %v4851_v5 = vsel %vm954_vm5, %v691_v28, %v944_v31 }
 0x639   :  { %v947_v11 = vmul.f32 %v4616_v59, %v922_v1  ;;  %v664_v42 = vpop.permute.xlu0 %663  ;;  %v2176_v6 = vpack.c.bf16 %v4028_v9, %v4026_v40 }
 0x63a   :  { %v693_v38 = vmul.f32 %v4543_v44, %v664_v42 }
 0x63b   :  { %3709 = vmatmul.mubr.msk.bf16.gmra.mrb[28].mxu1 %vm1737_vm4, %v2176_v6  ;;  %v4858_v41 = vsel %vm954_vm5, %v694_v18, %v947_v11 }
 0x63c   :  { %3755 = vmatprep.mubr.msk.f32.mxu1 %vm4172_vm1, %v4173_v15 }
 0x63d   :  { %v917_v48 = vpop.permute.xlu0 %916 }
 0x63e   :  { %v946_v4 = vmul.f32 %v4612_v19, %v917_v48 }
 0x640   :  { %v4866_v8 = vsel %vm954_vm5, %v693_v38, %v946_v4 }
 0x641   :  { %v674_v59 = vpop.permute.xlu0 %673 }
 0x642   :  { %v695_v54 = vmul.f32 %v674_v59, %v4553_v39 }
 0x645   :  { %v927_v21 = vpop.permute.xlu0 %926 }
 0x646   :  { %v948_v50 = vmul.f32 %v927_v21, %v4622_v62 }
 0x648   :  { %v4872_v34 = vsel %vm954_vm5, %v695_v54, %v948_v50 }
 0x6d9   :  { %v4874_v49 = vpop.f32.mrb[40].mxu0 }
 0x6da   :  { %4029 = vrcp.f32 %v4874_v49  ;;  %v4877_v44 = vpop.f32.mrb[41].mxu0 }
 0x6db   :  { %v4879_v19 = vpop.f32.mrb[42].mxu0 }
 0x6dc   :  { %v4881_v47 = vpop.f32.mrb[43].mxu0 }
 0x6dd   :  { %4031 = vrcp.f32 %v4881_v47 }
 0x6de   :  { %v4884_v16 = vpop.f32.mrb[20].mxu1 }
 0x6df   :  { %4033 = vrcp.f32 %v4884_v16  ;;  %v4887_v39 = vpop.f32.mrb[21].mxu1 }
 0x6e0   :  { %v4889_v62 = vpop.f32.mrb[22].mxu1  ;;  %4035 = vrcp.f32 %v4877_v44 }
 0x6e1   :  { %v4891_v36 = vpop.f32.mrb[23].mxu1  ;;  %4037 = vrcp.f32 %v4887_v39 }
 0x6e2   :  { %4039 = vrcp.f32 %v4879_v19 }
 0x6e3   :  { %4041 = vrcp.f32 %v4889_v62 }
 0x6e4   :  { %v4030_v13 = vpop.eup %4029  ;;  %4043 = vrcp.f32 %v4891_v36 }
 0x6e5   :  { %1939 = vperm.xlu1 %3925, %v4030_v13  }
 0x6e7   :  { %v4032_v35 = vpop.eup %4031 }
 0x6e8   :  { %1934 = vperm.xlu0 %3924, %v4032_v35  }
 0x6e9   :  { %v4034_v22 = vpop.eup %4033 }
 0x6ea   :  { %2300 = vperm.xlu1 %3925, %v4034_v22   ;;  %v4036_v25 = vpop.eup %4035 }
 0x6eb   :  { %v4038_v37 = vpop.eup %4037 }
 0x6ec   :  { %v4040_v26 = vpop.eup %4039 }
 0x6ed   :  { %v4042_v46 = vpop.eup %4041 }
 0x6ee   :  { %1929 = vperm.xlu1 %3925, %v4036_v25   ;;  %v4044_v60 = vpop.eup %4043 }
 0x6f2   :  { %2290 = vperm.xlu1 %3925, %v4038_v37  }
 0x6f6   :  { %1944 = vperm.xlu1 %3925, %v4040_v26  }
 0x6f7   :  { %v4898_v24 = vpop.f32.mrb[44].mxu0 }
 0x6f8   :  { %4045 = vrcp.f32 %v4898_v24  ;;  %v4901_v45 = vpop.f32.mrb[45].mxu0 }
 0x6f9   :  { %4047 = vrcp.f32 %v4901_v45  ;;  %v4904_v29 = vpop.f32.mrb[46].mxu0 }
 0x6fa   :  { %2305 = vperm.xlu1 %3925, %v4042_v46   ;;  %v4906_v51 = vpop.f32.mrb[47].mxu0 }
 0x6fb   :  { %v4908_v27 = vpop.f32.mrb[24].mxu1 }
 0x6fc   :  { %4049 = vrcp.f32 %v4908_v27  ;;  %v4911_v3 = vpop.f32.mrb[25].mxu1 }
 0x6fd   :  { %4051 = vrcp.f32 %v4904_v29  ;;  %v4914_v10 = vpop.f32.mrb[26].mxu1 }
 0x6fe   :  { %2295 = vperm.xlu1 %3925, %v4044_v60   ;;  %v4916_v61 = vpop.f32.mrb[27].mxu1  ;;  %4053 = vrcp.f32 %v4911_v3  ;;  %v4955_v60 = vld [vmem:[%s5609_s2 + $0x24] ss:$0 sm:$0xff] }
 0x6ff   :  { %4055 = vrcp.f32 %v4914_v10 }
 0x700   :  { %4057 = vrcp.f32 %v4906_v51 }
 0x701   :  { %4059 = vrcp.f32 %v4916_v61 }
 0x702   :  { %v4046_v52 = vpop.eup %4045 }
 0x703   :  { %v4048_v55 = vpop.eup %4047  ;;  %1959 = vperm.xlu0 %3924, %v4046_v52   ;;  %v4959_v52 = vadd.f32 %v4955_v60, %v4842_v32 }
 0x704   :  { %1949 = vperm.xlu1 %3925, %v4048_v55  }
 0x705   :  { %v978_v55 = vsel %vm220_vm2, %v4959_v52, 0.0 }
 0x706   :  { %v4050_v30 = vpop.eup %4049 }
 0x707   :  { %v4052_v20 = vpop.eup %4051  ;;  %2320 = vperm.xlu0 %3924, %v4050_v30   ;;  %v4965_v30 = vadd.f32 %v4955_v60, %v4851_v5 }
 0x708   :  { %1964 = vperm.xlu1 %3925, %v4052_v20   ;;  %v4054_v0 = vpop.eup %4053  ;;  %v4969_v20 = vpop.permute.xlu1 %678 }
 0x709   :  { %v4922_v12 = vpop.f32.mrb[48].mxu0  ;;  %v4056_v31 = vpop.eup %4055 }
 0x70a   :  { %4061 = vrcp.f32 %v4922_v12  ;;  %v4925_v28 = vpop.f32.mrb[49].mxu0  ;;  %v4058_v18 = vpop.eup %4057 }
 0x70b   :  { %2310 = vperm.xlu0 %3924, %v4054_v0   ;;  %v4927_v40 = vpop.f32.mrb[50].mxu0  ;;  %v4060_v48 = vpop.eup %4059 }
 0x70c   :  { %4063 = vrcp.f32 %v4927_v40  ;;  %2325 = vperm.xlu1 %3925, %v4056_v31   ;;  %v4930_v9 = vpop.f32.mrb[51].mxu0 }
 0x70e   :  { %v4932_v1 = vpop.f32.mrb[28].mxu1 }
 0x70f   :  { %4065 = vrcp.f32 %v4932_v1  ;;  %v4935_v11 = vpop.f32.mrb[29].mxu1 }
 0x710   :  { %1954 = vperm.xlu1 %3925, %v4058_v18   ;;  %v4937_v42 = vpop.f32.mrb[30].mxu1 }
 0x711   :  { %4067 = vrcp.f32 %v4937_v42  ;;  %v4940_v6 = vpop.f32.mrb[31].mxu1 }
 0x712   :  { %4069 = vrcp.f32 %v4925_v28 }
 0x713   :  { %4071 = vrcp.f32 %v4930_v9 }
 0x714   :  { %v4062_v38 = vpop.eup %4061  ;;  %2315 = vperm.xlu1 %3925, %v4060_v48   ;;  %4073 = vrcp.f32 %v4935_v11  ;;  %v4976_v48 = vld [vmem:[%s5609_s2 + $0x4c] ss:$0 sm:$0xff] }
 0x715   :  { %1979 = vperm.xlu0 %3924, %v4062_v38   ;;  %4075 = vrcp.f32 %v4940_v6 }
 0x716   :  { %v4064_v4 = vpop.eup %4063  ;;  %4077 = vrcp.f32 %v4551_v17 }
 0x717   :  { %4079 = vrcp.f32 %v4626_v2 }
 0x718   :  { %1984 = vperm.xlu1 %3925, %v4064_v4   ;;  %4081 = vrcp.f32 %v4620_v7 }
 0x719   :  { %v4066_v59 = vpop.eup %4065  ;;  %4083 = vrcp.f32 %v4555_v23 }
 0x71a   :  { %2340 = vperm.xlu0 %3924, %v4066_v59   ;;  %4085 = vrcp.f32 %v4624_v63 }
 0x71b   :  { %v4068_v21 = vpop.eup %4067 }
 0x71c   :  { %2345 = vperm.xlu1 %3925, %v4068_v21   ;;  %v4070_v54 = vpop.eup %4069 }
 0x71d   :  { %v4072_v50 = vpop.eup %4071 }
 0x71e   :  { %1969 = vperm.xlu0 %3924, %v4070_v54   ;;  %v4074_v13 = vpop.eup %4073 }
 0x71f   :  { %v4076_v35 = vpop.eup %4075 }
 0x720   :  { %1974 = vperm.xlu1 %3925, %v4072_v50   ;;  %v4078_v22 = vpop.eup %4077 }
 0x721   :  { %v4080_v25 = vpop.eup %4079 }
 0x722   :  { %2330 = vperm.xlu0 %3924, %v4074_v13   ;;  %v4082_v37 = vpop.eup %4081 }
 0x723   :  { %v4084_v26 = vpop.eup %4083 }
 0x724   :  { %2335 = vperm.xlu1 %3925, %v4076_v35   ;;  %v4086_v46 = vpop.eup %4085 }
 0x726   :  { %683 = vperm.xlu0 %3924, %v4078_v22  }
 0x728   :  { %931 = vperm.xlu1 %3925, %v4080_v25  }
 0x72a   :  { %936 = vperm.xlu0 %3924, %v4082_v37  }
 0x72c   :  { %688 = vperm.xlu1 %3925, %v4084_v26  }
 0x72e   :  { %3926 = vset.pattern.permute.xlu0 %v4174_v43  ;;  %v975_v43 = vsel %vm220_vm2, %v4965_v30, 0.0 }
 0x730   :  { %941 = vperm.xlu1 %3925, %v4086_v46  }
 0x749   :  { %979 = vadd.xlane.f32.xlu0 %v978_v55 }
 0x754   :  { %976 = vadd.xlane.f32.xlu1 %v975_v43 }
 0x764   :  { %v1940_v0 = vpop.permute.xlu1 %1939 }
 0x765   :  { %v1989_v18 = vmul.f32 %v4874_v49, %v1940_v0 }
 0x767   :  { %v1935_v26 = vpop.permute.xlu0 %1934 }
 0x768   :  { %v1988_v55 = vmul.f32 %v1935_v26, %v4881_v47 }
 0x769   :  { %v2301_v31 = vpop.permute.xlu1 %2300 }
 0x76a   :  { %v2350_v32 = vmul.f32 %v4884_v16, %v2301_v31 }
 0x76c   :  { %v2362_v5 = vsel %vm954_vm5, %v1989_v18, %v2350_v32 }
 0x76d   :  { %v1930_v38 = vpop.permute.xlu1 %1929  ;;  %v4981_v4 = vadd.f32 %v4976_v48, %v2362_v5 }
 0x76e   :  { %v1987_v49 = vmul.f32 %v1930_v38, %v4877_v44 }
 0x76f   :  { %v2394_v59 = vsel %vm220_vm2, %v4981_v4, 0.0 }
 0x770   :  { %2395 = vadd.xlane.f32.xlu0 %v2394_v59 }
 0x771   :  { %v2291_v21 = vpop.permute.xlu1 %2290 }
 0x772   :  { %v2348_v16 = vmul.f32 %v2291_v21, %v4887_v39 }
 0x774   :  { %v2360_v54 = vsel %vm954_vm5, %v1987_v49, %v2348_v16 }
 0x775   :  { %v1945_v50 = vpop.permute.xlu1 %1944  ;;  %v4990_v13 = vadd.f32 %v4976_v48, %v2360_v54 }
 0x776   :  { %v1990_v25 = vmul.f32 %v4879_v19, %v1945_v50 }
 0x777   :  { %v2388_v35 = vsel %vm220_vm2, %v4990_v13, 0.0 }
 0x778   :  { %2389 = vadd.xlane.f32.xlu0 %v2388_v35 }
 0x779   :  { %v2306_v22 = vpop.permute.xlu1 %2305 }
 0x77a   :  { %v2351_v37 = vmul.f32 %v4889_v62, %v2306_v22 }
 0x77c   :  { %v2363_v44 = vsel %vm954_vm5, %v1990_v25, %v2351_v37 }
 0x77d   :  { %v2296_v39 = vpop.permute.xlu1 %2295  ;;  %v4999_v46 = vadd.f32 %v4976_v48, %v2363_v44 }
 0x77e   :  { %v2349_v43 = vmul.f32 %v2296_v39, %v4891_v36 }
 0x77f   :  { %v2397_v0 = vsel %vm220_vm2, %v4999_v46, 0.0 }
 0x780   :  { %2398 = vadd.xlane.f32.xlu0 %v2397_v0  ;;  %v2361_v19 = vsel %vm954_vm5, %v1988_v55, %v2349_v43 }
 0x781   :  { %v5008_v62 = vadd.f32 %v4976_v48, %v2361_v19 }
 0x782   :  { %v1960_v31 = vpop.permute.xlu0 %1959 }
 0x783   :  { %v1950_v18 = vpop.permute.xlu1 %1949  ;;  %v2391_v32 = vsel %vm220_vm2, %v5008_v62, 0.0  ;;  %v1993_v47 = vmul.f32 %v4898_v24, %v1960_v31 }
 0x784   :  { %2392 = vadd.xlane.f32.xlu1 %v2391_v32  ;;  %v1991_v16 = vmul.f32 %v1950_v18, %v4901_v45 }
 0x786   :  { %v2321_v5 = vpop.permute.xlu0 %2320 }
 0x787   :  { %v2354_v36 = vmul.f32 %v4908_v27, %v2321_v5  ;;  %v1965_v38 = vpop.permute.xlu1 %1964 }
 0x788   :  { %v1994_v35 = vmul.f32 %v4904_v29, %v1965_v38 }
 0x789   :  { %v2366_v59 = vsel %vm954_vm5, %v1993_v47, %v2354_v36 }
 0x78a   :  { %v2311_v21 = vpop.permute.xlu0 %2310  ;;  %v5017_v49 = vadd.f32 %v4976_v48, %v2366_v59 }
 0x78b   :  { %v2352_v54 = vmul.f32 %v2311_v21, %v4911_v3  ;;  %v2326_v50 = vpop.permute.xlu1 %2325 }
 0x78c   :  { %v2355_v22 = vmul.f32 %v4914_v10, %v2326_v50  ;;  %v2406_v24 = vsel %vm220_vm2, %v5017_v49, 0.0  ;;  %v5039_v10 = vadd.f32 %v4955_v60, %v4866_v8 }
 0x78d   :  { %2407 = vadd.xlane.f32.xlu1 %v2406_v24  ;;  %v2364_v27 = vsel %vm954_vm5, %v1991_v16, %v2352_v54 }
 0x78e   :  { %v5028_v25 = vadd.f32 %v4976_v48, %v2364_v27  ;;  %v2367_v45 = vsel %vm954_vm5, %v1994_v35, %v2355_v22  ;;  %v981_v0 = vsel %vm220_vm2, %v5039_v10, 0.0 }
 0x78f   :  { %v1955_v37 = vpop.permute.xlu1 %1954  ;;  %v5033_v3 = vadd.f32 %v4976_v48, %v2367_v45 }
 0x790   :  { %v2400_v29 = vsel %vm220_vm2, %v5028_v25, 0.0  ;;  %v1992_v39 = vmul.f32 %v1955_v37, %v4906_v51  ;;  %v5056_v51 = vadd.f32 %v4955_v60, %v4858_v41 }
 0x791   :  { %2401 = vadd.xlane.f32.xlu1 %v2400_v29  ;;  %v2409_v26 = vsel %vm220_vm2, %v5033_v3, 0.0 }
 0x792   :  { %2410 = vadd.xlane.f32.xlu0 %v2409_v26  ;;  %v984_v16 = vsel %vm220_vm2, %v5056_v51, 0.0 }
 0x793   :  { %v2316_v44 = vpop.permute.xlu1 %2315 }
 0x794   :  { %v2353_v55 = vmul.f32 %v2316_v44, %v4916_v61  ;;  %v1980_v43 = vpop.permute.xlu0 %1979 }
 0x795   :  { %982 = vadd.xlane.f32.xlu1 %v981_v0  ;;  %v1997_v61 = vmul.f32 %v4922_v12, %v1980_v43 }
 0x796   :  { %v2365_v19 = vsel %vm954_vm5, %v1992_v39, %v2353_v55 }
 0x797   :  { %v1985_v8 = vpop.permute.xlu1 %1984  ;;  %v5050_v31 = vadd.f32 %v4976_v48, %v2365_v19 }
 0x798   :  { %v1998_v36 = vmul.f32 %v4927_v40, %v1985_v8 }
 0x799   :  { %v2341_v18 = vpop.permute.xlu0 %2340  ;;  %v2403_v32 = vsel %vm220_vm2, %v5050_v31, 0.0 }
 0x79a   :  { %v2358_v5 = vmul.f32 %v4932_v1, %v2341_v18  ;;  %2404 = vadd.xlane.f32.xlu0 %v2403_v32 }
 0x79b   :  { %v2346_v47 = vpop.permute.xlu1 %2345 }
 0x79c   :  { %v2359_v38 = vmul.f32 %v4937_v42, %v2346_v47  ;;  %v2370_v59 = vsel %vm954_vm5, %v1997_v61, %v2358_v5 }
 0x79d   :  { %v1970_v21 = vpop.permute.xlu0 %1969 }
 0x79e   :  { %985 = vadd.xlane.f32.xlu0 %v984_v16  ;;  %v2371_v41 = vsel %vm954_vm5, %v1998_v36, %v2359_v38  ;;  %v1995_v1 = vmul.f32 %v1970_v21, %v4925_v28 }
 0x79f   :  { %v1975_v12 = vpop.permute.xlu1 %1974  ;;  %v5093_v39 = vadd.f32 %v4976_v48, %v2371_v41 }
 0x7a0   :  { %v1996_v42 = vmul.f32 %v1975_v12, %v4930_v9  ;;  %v5085_v9 = vadd.f32 %v4976_v48, %v2370_v59 }
 0x7a1   :  { %v2331_v54 = vpop.permute.xlu0 %2330 }
 0x7a2   :  { %v2356_v50 = vmul.f32 %v2331_v54, %v4935_v11 }
 0x7a3   :  { %v2336_v40 = vpop.permute.xlu1 %2335 }
 0x7a4   :  { %v2357_v35 = vmul.f32 %v2336_v40, %v4940_v6  ;;  %v2368_v22 = vsel %vm954_vm5, %v1995_v1, %v2356_v50  ;;  %v696_v6 = vmul.f32 %v4969_v20, %v4557_v58  ;;  %v2418_v58 = vsel %vm220_vm2, %v5085_v9, 0.0 }
 0x7a5   :  { %v684_v24 = vpop.permute.xlu0 %683  ;;  %v5075_v27 = vadd.f32 %v4976_v48, %v2368_v22 }
 0x7a6   :  { %v2369_v45 = vsel %vm954_vm5, %v1996_v42, %v2357_v35  ;;  %v697_v55 = vmul.f32 %v4551_v17, %v684_v24  ;;  %v2421_v17 = vsel %vm220_vm2, %v5093_v39, 0.0 }
 0x7a7   :  { %v932_v37 = vpop.permute.xlu1 %931  ;;  %v2412_v28 = vsel %vm220_vm2, %v5075_v27, 0.0  ;;  %v5082_v11 = vadd.f32 %v4976_v48, %v2369_v45 }
 0x7a8   :  { %v949_v29 = vmul.f32 %v932_v37, %v4626_v2  ;;  %2413 = vadd.xlane.f32.xlu1 %v2412_v28  ;;  %v5103_v2 = vadd.f32 %v4955_v60, %v4872_v34 }
 0x7a9   :  { %v937_v26 = vpop.permute.xlu0 %936  ;;  %v2415_v44 = vsel %vm220_vm2, %v5082_v11, 0.0 }
 0x7aa   :  { %v950_v43 = vmul.f32 %v4620_v7, %v937_v26  ;;  %2416 = vadd.xlane.f32.xlu0 %v2415_v44  ;;  %v960_v0 = vsel %vm954_vm5, %v696_v6, %v949_v29  ;;  %v987_v8 = vsel %vm220_vm2, %v5103_v2, 0.0 }
 0x7ab   :  { %v689_v19 = vpop.permute.xlu1 %688  ;;  %v5110_v7 = vadd.f32 %v4955_v60, %v960_v0 }
 0x7ac   :  { %2419 = vadd.xlane.f32.xlu1 %v2418_v58  ;;  %v961_v20 = vsel %vm954_vm5, %v697_v55, %v950_v43  ;;  %v698_v34 = vmul.f32 %v4555_v23, %v689_v19 }
 0x7ad   :  { %v5115_v18 = vadd.f32 %v4955_v60, %v961_v20  ;;  %v990_v61 = vsel %vm220_vm2, %v5110_v7, 0.0 }
 0x7ae   :  { %2422 = vadd.xlane.f32.xlu0 %v2421_v17 }
 0x7af   :  { %v942_v48 = vpop.permute.xlu1 %941  ;;  %v993_v47 = vsel %vm220_vm2, %v5115_v18, 0.0 }
 0x7b0   :  { %v951_v32 = vmul.f32 %v4624_v63, %v942_v48  ;;  %988 = vadd.xlane.f32.xlu1 %v987_v8 }
 0x7b2   :  { %991 = vadd.xlane.f32.xlu0 %v990_v61  ;;  %v962_v5 = vsel %vm954_vm5, %v698_v34, %v951_v32 }
 0x7b3   :  { %v5126_v36 = vadd.f32 %v4955_v60, %v962_v5 }
 0x7b4   :  { %994 = vadd.xlane.f32.xlu1 %v993_v47 }
 0x7b5   :  { %v996_v23 = vsel %vm220_vm2, %v5126_v36, 0.0 }
 0x7b6   :  { %997 = vadd.xlane.f32.xlu0 %v996_v23 }
 0x7d6   :  { %v980_v63 = vpop.xlane.xlu0 %979 }
 0x7d7   :  { %v1001_v38 = vmul.f32 0.015625, %v980_v63 }
 0x7d9   :  { %v5131_v59 = vsub.f32 %v4959_v52, %v1001_v38 }
 0x7db   :  { %v1017_v21 = vmul.f32 %v5131_v59, %v5131_v59 }
 0x7dd   :  { %v1027_v16 = vsel %vm220_vm2, %v1017_v21, 0.0 }
 0x7de   :  { %1028 = vadd.xlane.f32.xlu0 %v1027_v16 }
 0x7e1   :  { %v977_v41 = vpop.xlane.xlu1 %976 }
 0x7e2   :  { %v1000_v12 = vmul.f32 0.015625, %v977_v41 }
 0x7e4   :  { %v5137_v60 = vsub.f32 %v4965_v30, %v1000_v12 }
 0x7e6   :  { %v1016_v54 = vmul.f32 %v5137_v60, %v5137_v60 }
 0x7e8   :  { %v1024_v1 = vsel %vm220_vm2, %v1016_v54, 0.0 }
 0x7e9   :  { %1025 = vadd.xlane.f32.xlu1 %v1024_v1 }
 0x7fd   :  { %v2396_v50 = vpop.xlane.xlu0 %2395 }
 0x7fe   :  { %v2426_v52 = vmul.f32 0.015625, %v2396_v50 }
 0x800   :  { %v5143_v40 = vsub.f32 %v4981_v4, %v2426_v52 }
 0x802   :  { %v2450_v42 = vmul.f32 %v5143_v40, %v5143_v40 }
 0x804   :  { %v2466_v35 = vsel %vm220_vm2, %v2450_v42, 0.0 }
 0x805   :  { %2467 = vadd.xlane.f32.xlu1 %v2466_v35  ;;  %v2390_v22 = vpop.xlane.xlu0 %2389 }
 0x806   :  { %v2424_v30 = vmul.f32 0.015625, %v2390_v22 }
 0x808   :  { %v5149_v24 = vsub.f32 %v4990_v13, %v2424_v30 }
 0x80a   :  { %v2448_v45 = vmul.f32 %v5149_v24, %v5149_v24 }
 0x80c   :  { %v2460_v37 = vsel %vm220_vm2, %v2448_v45, 0.0 }
 0x80d   :  { %2461 = vadd.xlane.f32.xlu1 %v2460_v37  ;;  %v2399_v28 = vpop.xlane.xlu0 %2398 }
 0x80e   :  { %v2427_v4 = vmul.f32 0.015625, %v2399_v28 }
 0x810   :  { %v5155_v6 = vsub.f32 %v4999_v46, %v2427_v4 }
 0x811   :  { %v2393_v29 = vpop.xlane.xlu1 %2392 }
 0x812   :  { %v2425_v26 = vmul.f32 0.015625, %v2393_v29  ;;  %v2451_v44 = vmul.f32 %v5155_v6, %v5155_v6 }
 0x814   :  { %v5160_v55 = vsub.f32 %v5008_v62, %v2425_v26  ;;  %v2469_v13 = vsel %vm220_vm2, %v2451_v44, 0.0 }
 0x815   :  { %2470 = vadd.xlane.f32.xlu0 %v2469_v13 }
 0x816   :  { %v2449_v43 = vmul.f32 %v5160_v55, %v5160_v55 }
 0x818   :  { %v2463_v0 = vsel %vm220_vm2, %v2449_v43, 0.0 }
 0x819   :  { %2464 = vadd.xlane.f32.xlu0 %v2463_v0 }
 0x81a   :  { %v2408_v19 = vpop.xlane.xlu1 %2407 }
 0x81b   :  { %v2430_v46 = vmul.f32 0.015625, %v2408_v19 }
 0x81d   :  { %v5167_v58 = vsub.f32 %v5017_v49, %v2430_v46 }
 0x81e   :  { %v2402_v20 = vpop.xlane.xlu1 %2401 }
 0x81f   :  { %v2428_v17 = vmul.f32 0.015625, %v2402_v20  ;;  %v2411_v48 = vpop.xlane.xlu0 %2410  ;;  %v2454_v62 = vmul.f32 %v5167_v58, %v5167_v58 }
 0x820   :  { %v2431_v8 = vmul.f32 0.015625, %v2411_v48 }
 0x821   :  { %v5172_v34 = vsub.f32 %v5028_v25, %v2428_v17  ;;  %v2478_v32 = vsel %vm220_vm2, %v2454_v62, 0.0 }
 0x822   :  { %v5176_v61 = vsub.f32 %v5033_v3, %v2431_v8  ;;  %v983_v5 = vpop.xlane.xlu1 %982  ;;  %2479 = vadd.xlane.f32.xlu1 %v2478_v32 }
 0x823   :  { %v1002_v47 = vmul.f32 0.015625, %v983_v5  ;;  %v2452_v49 = vmul.f32 %v5172_v34, %v5172_v34 }
 0x824   :  { %v2455_v23 = vmul.f32 %v5176_v61, %v5176_v61 }
 0x825   :  { %v5183_v63 = vsub.f32 %v5039_v10, %v1002_v47  ;;  %v2472_v25 = vsel %vm220_vm2, %v2452_v49, 0.0 }
 0x826   :  { %2473 = vadd.xlane.f32.xlu1 %v2472_v25  ;;  %v2481_v38 = vsel %vm220_vm2, %v2455_v23, 0.0 }
 0x827   :  { %2482 = vadd.xlane.f32.xlu0 %v2481_v38  ;;  %v2405_v3 = vpop.xlane.xlu0 %2404  ;;  %v1018_v21 = vmul.f32 %v5183_v63, %v5183_v63 }
 0x828   :  { %v2429_v16 = vmul.f32 0.015625, %v2405_v3 }
 0x829   :  { %v1030_v41 = vsel %vm220_vm2, %v1018_v21, 0.0 }
 0x82a   :  { %v5191_v12 = vsub.f32 %v5050_v31, %v2429_v16  ;;  %1031 = vadd.xlane.f32.xlu1 %v1030_v41 }
 0x82b   :  { %v986_v54 = vpop.xlane.xlu0 %985 }
 0x82c   :  { %v1003_v10 = vmul.f32 0.015625, %v986_v54  ;;  %v2453_v1 = vmul.f32 %v5191_v12, %v5191_v12 }
 0x82e   :  { %v5196_v50 = vsub.f32 %v5056_v51, %v1003_v10  ;;  %v2475_v52 = vsel %vm220_vm2, %v2453_v1, 0.0 }
 0x82f   :  { %2476 = vadd.xlane.f32.xlu0 %v2475_v52 }
 0x830   :  { %v1019_v42 = vmul.f32 %v5196_v50, %v5196_v50 }
 0x832   :  { %v1033_v35 = vsel %vm220_vm2, %v1019_v42, 0.0 }
 0x833   :  { %1034 = vadd.xlane.f32.xlu0 %v1033_v35 }
 0x835   :  { %v2414_v31 = vpop.xlane.xlu1 %2413 }
 0x836   :  { %v2432_v22 = vmul.f32 0.015625, %v2414_v31 }
 0x837   :  { %v2417_v30 = vpop.xlane.xlu0 %2416 }
 0x838   :  { %v5203_v45 = vsub.f32 %v5075_v27, %v2432_v22  ;;  %v2433_v37 = vmul.f32 0.015625, %v2417_v30  ;;  %v5253_v22 = vld [vmem:[%s5609_s2 + $0x25] ss:$0 sm:$0xff] }
 0x839   :  { %v2420_v28 = vpop.xlane.xlu1 %2419 }
 0x83a   :  { %v5206_v51 = vsub.f32 %v5082_v11, %v2433_v37  ;;  %v2434_v4 = vmul.f32 0.015625, %v2420_v28  ;;  %v2456_v29 = vmul.f32 %v5203_v45, %v5203_v45  ;;  %v5259_v37 = vld [vmem:[%s5609_s2 + $0x26] ss:$0 sm:$0xff] }
 0x83b   :  { %v2423_v26 = vpop.xlane.xlu0 %2422 }
 0x83c   :  { %v5211_v44 = vsub.f32 %v5085_v9, %v2434_v4  ;;  %v2435_v13 = vmul.f32 0.015625, %v2423_v26  ;;  %v2484_v43 = vsel %vm220_vm2, %v2456_v29, 0.0  ;;  %v2457_v27 = vmul.f32 %v5206_v51, %v5206_v51 }
 0x83d   :  { %v989_v0 = vpop.xlane.xlu1 %988  ;;  %2485 = vadd.xlane.f32.xlu1 %v2484_v43 }
 0x83e   :  { %v5217_v19 = vsub.f32 %v5093_v39, %v2435_v13  ;;  %v1004_v11 = vmul.f32 0.015625, %v989_v0  ;;  %v2487_v46 = vsel %vm220_vm2, %v2457_v27, 0.0  ;;  %v2458_v20 = vmul.f32 %v5211_v44, %v5211_v44 }
 0x83f   :  { %2488 = vadd.xlane.f32.xlu0 %v2487_v46  ;;  %v992_v9 = vpop.xlane.xlu0 %991 }
 0x840   :  { %v5223_v17 = vsub.f32 %v5103_v2, %v1004_v11  ;;  %v1005_v48 = vmul.f32 0.015625, %v992_v9  ;;  %v2490_v62 = vsel %vm220_vm2, %v2458_v20, 0.0  ;;  %v2459_v8 = vmul.f32 %v5217_v19, %v5217_v19 }
 0x841   :  { %v995_v32 = vpop.xlane.xlu1 %994  ;;  %2491 = vadd.xlane.f32.xlu1 %v2490_v62 }
 0x842   :  { %v5229_v39 = vsub.f32 %v5110_v7, %v1005_v48  ;;  %v1006_v5 = vmul.f32 0.015625, %v995_v32  ;;  %v2493_v47 = vsel %vm220_vm2, %v2459_v8, 0.0  ;;  %v1020_v49 = vmul.f32 %v5223_v17, %v5223_v17 }
 0x843   :  { %2494 = vadd.xlane.f32.xlu0 %v2493_v47  ;;  %v998_v2 = vpop.xlane.xlu0 %997 }
 0x844   :  { %v5235_v23 = vsub.f32 %v5115_v18, %v1006_v5  ;;  %v1007_v25 = vmul.f32 0.015625, %v998_v2  ;;  %v1036_v38 = vsel %vm220_vm2, %v1020_v49, 0.0  ;;  %v1021_v3 = vmul.f32 %v5229_v39, %v5229_v39 }
 0x845   :  { %1037 = vadd.xlane.f32.xlu1 %v1036_v38 }
 0x846   :  { %v5241_v7 = vsub.f32 %v5126_v36, %v1007_v25  ;;  %v1039_v21 = vsel %vm220_vm2, %v1021_v3, 0.0  ;;  %v1022_v16 = vmul.f32 %v5235_v23, %v5235_v23 }
 0x847   :  { %1040 = vadd.xlane.f32.xlu0 %v1039_v21 }
 0x848   :  { %v1042_v41 = vsel %vm220_vm2, %v1022_v16, 0.0  ;;  %v1023_v18 = vmul.f32 %v5241_v7, %v5241_v7 }
 0x849   :  { %1043 = vadd.xlane.f32.xlu1 %v1042_v41 }
 0x84a   :  { %v1045_v54 = vsel %vm220_vm2, %v1023_v18, 0.0 }
 0x84b   :  { %1046 = vadd.xlane.f32.xlu0 %v1045_v54 }
 0x86b   :  { %v1029_v10 = vpop.xlane.xlu0 %1028 }
 0x86c   :  { %v1049_v1 = vmul.f32 0.015625, %v1029_v10 }
 0x86e   :  { %v1057_v52 = vadd.f32 1e-05, %v1049_v1 }
 0x870   :  { %4087 = vrsqrt.f32 %v1057_v52 }
 0x876   :  { %v1026_v36 = vpop.xlane.xlu1 %1025 }
 0x877   :  { %v1048_v42 = vmul.f32 0.015625, %v1026_v36 }
 0x879   :  { %v1056_v35 = vadd.f32 1e-05, %v1048_v42 }
 0x87a   :  { %v4088_v31 = vpop.eup %4087 }
 0x87b   :  { %4089 = vrsqrt.f32 %v1056_v35  ;;  %v1073_v30 = vmul.f32 %v4088_v31, %v5131_v59 }
 0x87d   :  { %v1085_v28 = vmul.f32 %v5253_v22, %v1073_v30 }
 0x87f   :  { %v1097_v4 = vadd.f32 %v5259_v37, %v1085_v28 }
 0x881   :  { %v1113_v29 = vmin.f32 %v1097_v4, 0.0  ;;  %vm1105_vm6 = vcmp.gt.f32.partialorder %v1097_v4, 0.0 }
 0x883   :  { %v1122_v26 = vmul.f32 1.442695, %v1113_v29 }
 0x885   :  { %v4090_v13 = vpop.eup %4089  ;;  %4091 = vpow2.f32 %v1122_v26  ;;  %v5278_v26 = vld [vmem:[%s5609_s2 + $0x4d] ss:$0 sm:$0xff] }
 0x886   :  { %v1072_v43 = vmul.f32 %v4090_v13, %v5137_v60 }
 0x888   :  { %v1084_v27 = vmul.f32 %v5253_v22, %v1072_v43 }
 0x88a   :  { %v1096_v0 = vadd.f32 %v5259_v37, %v1084_v27 }
 0x88c   :  { %v1112_v59 = vmin.f32 %v1096_v0, 0.0  ;;  %vm1104_vm7 = vcmp.gt.f32.partialorder %v1096_v0, 0.0 }
 0x88e   :  { %v1120_v11 = vmul.f32 1.442695, %v1112_v59 }
 0x88f   :  { %v4092_v46 = vpop.eup %4091 }
 0x890   :  { %v3230_v20 = vadd.f32 -1.0, %v4092_v46  ;;  %4093 = vpow2.f32 %v1120_v11 }
 0x892   :  { %v5266_v9 = vsel %vm1105_vm6, %v1097_v4, %v3230_v20  ;;  %v2468_v8 = vpop.xlane.xlu1 %2467 }
 0x893   :  { %1162 = vrot.lane.b32.xlu1 %v5266_v9, %s4177_s6  ;;  %v2498_v5 = vmul.f32 0.015625, %v2468_v8 }
 0x895   :  { %v2510_v2 = vadd.f32 1e-05, %v2498_v5 }
 0x897   :  { %4095 = vrsqrt.f32 %v2510_v2 }
 0x89a   :  { %v4094_v48 = vpop.eup %4093  ;;  %v2462_v25 = vpop.xlane.xlu1 %2461 }
 0x89b   :  { %v3229_v62 = vadd.f32 -1.0, %v4094_v48  ;;  %v2496_v41 = vmul.f32 0.015625, %v2462_v25 }
 0x89d   :  { %v5270_v60 = vsel %vm1104_vm7, %v1096_v0, %v3229_v62  ;;  %v2508_v36 = vadd.f32 1e-05, %v2496_v41 }
 0x89e   :  { %1160 = vrot.lane.b32.xlu0 %v5270_v60, %s4177_s6 }
 0x8a1   :  { %v4096_v52 = vpop.eup %4095 }
 0x8a2   :  { %v2471_v32 = vpop.xlane.xlu0 %2470  ;;  %v2534_v29 = vmul.f32 %v4096_v52, %v5143_v40  ;;  %v5285_v40 = vld [vmem:[%s5609_s2 + $0x4e] ss:$0 sm:$0xff] }
 0x8a3   :  { %v2499_v35 = vmul.f32 0.015625, %v2471_v32 }
 0x8a4   :  { %v2550_v59 = vmul.f32 %v5278_v26, %v2534_v29 }
 0x8a5   :  { %v2511_v13 = vadd.f32 1e-05, %v2499_v35 }
 0x8a6   :  { %v2465_v47 = vpop.xlane.xlu0 %2464 }
 0x8a7   :  { %v2497_v49 = vmul.f32 0.015625, %v2465_v47 }
 0x8a9   :  { %v2509_v38 = vadd.f32 1e-05, %v2497_v49 }
 0x8ab   :  { %4097 = vrsqrt.f32 %v2509_v38 }
 0x8af   :  { %v2480_v3 = vpop.xlane.xlu1 %2479 }
 0x8b0   :  { %v2502_v21 = vmul.f32 0.015625, %v2480_v3 }
 0x8b2   :  { %v2514_v16 = vadd.f32 1e-05, %v2502_v21 }
 0x8b3   :  { %v2474_v18 = vpop.xlane.xlu1 %2473 }
 0x8b4   :  { %v2500_v54 = vmul.f32 0.015625, %v2474_v18  ;;  %4099 = vrsqrt.f32 %v2514_v16  ;;  %v2483_v1 = vpop.xlane.xlu0 %2482 }
 0x8b5   :  { %v4098_v30 = vpop.eup %4097  ;;  %v2503_v28 = vmul.f32 0.015625, %v2483_v1 }
 0x8b6   :  { %v2512_v10 = vadd.f32 1e-05, %v2500_v54  ;;  %v2533_v27 = vmul.f32 %v4098_v30, %v5160_v55  ;;  %v5290_v55 = vadd.f32 %v5285_v40, %v2550_v59 }
 0x8b7   :  { %v1032_v42 = vpop.xlane.xlu1 %1031  ;;  %v2515_v0 = vadd.f32 1e-05, %v2503_v28 }
 0x8b8   :  { %4101 = vrsqrt.f32 %v2512_v10  ;;  %v1050_v31 = vmul.f32 0.015625, %v1032_v42  ;;  %v2549_v48 = vmul.f32 %v5278_v26, %v2533_v27  ;;  %v2590_v21 = vmin.f32 %v5290_v55, 0.0 }
 0x8b9   :  { %4103 = vrsqrt.f32 %v2508_v36  ;;  %vm2578_vm12 = vcmp.gt.f32.partialorder %v5290_v55, 0.0 }
 0x8ba   :  { %v1058_v4 = vadd.f32 1e-05, %v1050_v31  ;;  %v5293_v49 = vadd.f32 %v5285_v40, %v2549_v48  ;;  %v2604_v52 = vmul.f32 1.442695, %v2590_v21 }
 0x8bc   :  { %4105 = vrsqrt.f32 %v1058_v4  ;;  %v2477_v43 = vpop.xlane.xlu0 %2476  ;;  %v2589_v16 = vmin.f32 %v5293_v49, 0.0  ;;  %vm2577_vm9 = vcmp.gt.f32.partialorder %v5293_v49, 0.0 }
 0x8bd   :  { %v2501_v46 = vmul.f32 0.015625, %v2477_v43  ;;  %4107 = vrsqrt.f32 %v2511_v13 }
 0x8be   :  { %v4100_v11 = vpop.eup %4099  ;;  %4109 = vrsqrt.f32 %v2515_v0  ;;  %v2602_v31 = vmul.f32 1.442695, %v2589_v16 }
 0x8bf   :  { %v2538_v32 = vmul.f32 %v4100_v11, %v5167_v58  ;;  %v2513_v5 = vadd.f32 1e-05, %v2501_v46 }
 0x8c0   :  { %v1035_v20 = vpop.xlane.xlu0 %1034 }
 0x8c1   :  { %v1051_v62 = vmul.f32 0.015625, %v1035_v20  ;;  %v2554_v3 = vmul.f32 %v5278_v26, %v2538_v32 }
 0x8c2   :  { %v4102_v8 = vpop.eup %4101 }
 0x8c3   :  { %v1059_v47 = vadd.f32 1e-05, %v1051_v62  ;;  %v2536_v2 = vmul.f32 %v4102_v8, %v5172_v34  ;;  %v4104_v25 = vpop.eup %4103  ;;  %v5304_v1 = vadd.f32 %v5285_v40, %v2554_v3 }
 0x8c4   :  { %v2532_v18 = vmul.f32 %v4104_v25, %v5149_v24 }
 0x8c5   :  { %4111 = vrsqrt.f32 %v1059_v47  ;;  %v2552_v41 = vmul.f32 %v5278_v26, %v2536_v2  ;;  %v2594_v43 = vmin.f32 %v5304_v1, 0.0  ;;  %vm2582_vm10 = vcmp.gt.f32.partialorder %v5304_v1, 0.0 }
 0x8c6   :  { %v4106_v38 = vpop.eup %4105  ;;  %4113 = vrsqrt.f32 %v2513_v5  ;;  %v2548_v24 = vmul.f32 %v5278_v26, %v2532_v18 }
 0x8c7   :  { %v1074_v58 = vmul.f32 %v4106_v38, %v5183_v63  ;;  %v4108_v10 = vpop.eup %4107  ;;  %v5310_v30 = vadd.f32 %v5285_v40, %v2552_v41  ;;  %4115 = vpow2.f32 %v2604_v52 }
 0x8c8   :  { %v4110_v36 = vpop.eup %4109  ;;  %v2535_v27 = vmul.f32 %v4108_v10, %v5155_v6  ;;  %v5320_v32 = vadd.f32 %v5285_v40, %v2548_v24 }
 0x8c9   :  { %v1086_v54 = vmul.f32 %v5253_v22, %v1074_v58  ;;  %v2539_v0 = vmul.f32 %v4110_v36, %v5176_v61  ;;  %v2592_v8 = vmin.f32 %v5310_v30, 0.0  ;;  %v2612_v61 = vmul.f32 1.442695, %v2594_v43 }
 0x8ca   :  { %v2486_v34 = vpop.xlane.xlu1 %2485  ;;  %v2551_v38 = vmul.f32 %v5278_v26, %v2535_v27  ;;  %v2588_v18 = vmin.f32 %v5320_v32, 0.0  ;;  %vm2580_vm13 = vcmp.gt.f32.partialorder %v5310_v30, 0.0  ;;  %vm2576_vm14 = vcmp.gt.f32.partialorder %v5320_v32, 0.0 }
 0x8cb   :  { %v2504_v42 = vmul.f32 0.015625, %v2486_v34  ;;  %v5307_v35 = vadd.f32 %v5259_v37, %v1086_v54  ;;  %v2608_v41 = vmul.f32 1.442695, %v2592_v8 }
 0x8cc   :  { %v2489_v63 = vpop.xlane.xlu0 %2488 }
 0x8cd   :  { %v2516_v28 = vadd.f32 1e-05, %v2504_v42  ;;  %v2505_v4 = vmul.f32 0.015625, %v2489_v63  ;;  %v1114_v29 = vmin.f32 %v5307_v35, 0.0  ;;  %v5332_v42 = vadd.f32 %v5285_v40, %v2551_v38 }
 0x8ce   :  { %v2492_v13 = vpop.xlane.xlu1 %2491  ;;  %vm1106_vm8 = vcmp.gt.f32.partialorder %v5307_v35, 0.0 }
 0x8cf   :  { %v4112_v59 = vpop.eup %4111  ;;  %4117 = vrsqrt.f32 %v2516_v28  ;;  %v2517_v11 = vadd.f32 1e-05, %v2505_v4  ;;  %v2506_v46 = vmul.f32 0.015625, %v2492_v13  ;;  %v1124_v20 = vmul.f32 1.442695, %v1114_v29 }
 0x8d0   :  { %v2495_v48 = vpop.xlane.xlu0 %2494  ;;  %4119 = vpow2.f32 %v2602_v31  ;;  %v1075_v62 = vmul.f32 %v4112_v59, %v5196_v50  ;;  %v4114_v5 = vpop.eup %4113  ;;  %v2555_v50 = vmul.f32 %v5278_v26, %v2539_v0  ;;  %vm2579_vm15 = vcmp.gt.f32.partialorder %v5332_v42, 0.0 }
 0x8d1   :  { %4121 = vrsqrt.f32 %v2517_v11  ;;  %v2518_v47 = vadd.f32 1e-05, %v2506_v46  ;;  %v2507_v6 = vmul.f32 0.015625, %v2495_v48  ;;  %v2537_v54 = vmul.f32 %v4114_v5, %v5191_v12  ;;  %v4116_v28 = vpop.eup %4115 }
 0x8d2   :  { %v1038_v2 = vpop.xlane.xlu1 %1037  ;;  %4123 = vpow2.f32 %v1124_v20  ;;  %v1087_v25 = vmul.f32 %v5253_v22, %v1075_v62  ;;  %v5335_v24 = vadd.f32 %v5285_v40, %v2555_v50  ;;  %v2600_v12 = vmul.f32 1.442695, %v2588_v18 }
 0x8d3   :  { %4125 = vrsqrt.f32 %v2518_v47  ;;  %v2519_v3 = vadd.f32 1e-05, %v2507_v6  ;;  %v1052_v21 = vmul.f32 0.015625, %v1038_v2  ;;  %v2553_v13 = vmul.f32 %v5278_v26, %v2537_v54 }
 0x8d4   :  { %v1041_v58 = vpop.xlane.xlu0 %1040  ;;  %v5326_v16 = vadd.f32 %v5259_v37, %v1087_v25  ;;  %v2591_v11 = vmin.f32 %v5332_v42, 0.0  ;;  %v2595_v62 = vmin.f32 %v5335_v24, 0.0  ;;  %vm2583_vm5 = vcmp.gt.f32.partialorder %v5335_v24, 0.0 }
 0x8d5   :  { %4127 = vrsqrt.f32 %v2519_v3  ;;  %v1060_v10 = vadd.f32 1e-05, %v1052_v21  ;;  %v1053_v34 = vmul.f32 0.015625, %v1041_v58  ;;  %v5343_v47 = vadd.f32 %v5285_v40, %v2553_v13 }
 0x8d6   :  { %v1044_v52 = vpop.xlane.xlu1 %1043  ;;  %4129 = vpow2.f32 %v2612_v61  ;;  %v1115_v36 = vmin.f32 %v5326_v16, 0.0  ;;  %v2614_v58 = vmul.f32 1.442695, %v2595_v62  ;;  %vm1107_vm11 = vcmp.gt.f32.partialorder %v5326_v16, 0.0 }
 0x8d7   :  { %4131 = vrsqrt.f32 %v1060_v10  ;;  %v1061_v63 = vadd.f32 1e-05, %v1053_v34  ;;  %v1054_v31 = vmul.f32 0.015625, %v1044_v52  ;;  %v2593_v54 = vmin.f32 %v5343_v47, 0.0 }
 0x8d8   :  { %v1047_v4 = vpop.xlane.xlu0 %1046  ;;  %v1126_v29 = vmul.f32 1.442695, %v1115_v36  ;;  %4133 = vpow2.f32 %v2608_v41  ;;  %v3292_v34 = vadd.f32 -1.0, %v4116_v28  ;;  %vm2581_vm7 = vcmp.gt.f32.partialorder %v5343_v47, 0.0 }
 0x8d9   :  { %v4118_v43 = vpop.eup %4117  ;;  %4135 = vrsqrt.f32 %v1061_v63  ;;  %v1062_v27 = vadd.f32 1e-05, %v1054_v31  ;;  %v1055_v0 = vmul.f32 0.015625, %v1047_v4 }
 0x8da   :  { %v4120_v59 = vpop.eup %4119  ;;  %4137 = vpow2.f32 %v1126_v29  ;;  %v2540_v46 = vmul.f32 %v4118_v43, %v5203_v45  ;;  %v2606_v45 = vmul.f32 1.442695, %v2591_v11  ;;  %v2610_v43 = vmul.f32 1.442695, %v2593_v54 }
 0x8db   :  { %v4122_v20 = vpop.eup %4121  ;;  %4139 = vrsqrt.f32 %v1062_v27  ;;  %v1063_v48 = vadd.f32 1e-05, %v1055_v0  ;;  %v3291_v50 = vadd.f32 -1.0, %v4120_v59 }
 0x8dc   :  { %v4124_v8 = vpop.eup %4123  ;;  %4141 = vpow2.f32 %v2600_v12  ;;  %v2556_v5 = vmul.f32 %v5278_v26, %v2540_v46  ;;  %v2541_v61 = vmul.f32 %v4122_v20, %v5206_v51 }
 0x8dd   :  { %v4126_v6 = vpop.eup %4125  ;;  %4143 = vrsqrt.f32 %v1063_v48  ;;  %v3231_v2 = vadd.f32 -1.0, %v4124_v8  ;;  %v5368_v29 = vsel %vm2577_vm9, %v5293_v49, %v3291_v50 }
 0x8de   :  { %v2542_v25 = vmul.f32 %v4126_v6, %v5211_v44  ;;  %v5349_v38 = vadd.f32 %v5285_v40, %v2556_v5  ;;  %4145 = vpow2.f32 %v2606_v45 }
 0x8df   :  { %v4128_v3 = vpop.eup %4127  ;;  %v5352_v21 = vsel %vm1106_vm8, %v5307_v35, %v3231_v2  ;;  %v2557_v35 = vmul.f32 %v5278_v26, %v2541_v61  ;;  %4147 = vpow2.f32 %v2614_v58 }
 0x8e0   :  { %v4130_v41 = vpop.eup %4129  ;;  %1164 = vrot.lane.b32.xlu0 %v5352_v21, %s4177_s6  ;;  %v2558_v51 = vmul.f32 %v5278_v26, %v2542_v25  ;;  %v2596_v18 = vmin.f32 %v5349_v38, 0.0  ;;  %v2543_v44 = vmul.f32 %v4128_v3, %v5217_v19  ;;  %v5413_v25 = vsel %vm2578_vm12, %v5290_v55, %v3292_v34 }
 0x8e1   :  { %v4132_v10 = vpop.eup %4131  ;;  %v3296_v19 = vadd.f32 -1.0, %v4130_v41  ;;  %v5379_v27 = vadd.f32 %v5285_v40, %v2557_v35  ;;  %vm2584_vm6 = vcmp.gt.f32.partialorder %v5349_v38, 0.0 }
 0x8e2   :  { %v4134_v52 = vpop.eup %4133  ;;  %v5363_v36 = vadd.f32 %v5285_v40, %v2558_v51  ;;  %v2559_v63 = vmul.f32 %v5278_v26, %v2543_v44  ;;  %v1076_v31 = vmul.f32 %v4132_v10, %v5223_v17  ;;  %v2616_v12 = vmul.f32 1.442695, %v2596_v18 }
 0x8e3   :  { %v4136_v4 = vpop.eup %4135  ;;  %v5388_v8 = vsel %vm2582_vm10, %v5304_v1, %v3296_v19  ;;  %vm2585_vm10 = vcmp.gt.f32.partialorder %v5379_v27, 0.0 }
 0x8e4   :  { %v4138_v28 = vpop.eup %4137  ;;  %2662 = vrot.lane.b32.xlu0 %v5368_v29, %s4177_s6  ;;  %v2598_v13 = vmin.f32 %v5363_v36, 0.0  ;;  %v5375_v26 = vadd.f32 %v5285_v40, %v2559_v63  ;;  %v1088_v0 = vmul.f32 %v5253_v22, %v1076_v31  ;;  %v1077_v48 = vmul.f32 %v4136_v4, %v5229_v39 }
 0x8e5   :  { %v4140_v17 = vpop.eup %4139  ;;  %v3232_v49 = vadd.f32 -1.0, %v4138_v28  ;;  %v3294_v40 = vadd.f32 -1.0, %v4134_v52  ;;  %4149 = vpow2.f32 %v2616_v12  ;;  %vm2586_vm3 = vcmp.gt.f32.partialorder %v5363_v36, 0.0 }
 0x8e6   :  { %v4142_v59 = vpop.eup %4141  ;;  %v2620_v11 = vmul.f32 1.442695, %v2598_v13  ;;  %v2599_v46 = vmin.f32 %v5375_v26, 0.0  ;;  %v1078_v20 = vmul.f32 %v4140_v17, %v5235_v23  ;;  %v2597_v23 = vmin.f32 %v5379_v27, 0.0 }
 0x8e7   :  { %v4144_v62 = vpop.eup %4143  ;;  %v5391_v5 = vsel %vm1107_vm11, %v5326_v16, %v3232_v49  ;;  %v5402_v1 = vadd.f32 %v5259_v37, %v1088_v0  ;;  %v1089_v2 = vmul.f32 %v5253_v22, %v1077_v48  ;;  %v5410_v45 = vsel %vm2580_vm13, %v5310_v30, %v3294_v40  ;;  %v2721_v0 = vld [vmem:[%s5613_s0 + $0x8] sm:$0xff] }
 0x8e8   :  { %2672 = vrot.lane.b32.xlu0 %v5388_v8, %s4177_s6  ;;  %1166 = vrot.lane.b32.xlu1 %v5391_v5, %s4177_s6  ;;  %4151 = vpow2.f32 %v2620_v11  ;;  %v1090_v39 = vmul.f32 %v5253_v22, %v1078_v20  ;;  %v2622_v16 = vmul.f32 1.442695, %v2599_v46  ;;  %v1079_v61 = vmul.f32 %v4144_v62, %v5241_v7  ;;  %v4146_v50 = vpop.eup %4145 }
 0x8e9   :  { %4153 = vpow2.f32 %v2610_v43  ;;  %v3290_v3 = vadd.f32 -1.0, %v4142_v59  ;;  %v2618_v41 = vmul.f32 1.442695, %v2597_v23  ;;  %v1116_v7 = vmin.f32 %v5402_v1, 0.0  ;;  %v4148_v30 = vpop.eup %4147 }
 0x8ea   :  { %v5405_v6 = vadd.f32 %v5259_v37, %v1090_v39  ;;  %4155 = vpow2.f32 %v2622_v16  ;;  %v5423_v55 = vadd.f32 %v5259_v37, %v1089_v2  ;;  %v1091_v18 = vmul.f32 %v5253_v22, %v1079_v61 }
 0x8eb   :  { %v5427_v54 = vsel %vm2576_vm14, %v5320_v32, %v3290_v3  ;;  %v3293_v44 = vadd.f32 -1.0, %v4146_v50  ;;  %v1128_v35 = vmul.f32 1.442695, %v1116_v7  ;;  %v3297_v4 = vadd.f32 -1.0, %v4148_v30 }
 0x8ec   :  { %2668 = vrot.lane.b32.xlu0 %v5410_v45, %s4177_s6  ;;  %2664 = vrot.lane.b32.xlu1 %v5413_v25, %s4177_s6  ;;  %v1118_v58 = vmin.f32 %v5405_v6, 0.0  ;;  %v1117_v52 = vmin.f32 %v5423_v55, 0.0  ;;  %v1103_v63 = vadd.f32 %v5259_v37, %v1091_v18  ;;  %vm2587_vm8 = vcmp.gt.f32.partialorder %v5375_v26, 0.0 }
 0x8ed   :  { %v5435_v22 = vsel %vm2579_vm15, %v5332_v42, %v3293_v44  ;;  %v5447_v28 = vsel %vm2583_vm5, %v5335_v24, %v3297_v4  ;;  %vm1110_vm9 = vcmp.gt.f32.partialorder %v5405_v6, 0.0  ;;  %vm1108_vm11 = vcmp.gt.f32.partialorder %v5402_v1, 0.0 }
 0x8ee   :  { %v1132_v51 = vmul.f32 1.442695, %v1118_v58  ;;  %v1130_v37 = vmul.f32 1.442695, %v1117_v52  ;;  %v1119_v42 = vmin.f32 %v1103_v63, 0.0  ;;  %vm1109_vm12 = vcmp.gt.f32.partialorder %v5423_v55, 0.0 }
 0x8ef   :  { %v4150_v10 = vpop.eup %4149  ;;  %vm1111_vm13 = vcmp.gt.f32.partialorder %v1103_v63, 0.0 }
 0x8f0   :  { %2660 = vrot.lane.b32.xlu1 %v5427_v54, %s4177_s6  ;;  %4157 = vpow2.f32 %v1132_v51  ;;  %v3298_v12 = vadd.f32 -1.0, %v4150_v10  ;;  %v1134_v49 = vmul.f32 1.442695, %v1119_v42 }
 0x8f1   :  { %4159 = vpow2.f32 %v2618_v41 }
 0x8f2   :  { %v4152_v34 = vpop.eup %4151  ;;  %4161 = vpow2.f32 %v1128_v35 }
 0x8f3   :  { %v4154_v31 = vpop.eup %4153  ;;  %v3300_v32 = vadd.f32 -1.0, %v4152_v34  ;;  %4163 = vpow2.f32 %v1130_v37 }
 0x8f4   :  { %2666 = vrot.lane.b32.xlu1 %v5435_v22, %s4177_s6  ;;  %v3295_v13 = vadd.f32 -1.0, %v4154_v31  ;;  %v4156_v43 = vpop.eup %4155  ;;  %4165 = vpow2.f32 %v1134_v49 }
 0x8f5   :  { %v5441_v19 = vsel %vm2586_vm3, %v5363_v36, %v3300_v32  ;;  %v5453_v36 = vsel %vm2584_vm6, %v5349_v38, %v3298_v12  ;;  %v3301_v59 = vadd.f32 -1.0, %v4156_v43 }
 0x8f6   :  { %2680 = vrot.lane.b32.xlu0 %v5441_v19, %s4177_s6  ;;  %v5459_v24 = vsel %vm2581_vm7, %v5343_v47, %v3295_v13 }
 0x8f7   :  { %v5468_v46 = vsel %vm2587_vm8, %v5375_v26, %v3301_v59  ;;  %v2720_v26 = vld [vmem:[%s5613_s0] sm:$0xff] }
 0x8f8   :  { %2674 = vrot.lane.b32.xlu1 %v5447_v28, %s4177_s6 }
 0x8fa   :  { %v4158_v17 = vpop.eup %4157  ;;  %2676 = vrot.lane.b32.xlu0 %v5453_v36, %s4177_s6 }
 0x8fb   :  { %v4160_v11 = vpop.eup %4159  ;;  %v3235_v38 = vadd.f32 -1.0, %v4158_v17 }
 0x8fc   :  { %2670 = vrot.lane.b32.xlu1 %v5459_v24, %s4177_s6  ;;  %v3299_v20 = vadd.f32 -1.0, %v4160_v11  ;;  %v4162_v47 = vpop.eup %4161 }
 0x8fd   :  { %v5474_v48 = vsel %vm1110_vm9, %v5405_v6, %v3235_v38  ;;  %v3233_v40 = vadd.f32 -1.0, %v4162_v47  ;;  %v4164_v39 = vpop.eup %4163 }
 0x8fe   :  { %2729 = vperm.xlu0 %3926, %v2721_v0   ;;  %v5480_v62 = vsel %vm2585_vm10, %v5379_v27, %v3299_v20  ;;  %v3234_v16 = vadd.f32 -1.0, %v4164_v39  ;;  %v4166_v6 = vpop.eup %4165 }
 0x8ff   :  { %v5489_v23 = vsel %vm1108_vm11, %v5402_v1, %v3233_v40  ;;  %v3236_v2 = vadd.f32 -1.0, %v4166_v6 }
 0x900   :  { %2682 = vrot.lane.b32.xlu1 %v5468_v46, %s4177_s6  ;;  %v5495_v27 = vsel %vm1109_vm12, %v5423_v55, %v3234_v16 }
 0x901   :  { %v5500_v1 = vsel %vm1111_vm13, %v1103_v63, %v3236_v2 }
 0x902   :  { %1172 = vrot.lane.b32.xlu0 %v5474_v48, %s4177_s6 }
 0x904   :  { %2678 = vrot.lane.b32.xlu1 %v5480_v62, %s4177_s6 }
 0x905   :  { %v1163_v61 = vpop.permute.xlu1 %1162 }
 0x906   :  { %2723 = vperm.xlu0 %3926, %v2720_v26   ;;  %v1185_v3 = vadd.f32 %v1163_v61, %v5266_v9 }
 0x908   :  { %1168 = vrot.lane.b32.xlu1 %v5489_v23, %s4177_s6  ;;  %v1193_v41 = vmul.f32 0.5, %v1185_v3 }
 0x90c   :  { %1170 = vrot.lane.b32.xlu1 %v5495_v27, %s4177_s6 }
 0x910   :  { %1174 = vrot.lane.b32.xlu1 %v5500_v1, %s4177_s6  ;;  %v1161_v50 = vpop.permute.xlu0 %1160 }
 0x911   :  { %v1184_v58 = vadd.f32 %v1161_v50, %v5270_v60 }
 0x913   :  { %v1192_v7 = vmul.f32 0.5, %v1184_v58 }
 0x915   :  { %v3848_v30 = vpack.c.bf16 %v1193_v41, %v1192_v7 }
 0x917   :  { %3849 = vmatpush3.bf16.msra.mxu0 %v3848_v30 }
 0x918   :  { %3850 = vmatprep.subr.bf16.mxu0 %v4171_v14 }
 0x952   :  { %v1165_v51 = vpop.permute.xlu0 %1164 }
 0x953   :  { %v1186_v55 = vadd.f32 %v1165_v51, %v5352_v21 }
 0x955   :  { %v1194_v10 = vmul.f32 0.5, %v1186_v55 }
 0x956   :  { %v2663_v44 = vpop.permute.xlu0 %2662 }
 0x957   :  { %v2697_v63 = vadd.f32 %v2663_v44, %v5368_v29 }
 0x959   :  { %v2709_v4 = vmul.f32 0.5, %v2697_v63  ;;  %v2884_v63 = vld [vmem:[%s5610_s1 + $0xc0] sm:$0xff] }
 0x95a   :  { %v1167_v18 = vpop.permute.xlu1 %1166  ;;  %v2673_v60 = vpop.permute.xlu0 %2672 }
 0x95b   :  { %v1187_v9 = vadd.f32 %v1167_v18, %v5391_v5 }
 0x95d   :  { %v1195_v34 = vmul.f32 0.5, %v1187_v9 }
 0x95e   :  { %v2665_v35 = vpop.permute.xlu1 %2664  ;;  %v2669_v13 = vpop.permute.xlu0 %2668 }
 0x95f   :  { %v3851_v52 = vpack.c.bf16 %v1195_v34, %v1194_v10  ;;  %v2698_v21 = vadd.f32 %v2665_v35, %v5413_v25  ;;  %v2700_v59 = vadd.f32 %v2669_v13, %v5410_v45 }
 0x961   :  { %3852 = vmatpush3.bf16.msra.mxu0 %v3851_v52  ;;  %v2710_v43 = vmul.f32 0.5, %v2698_v21  ;;  %v2712_v38 = vmul.f32 0.5, %v2700_v59 }
 0x962   :  { %v2661_v31 = vpop.permute.xlu1 %2660  ;;  %3853 = vmatprep.subr.bf16.mxu0 %v4171_v14 }
 0x963   :  { %v2696_v32 = vadd.f32 %v2661_v31, %v5427_v54  ;;  %v2886_v31 = vld [vmem:[%s5610_s1 + $0xd0] sm:$0xff] }
 0x965   :  { %v2708_v12 = vmul.f32 0.5, %v2696_v32  ;;  %v2887_v32 = vld [vmem:[%s5610_s1 + $0xd8] sm:$0xff] }
 0x966   :  { %v2667_v37 = vpop.permute.xlu1 %2666  ;;  %v3881_v21 = vpack.c.bf16 %v2887_v32, %v2886_v31  ;;  %v3175_v32 = vsub.s32 3, %v4329_v56 }
 0x967   :  { %v3860_v5 = vpack.c.bf16 %v2709_v4, %v2708_v12  ;;  %v2699_v42 = vadd.f32 %v2667_v37, %v5435_v22  ;;  %v2702_v22 = vadd.f32 %v2673_v60, %v5388_v8  ;;  %v2881_v12 = vld [vmem:[%s5610_s1 + $0xa8] sm:$0xff] }
 0x968   :  { %v2681_v0 = vpop.permute.xlu0 %2680 }
 0x969   :  { %v2711_v17 = vmul.f32 0.5, %v2699_v42  ;;  %3861 = vmatpush3.bf16.msra.mxu1 %v3860_v5  ;;  %v2714_v16 = vmul.f32 0.5, %v2702_v22  ;;  %v2706_v8 = vadd.f32 %v2681_v0, %v5441_v19  ;;  %v2882_v5 = vld [vmem:[%s5610_s1 + $0xb0] sm:$0xff]  ;;  %v2883_v42 = vld [vmem:[%s5610_s1 + $0xb8] sm:$0xff] }
 0x96a   :  { %v2675_v29 = vpop.permute.xlu1 %2674  ;;  %3862 = vmatprep.subr.bf16.mxu1 %v4171_v14 }
 0x96b   :  { %v3863_v49 = vpack.c.bf16 %v2711_v17, %v2710_v43  ;;  %v2703_v25 = vadd.f32 %v2675_v29, %v5447_v28  ;;  %v3887_v17 = vpack.c.bf16 %v2883_v42, %v2882_v5  ;;  %v3183_v42 = vsub.s32 4, %v4329_v56 }
 0x96c   :  { %v2677_v47 = vpop.permute.xlu0 %2676 }
 0x96d   :  { %3864 = vmatpush3.bf16.msra.mxu1 %v3863_v49  ;;  %v2715_v40 = vmul.f32 0.5, %v2703_v25  ;;  %v2704_v6 = vadd.f32 %v2677_v47, %v5453_v36  ;;  %v2718_v36 = vmul.f32 0.5, %v2706_v8 }
 0x96e   :  { %v2671_v54 = vpop.permute.xlu1 %2670  ;;  %3865 = vmatprep.subr.bf16.mxu1 %v4171_v14 }
 0x96f   :  { %v2701_v11 = vadd.f32 %v2671_v54, %v5459_v24  ;;  %v3869_v2 = vpack.c.bf16 %v2715_v40, %v2714_v16  ;;  %v2716_v61 = vmul.f32 0.5, %v2704_v6  ;;  %v2888_v54 = vld [vmem:[%s5610_s1 + $0xe0] sm:$0x7]  ;;  %v3065_v6 = vld [vmem:[%s5610_s1 + $0xe8] sm:$0xff] }
 0x970   :  { %v3038_v25 = vrot.slane %v2888_v54, %v4332_v57 }
 0x971   :  { %v2713_v20 = vmul.f32 0.5, %v2701_v11 }
 0x972   :  { %v2683_v26 = vpop.permute.xlu1 %2682 }
 0x973   :  { %v3866_v39 = vpack.c.bf16 %v2713_v20, %v2712_v38  ;;  %v2707_v28 = vadd.f32 %v2683_v26, %v5468_v46 }
 0x975   :  { %3867 = vmatpush3.bf16.msra.mxu1 %v3866_v39  ;;  %v2719_v58 = vmul.f32 0.5, %v2707_v28 }
 0x976   :  { %v2679_v45 = vpop.permute.xlu1 %2678  ;;  %3868 = vmatprep.subr.bf16.mxu1 %v4171_v14 }
 0x977   :  { %v2705_v24 = vadd.f32 %v2679_v45, %v5480_v62  ;;  %v3875_v46 = vpack.c.bf16 %v2719_v58, %v2718_v36  ;;  %v3066_v45 = vld [vmem:[%s5610_s1 + $0xf0] sm:$0xff]  ;;  %v3061_v58 = vsub.s32 2, %v4329_v56 }
 0x978   :  { %v3890_v28 = vpack.c.bf16 %v3066_v45, %v3065_v6 }
 0x979   :  { %v2717_v3 = vmul.f32 0.5, %v2705_v24  ;;  %3870 = vmatpush3.bf16.msra.mxu1 %v3869_v2  ;;  %v3067_v2 = vld [vmem:[%s5610_s1 + $0xf8] sm:$0xff]  ;;  %v3068_v24 = vld [vmem:[%s5610_s1 + $0x100] sm:$0xff] }
 0x97a   :  { %v1169_v50 = vpop.permute.xlu1 %1168  ;;  %3871 = vmatprep.subr.bf16.mxu1 %v4171_v14  ;;  %v3893_v8 = vpack.c.bf16 %v3068_v24, %v3067_v2 }
 0x97b   :  { %v3872_v41 = vpack.c.bf16 %v2717_v3, %v2716_v61  ;;  %v1188_v7 = vadd.f32 %v1169_v50, %v5489_v23 }
 0x97d   :  { %3873 = vmatpush3.bf16.msra.mxu1 %v3872_v41  ;;  %v2730_v30 = vpop.permute.xlu0 %2729  ;;  %v1196_v19 = vmul.f32 0.5, %v1188_v7  ;;  %v3057_v41 = vrot.slane %v2888_v54, %v4415_v53  ;;  %v3062_v7 = vrot.slane %v2888_v54, %v3061_v58 }
 0x97e   :  { %v1171_v51 = vpop.permute.xlu1 %1170  ;;  %3874 = vmatprep.subr.bf16.mxu1 %v4171_v14  ;;  %vm2731_vm14 = vcmp.eq.s32.totalorder %v4833_v33, %v2730_v30 }
 0x97f   :  { %v1189_v62 = vadd.f32 %v1171_v51, %v5495_v27  ;;  %v3303_v10 = vsel %vm2731_vm14, 1.0, %v4173_v15 }
 0x981   :  { %v1197_v55 = vmul.f32 0.5, %v1189_v62  ;;  %3876 = vmatpush3.bf16.msra.mxu1 %v3875_v46  ;;  %v1173_v18 = vpop.permute.xlu0 %1172 }
 0x982   :  { %v1190_v9 = vadd.f32 %v1173_v18, %v5474_v48  ;;  %v1175_v44 = vpop.permute.xlu1 %1174  ;;  %v2885_v48 = vld [vmem:[%s5610_s1 + $0xc8] sm:$0xff] }
 0x983   :  { %v3854_v23 = vpack.c.bf16 %v1197_v55, %v1196_v19  ;;  %v1191_v34 = vadd.f32 %v1175_v44, %v5500_v1  ;;  %v3878_v1 = vpack.c.bf16 %v2885_v48, %v2884_v63 }
 0x984   :  { %v1198_v35 = vmul.f32 0.5, %v1190_v9  ;;  %3756 = vmatmul.mubr.msk.f32.vlgmr.msra.gmra.mrb[32].mxu1 %vm1737_vm4, %v3303_v10 }
 0x985   :  { %v1199_v52 = vmul.f32 0.5, %v1191_v34  ;;  %3855 = vmatpush3.bf16.msra.mxu0 %v3854_v23  ;;  %v2724_v27 = vpop.permute.xlu0 %2723 }
 0x986   :  { %3856 = vmatprep.subr.bf16.mxu0 %v4171_v14  ;;  %vm2725_vm15 = vcmp.eq.s32.totalorder %v4833_v33, %v2724_v27  ;;  %v2880_v33 = vld [vmem:[%s5610_s1 + $0xa0] sm:$0xff] }
 0x987   :  { %v3857_v60 = vpack.c.bf16 %v1199_v52, %v1198_v35  ;;  %v3302_v4 = vsel %vm2725_vm15, 1.0, %v4173_v15  ;;  %v3884_v37 = vpack.c.bf16 %v2881_v12, %v2880_v33 }
 0x989   :  { %3858 = vmatpush3.bf16.msra.mxu0 %v3857_v60 }
 0x98a   :  { %3877 = vmatprep.subr.bf16.mxu0 %v4171_v14 }
 0x98c   :  { %3729 = vmatmul.mubr.msk.f32.vlgmr.msra.gmra.mrb[52].mxu0 %vm220_vm2, %v3302_v4 }
 0x98d   :  { %3879 = vmatpush3.bf16.msra.mxu0 %v3878_v1  ;;  %3766 = vmatprep.mubr.msk.f32.mxu0 %vm4172_vm1, %v4173_v15 }
 0x98e   :  { %3880 = vmatprep.subr.bf16.mxu0 %v4171_v14 }
 0x991   :  { %3882 = vmatpush3.bf16.msra.mxu0 %v3881_v21 }
 0x992   :  { %3883 = vmatprep.subr.bf16.mxu0 %v4171_v14 }
 0xa57   :  { %v2876_v13 = vpop.f32.mrb[32].mxu1 }
 0xa58   :  { %v3757_v43 = vpop.f32.mrb[33].mxu1  ;;  %3767 = vmatmul.mubr.msk.f32.vlgmr.msra.gmra.mrb[54].mxu0 %vm90_vm0, %v2876_v13 }
 0xa59   :  { %3885 = vmatpush3.bf16.msra.mxu0 %v3884_v37  ;;  %3777 = vmatprep.mubr.msk.f32.mxu0 %vm4172_vm1, %v4173_v15 }
 0xa5a   :  { %3886 = vmatprep.subr.bf16.mxu0 %v4171_v14 }
 0xa5d   :  { %3888 = vmatpush3.bf16.msra.mxu0 %v3887_v17 }
 0xa5e   :  { %3889 = vmatprep.subr.bf16.mxu0 %v4171_v14 }
 0xa5f   :  { %v2803_v29 = vpop.f32.mrb[52].mxu0 }
 0xa60   :  { %v3730_v49 = vpop.f32.mrb[53].mxu0  ;;  %3778 = vmatmul.mubr.msk.f32.vlgmr.msra.gmra.mrb[56].mxu0 %vm90_vm0, %v2803_v29 }
 0xa61   :  { %3788 = vmatprep.mubr.msk.f32.mxu0 %vm4172_vm1, %v4173_v15  ;;  %3891 = vmatpush3.bf16.msra.mxu0 %v3890_v28  ;;  %vm3147_vm1 = vcmask 130048  }
 0xa62   :  { %3892 = vmatprep.subr.bf16.mxu0 %v4171_v14  ;;  %v3069_v14 = vld [vmem:[%s5610_s1 + $0x108] sm:$0x1f] }
 0xa63   :  { %v3073_v19 = vrot.slane %v3069_v14, %v4332_v57  ;;  %v3165_v57 = vrot.slane %v3069_v14, %v4415_v53  ;;  %v3170_v31 = vrot.slane %v3069_v14, %v3061_v58  ;;  %v3176_v33 = vrot.slane %v3069_v14, %v3175_v32 }
 0xa64   :  { %v3184_v13 = vrot.slane %v3069_v14, %v3183_v42 }
 0xa65   :  { %3894 = vmatpush3.bf16.msra.mxu0 %v3893_v8 }
 0xb2b   :  { %v2958_v0 = vpop.f32.mrb[54].mxu0 }
 0xb2c   :  { %v3768_v59 = vpop.f32.mrb[55].mxu0 }
 0xb33   :  { %v3031_v11 = vpop.f32.mrb[56].mxu0 }
 0xb34   :  { %v3032_v22 = vadd.f32 %v3031_v11, %v2958_v0  ;;  %v3779_v38 = vpop.f32.mrb[57].mxu0 }
 0xb36   :  { %v3039_v20 = vadd.f32 %v3038_v25, %v3032_v22 }
 0xb38   :  { %v3040_v47 = vsel %vm90_vm0, %v3039_v20, 0.0 }
 0xb39   :  { %3041 = vadd.xlane.f32.xlu1 %v3040_v47 }
 0xbc6   :  { %v3042_v26 = vpop.xlane.xlu1 %3041 }
 0xbc7   :  { %v3044_v40 = vmul.f32 0.03125, %v3042_v26 }
 0xbc9   :  { %v3045_v39 = vsub.f32 %v3039_v20, %v3044_v40 }
 0xbcb   :  { %v3046_v16 = vmul.f32 %v3045_v39, %v3045_v39 }
 0xbcd   :  { %v3047_v15 = vsel %vm90_vm0, %v3046_v16, 0.0 }
 0xbce   :  { %3048 = vadd.xlane.f32.xlu0 %v3047_v15 }
 0xc5b   :  { %v3049_v61 = vpop.xlane.xlu0 %3048 }
 0xc5c   :  { %v3050_v3 = vmul.f32 0.03125, %v3049_v61 }
 0xc5e   :  { %v3051_v50 = vadd.f32 1e-05, %v3050_v3 }
 0xc60   :  { %4167 = vrsqrt.f32 %v3051_v50 }
 0xc6a   :  { %v4168_v36 = vpop.eup %4167 }
 0xc6b   :  { %v3053_v30 = vmul.f32 %v4168_v36, %v3045_v39 }
 0xc6d   :  { %v3058_v51 = vmul.f32 %v3057_v41, %v3053_v30 }
 0xc6f   :  { %v3063_v46 = vadd.f32 %v3062_v7, %v3058_v51 }
 0xc71   :  { %v3064_v62 = vmax.f32 %v3063_v46, 0.0 }
 0xc73   :  { %3789 = vmatmul.mubr.msk.f32.vlgmr.msra.gmra.mrb[58].mxu0 %vm90_vm0, %v3064_v62  ;;  %vm3186_vm0 = vcmask 7168  }
 0xd46   :  { %v3143_v55 = vpop.f32.mrb[58].mxu0 }
 0xd47   :  { %v3144_v18 = vadd.f32 %v3143_v55, %v3073_v19  ;;  %v3790_v9 = vpop.f32.mrb[59].mxu0 }
 0xd49   :  { %v3148_v44 = vsel %vm3147_vm1, %v3144_v18, 0.0 }
 0xd4a   :  { %3149 = vadd.xlane.f32.xlu0 %v3148_v44 }
 0xdd7   :  { %v3150_v10 = vpop.xlane.xlu0 %3149 }
 0xdd8   :  { %v3152_v23 = vmul.f32 0.0625, %v3150_v10 }
 0xdda   :  { %v3153_v34 = vsub.f32 %v3144_v18, %v3152_v23 }
 0xddc   :  { %v3154_v35 = vmul.f32 %v3153_v34, %v3153_v34 }
 0xdde   :  { %v3155_v52 = vsel %vm3147_vm1, %v3154_v35, 0.0 }
 0xddf   :  { %3156 = vadd.xlane.f32.xlu1 %v3155_v52 }
 0xe6c   :  { %v3157_v27 = vpop.xlane.xlu1 %3156 }
 0xe6d   :  { %v3158_v63 = vmul.f32 0.0625, %v3157_v27 }
 0xe6f   :  { %v3159_v48 = vadd.f32 1e-05, %v3158_v63 }
 0xe71   :  { %4169 = vrsqrt.f32 %v3159_v48 }
 0xe7b   :  { %v4170_v60 = vpop.eup %4169 }
 0xe7c   :  { %v3161_v1 = vmul.f32 %v4170_v60, %v3153_v34 }
 0xe7e   :  { %v3166_v4 = vmul.f32 %v3165_v57, %v3161_v1 }
 0xe80   :  { %v3171_v21 = vadd.f32 %v3170_v31, %v3166_v4 }
 0xe82   :  { %v3172_v12 = vmax.f32 %v3171_v21, 0.0 }
 0xe84   :  { %v3177_v37 = vmul.f32 %v3176_v33, %v3172_v12 }
 0xe86   :  { %v3178_v5 = vsel %vm3147_vm1, %v3177_v37, 0.0 }
 0xe87   :  { %3179 = vadd.xlane.f32.xlu0 %v3178_v5 }
 0xf14   :  { %v3180_v43 = vpop.xlane.xlu0 %3179 }
 0xf15   :  { %v3185_v17 = vadd.f32 %v3184_v13, %v3180_v43 }
 0xf17   :  { %3187 = vst.msk [vmem:[%s5614_s5] sm:$0xff] %vm3186_vm0, %v3185_v17 }

</bundles_post_ra>
